<compile_context>
chip_gen: v7x
topology: tpu7x:2x2x1
jax: 0.10.0
libtpu: 0.0.40
codegen_flags: <defaults>
</compile_context>

<pallas_src>
import jax
import jax.numpy as jnp
from jax.experimental import pallas as pl
from jax.experimental.pallas import tpu as pltpu

jax.config.update("jax_default_matmul_precision", "highest")


# ------------------------------ parameters ---------------------------------- #

def init_params(key, num_nodes, in_channels, temporal_channels, kt, spacial_channels):
    ks = jax.random.split(key, 10)
    u = lambda k, shp, s=0.3: jax.random.uniform(k, shp, jnp.float32, -s, s)
    p = {}
    # tc1: Conv2d(in_channels, 2*temporal_channels, (1, kt))   [GLU]
    p["tc1_conv_w"] = u(ks[0], (2 * temporal_channels, in_channels, 1, kt))
    p["tc1_conv_b"] = u(ks[1], (2 * temporal_channels,))
    # gc: weight [oc, oc], bias [1, oc]
    p["gc_w"] = u(ks[2], (spacial_channels, spacial_channels))
    p["gc_b"] = u(ks[3], (1, spacial_channels))
    # tc2: Conv2d(spacial_channels, temporal_channels, (1, kt))  [relu]
    p["tc2_conv_w"] = u(ks[4], (temporal_channels, spacial_channels, 1, kt))
    p["tc2_conv_b"] = u(ks[5], (temporal_channels,))
    # tc2.tca: Conv2d(spacial_channels, temporal_channels, (1, 1)) (in > out branch)
    p["tc2_tca_w"] = u(ks[6], (temporal_channels, spacial_channels, 1, 1))
    p["tc2_tca_b"] = u(ks[7], (temporal_channels,))
    # LayerNorm([num_nodes, temporal_channels])
    p["ln_g"] = 1.0 + u(ks[8], (num_nodes, temporal_channels), 0.1)
    p["ln_b"] = u(ks[9], (num_nodes, temporal_channels), 0.1)
    return p


# ----------------------- one-time weight re-layout (JAX glue) ---------------- #

def prepare_params(params, *, num_nodes, in_channels, temporal_channels, kt, spacial_channels):
    n, cin, tc, sc = num_nodes, in_channels, temporal_channels, spacial_channels
    assert cin < tc < sc  # channel-align paths exercised by this STConvBlock config
    eye_n = jnp.eye(n, dtype=jnp.float32)

    # ---- tc1 (GLU): fold the in<out TemporalChannelAlign zero-pad into tap kt-1 of p.
    w1 = params["tc1_conv_w"][:, :, 0, :]                  # (2*tc, cin, kt)  [o, c, k]
    wp = jnp.transpose(w1[:tc], (2, 1, 0))                 # (kt, cin, tc)    [k, c, o]
    wq = jnp.transpose(w1[tc:], (2, 1, 0))                 # (kt, cin, tc)
    wp = wp.at[kt - 1].add(jnp.eye(cin, tc, dtype=jnp.float32))   # "+ x_tca" folded in
    # block-diagonal per-node weights, output lanes laid out as [all-p (N*tc) | all-q (N*tc)]
    w1bd = jnp.stack([
        jnp.concatenate([jnp.kron(eye_n, wp[k]), jnp.kron(eye_n, wq[k])], axis=1)
        for k in range(kt)])                               # (kt, n*cin, 2*n*tc)
    bp = params["tc1_conv_b"][:tc].reshape(1, tc)
    bq = params["tc1_conv_b"][tc:].reshape(1, tc)
    b1row = jnp.concatenate([jnp.tile(bp, (1, n)), jnp.tile(bq, (1, n))], axis=1)  # (1, 2*n*tc)

    # ---- gc ('Linear'): padded channels of x_gca are zero -> X@W only needs the top rows of W.
    w_fc_bd = jnp.kron(eye_n, params["gc_w"][:tc, :])                   # (n*tc, n*sc)
    w_gca_bd = jnp.kron(eye_n, jnp.eye(tc, sc, dtype=jnp.float32))      # (n*tc, n*sc) pad-projection

    # ---- tc2 (relu): fold the in>out 1x1 TemporalChannelAlign conv (+ its bias) into tap kt-1.
    w2 = jnp.transpose(params["tc2_conv_w"][:, :, 0, :], (2, 1, 0))     # (kt, sc, tc)
    w2 = w2.at[kt - 1].add(params["tc2_tca_w"][:, :, 0, 0].T)
    w2bd = jnp.stack([jnp.kron(eye_n, w2[k]) for k in range(kt)])       # (kt, n*sc, n*tc)
    b2 = (params["tc2_conv_b"] + params["tc2_tca_b"]).reshape(1, tc)
    b2row = jnp.tile(b2, (1, n))                                        # (1, n*tc)

    return {
        "w1bd": w1bd, "b1row": b1row,
        "w_gca_bd": w_gca_bd, "w_fc_bd": w_fc_bd, "gc_b": params["gc_b"],
        "w2bd": w2bd, "b2row": b2row,
        "ln_g": params["ln_g"].reshape(1, n * tc),
        "ln_b": params["ln_b"].reshape(1, n * tc),
    }


# ------------------------------ fused forward -------------------------------- #

def build_stconv_forward(*, batch, time_steps, num_nodes, in_channels,
                         temporal_channels, kt, spacial_channels):
    B, T, N = batch, time_steps, num_nodes
    cin, tc, sc = in_channels, temporal_channels, spacial_channels
    T1 = T - kt + 1
    T2 = T1 - kt + 1
    f32 = jnp.float32

    # --------- kernel A: tc1 (GLU, tca folded) + gca-pad + X@W of the graph conv ---------
    def tc1_gc_kernel(x_ref, w_ref, b_ref, wgca_ref, wfc_ref, xgca_ref, fc_ref):
        x = x_ref[0]                                                   # (T, N*cin)
        acc = jnp.dot(x[0:T1, :], w_ref[0], preferred_element_type=f32)
        for k in range(1, kt):                                         # unrolled: kt taps
            acc = acc + jnp.dot(x[k:k + T1, :], w_ref[k], preferred_element_type=f32)
        acc = acc + b_ref[...]                                         # (T1, 2*N*tc)
        p = acc[:, :N * tc]
        q = acc[:, N * tc:]
        out1 = p * jax.nn.sigmoid(q)                                   # (T1, N*tc)
        xgca_ref[0] = jnp.dot(out1, wgca_ref[...], preferred_element_type=f32)
        fc_ref[0] = jnp.dot(out1, wfc_ref[...], preferred_element_type=f32)

    tc1_gc = pl.pallas_call(
        tc1_gc_kernel,
        out_shape=(jax.ShapeDtypeStruct((B, T1, N * sc), f32),   # x_gca (residual)
                   jax.ShapeDtypeStruct((B, T1, N * sc), f32)),  # fc = x_gca @ W
        grid=(B,),
        in_specs=[
            pl.BlockSpec((1, T, N * cin), lambda b: (b, 0, 0)),
            pl.BlockSpec((kt, N * cin, 2 * N * tc), lambda b: (0, 0, 0)),
            pl.BlockSpec((1, 2 * N * tc), lambda b: (0, 0)),
            pl.BlockSpec((N * tc, N * sc), lambda b: (0, 0)),
            pl.BlockSpec((N * tc, N * sc), lambda b: (0, 0)),
        ],
        out_specs=(pl.BlockSpec((1, T1, N * sc), lambda b: (b, 0, 0)),
                   pl.BlockSpec((1, T1, N * sc), lambda b: (b, 0, 0))),
        compiler_params=pltpu.CompilerParams(dimension_semantics=("arbitrary",)),
    )

    # --------- kernel B: graph matmul + bias + residual + relu (reshaped layout) ---------
    def graph_gc_kernel(a_ref, fc2_ref, xg_ref, bias_ref, o_ref):
        g = jnp.dot(a_ref[...], fc2_ref[...], preferred_element_type=f32)
        o_ref[...] = jnp.maximum(g + bias_ref[...] + xg_ref[...], 0.0)

    graph_gc = pl.pallas_call(
        graph_gc_kernel,
        out_shape=jax.ShapeDtypeStruct((N, B * T1 * sc), f32),
    )

    # --------- kernel C: tc2 (relu, 1x1 tca folded) + LayerNorm([N, C]) epilogue ---------
    def tc2_ln_kernel(x_ref, w_ref, b_ref, g_ref, beta_ref, o_ref):
        x = x_ref[0]                                                   # (T1, N*sc)
        acc = jnp.dot(x[0:T2, :], w_ref[0], preferred_element_type=f32)
        for k in range(1, kt):
            acc = acc + jnp.dot(x[k:k + T2, :], w_ref[k], preferred_element_type=f32)
        h = jnp.maximum(acc + b_ref[...], 0.0)                         # (T2, N*tc)
        # LayerNorm over [N, tc] == lane-axis reduction over exactly N*tc lanes per row.
        mu = jnp.mean(h, axis=-1, keepdims=True)
        var = jnp.mean((h - mu) ** 2, axis=-1, keepdims=True)
        inv = jax.lax.rsqrt(var + 1e-5)
        o_ref[0] = (h - mu) * inv * g_ref[...] + beta_ref[...]

    tc2_ln = pl.pallas_call(
        tc2_ln_kernel,
        out_shape=jax.ShapeDtypeStruct((B, T2, N * tc), f32),
        grid=(B,),
        in_specs=[
            pl.BlockSpec((1, T1, N * sc), lambda b: (b, 0, 0)),
            pl.BlockSpec((kt, N * sc, N * tc), lambda b: (0, 0, 0)),
            pl.BlockSpec((1, N * tc), lambda b: (0, 0)),
            pl.BlockSpec((1, N * tc), lambda b: (0, 0)),
            pl.BlockSpec((1, N * tc), lambda b: (0, 0)),
        ],
        out_specs=pl.BlockSpec((1, T2, N * tc), lambda b: (b, 0, 0)),
        compiler_params=pltpu.CompilerParams(dimension_semantics=("arbitrary",)),
    )

    def forward(x, graph_kernel, prep):
        # x: (B, T, N, cin) -> lane-dense (B, T, N*cin)  (free bitcast)
        x2 = x.reshape(B, T, N * cin)
        x_gca, fc = tc1_gc(x2, prep["w1bd"], prep["b1row"],
                           prep["w_gca_bd"], prep["w_fc_bd"])
        # torch's fc.reshape(num_nodes, -1) quirk: free row-major HBM bitcasts.
        fc2 = fc.reshape(N, B * T1 * sc)
        xg_g = x_gca.reshape(N, B * T1 * sc)
        bias_g = jnp.tile(prep["gc_b"], (1, B * T1))                   # (1, B*T1*sc)
        out2_g = graph_gc(graph_kernel, fc2, xg_g, bias_g)
        out2 = out2_g.reshape(B, T1, N * sc)                           # back to (b, t, n*c)
        out4 = tc2_ln(out2, prep["w2bd"], prep["b2row"], prep["ln_g"], prep["ln_b"])
        return out4.reshape(B, T2, N, tc)

    return jax.jit(forward)


# ------------------------- pure-JAX reference (for check) ------------------- #

def ref_forward(x, graph_kernel, params, *, kt, temporal_channels, spacial_channels):
    B, T, N, Cin = x.shape
    tc_ch, sc_ch = temporal_channels, spacial_channels
    T1 = T - kt + 1
    # tc1 (GLU)
    x_tca1 = jnp.pad(x, ((0, 0), (0, 0), (0, 0), (0, tc_ch - Cin)))[:, kt - 1:, :, :]
    conv1 = jnp.zeros((B, T1, N, 2 * tc_ch), jnp.float32)
    Wc1 = params["tc1_conv_w"]
    for k in range(kt):
        conv1 = conv1 + jnp.einsum("btnc,oc->btno", x[:, k:k + T1], Wc1[:, :, 0, k])
    conv1 = conv1 + params["tc1_conv_b"]
    p, q = conv1[..., :tc_ch], conv1[..., tc_ch:]
    out1 = (p + x_tca1) * jax.nn.sigmoid(q)
    # gc + relu
    x_gca = jnp.pad(out1, ((0, 0), (0, 0), (0, 0), (0, sc_ch - tc_ch)))
    fc = (x_gca.reshape(-1, sc_ch) @ params["gc_w"]).reshape(N, -1)
    gc_out = (graph_kernel @ fc).reshape(B, T1, N, sc_ch) + params["gc_b"] + x_gca
    out2 = jnp.maximum(gc_out, 0.0)
    # tc2 (relu)
    T2 = T1 - kt + 1
    Wt = params["tc2_tca_w"][:, :, 0, 0]
    x_tca2 = (jnp.einsum("btnc,oc->btno", out2, Wt) + params["tc2_tca_b"])[:, kt - 1:, :, :]
    conv2 = jnp.zeros((B, T2, N, tc_ch), jnp.float32)
    Wc2 = params["tc2_conv_w"]
    for k in range(kt):
        conv2 = conv2 + jnp.einsum("btnc,oc->btno", out2[:, k:k + T2], Wc2[:, :, 0, k])
    conv2 = conv2 + params["tc2_conv_b"]
    out3 = jnp.maximum(conv2 + x_tca2, 0.0)
    # LayerNorm([N, tc_ch])
    mu = out3.mean(axis=(-2, -1), keepdims=True)
    var = ((out3 - mu) ** 2).mean(axis=(-2, -1), keepdims=True)
    return (out3 - mu) / jnp.sqrt(var + 1e-5) * params["ln_g"] + params["ln_b"]


# ---------------------------------- main ------------------------------------ #

if __name__ == "__main__":
    B, T, N = 2, 12, 16
    in_ch, tc_ch, kt, sc_ch = 4, 8, 3, 16  # num_nodes=16, graph_conv_approx='Linear'

    key = jax.random.PRNGKey(0)
    kx, kk, kp = jax.random.split(key, 3)
    x = jax.random.normal(kx, (B, T, N, in_ch), jnp.float32)
    # dense stand-in for the (semantically dense) sparse graph kernel [N, N]
    graph_kernel = jax.random.uniform(kk, (N, N), jnp.float32, -0.2, 0.2)
    params = init_params(kp, N, in_ch, tc_ch, kt, sc_ch)

    prep = prepare_params(params, num_nodes=N, in_channels=in_ch,
                          temporal_channels=tc_ch, kt=kt, spacial_channels=sc_ch)
    fwd = build_stconv_forward(batch=B, time_steps=T, num_nodes=N, in_channels=in_ch,
                               temporal_channels=tc_ch, kt=kt, spacial_channels=sc_ch)

    out = jax.block_until_ready(fwd(x, graph_kernel, prep))

    ref = ref_forward(x, graph_kernel, params, kt=kt,
                      temporal_channels=tc_ch, spacial_channels=sc_ch)
    assert out.shape == (B, T - 2 * (kt - 1), N, tc_ch), out.shape
    err = float(jnp.max(jnp.abs(out - ref)))
    assert jnp.allclose(out, ref, rtol=2e-3, atol=2e-3), f"max abs err = {err}"
    print("KERNEL_OK")
</pallas_src>

<mosaic_0001>
module attributes {stable_mosaic.version = 11 : i64} {
  func.func @tc1_gc_kernel(%arg0: i32, %arg1: memref<1x12x64xf32, #tpu.memory_space<vmem>>, %arg2: memref<3x64x256xf32, #tpu.memory_space<vmem>>, %arg3: memref<1x256xf32, #tpu.memory_space<vmem>>, %arg4: memref<128x256xf32, #tpu.memory_space<vmem>>, %arg5: memref<128x256xf32, #tpu.memory_space<vmem>>, %arg6: memref<1x10x256xf32, #tpu.memory_space<vmem>>, %arg7: memref<1x10x256xf32, #tpu.memory_space<vmem>>) attributes {dimension_semantics = [#tpu.dimension_semantics<arbitrary>], iteration_bounds = array<i64: 2>, scalar_prefetch = 0 : i64, scratch_operands = 0 : i64, tpu.core_type = #tpu.core_type<tc>, window_params = [{transform_indices = @transform_0, window_bounds = array<i64: 1, 12, 64>}, {pipeline_mode = #tpu.pipeline_mode<synchronous>, transform_indices = @transform_1, window_bounds = array<i64: 3, 64, 256>}, {pipeline_mode = #tpu.pipeline_mode<synchronous>, transform_indices = @transform_2, window_bounds = array<i64: 1, 256>}, {pipeline_mode = #tpu.pipeline_mode<synchronous>, transform_indices = @transform_3, window_bounds = array<i64: 128, 256>}, {pipeline_mode = #tpu.pipeline_mode<synchronous>, transform_indices = @transform_4, window_bounds = array<i64: 128, 256>}, {transform_indices = @transform_5, window_bounds = array<i64: 1, 10, 256>}, {transform_indices = @transform_6, window_bounds = array<i64: 1, 10, 256>}]} {
    %c0 = arith.constant 0 : index
    %c0_0 = arith.constant 0 : index
    %c0_1 = arith.constant 0 : index
    %0 = vector.load %arg1[%c0, %c0_0, %c0_1] : memref<1x12x64xf32, #tpu.memory_space<vmem>>, vector<1x12x64xf32>
    %1 = vector.shape_cast %0 : vector<1x12x64xf32> to vector<12x64xf32>
    %2 = vector.extract_strided_slice %1 {offsets = [0, 0], sizes = [10, 64], strides = [1, 1]} : vector<12x64xf32> to vector<10x64xf32>
    %c0_2 = arith.constant 0 : index
    %c0_3 = arith.constant 0 : index
    %c0_4 = arith.constant 0 : index
    %3 = vector.load %arg2[%c0_2, %c0_3, %c0_4] : memref<3x64x256xf32, #tpu.memory_space<vmem>>, vector<1x64x256xf32>
    %4 = vector.shape_cast %3 : vector<1x64x256xf32> to vector<64x256xf32>
    %cst = arith.constant dense<0.000000e+00> : vector<10x256xf32>
    %5 = tpu.matmul %2, %4, %cst {dimension_numbers = #tpu.dot_dimension_numbers<[1], [0], [0], [1], [0, 0, 1, 1], [], []>, precision = #tpu.contract_precision<fp32>} : vector<10x64xf32>, vector<64x256xf32>, vector<10x256xf32> -> vector<10x256xf32>
    %6 = vector.extract_strided_slice %1 {offsets = [1, 0], sizes = [10, 64], strides = [1, 1]} : vector<12x64xf32> to vector<10x64xf32>
    %c1 = arith.constant 1 : index
    %c0_5 = arith.constant 0 : index
    %c0_6 = arith.constant 0 : index
    %7 = vector.load %arg2[%c1, %c0_5, %c0_6] : memref<3x64x256xf32, #tpu.memory_space<vmem>>, vector<1x64x256xf32>
    %8 = vector.shape_cast %7 : vector<1x64x256xf32> to vector<64x256xf32>
    %cst_7 = arith.constant dense<0.000000e+00> : vector<10x256xf32>
    %9 = tpu.matmul %6, %8, %cst_7 {dimension_numbers = #tpu.dot_dimension_numbers<[1], [0], [0], [1], [0, 0, 1, 1], [], []>, precision = #tpu.contract_precision<fp32>} : vector<10x64xf32>, vector<64x256xf32>, vector<10x256xf32> -> vector<10x256xf32>
    %10 = arith.addf %5, %9 : vector<10x256xf32>
    %11 = vector.extract_strided_slice %1 {offsets = [2, 0], sizes = [10, 64], strides = [1, 1]} : vector<12x64xf32> to vector<10x64xf32>
    %c2 = arith.constant 2 : index
    %c0_8 = arith.constant 0 : index
    %c0_9 = arith.constant 0 : index
    %12 = vector.load %arg2[%c2, %c0_8, %c0_9] : memref<3x64x256xf32, #tpu.memory_space<vmem>>, vector<1x64x256xf32>
    %13 = vector.shape_cast %12 : vector<1x64x256xf32> to vector<64x256xf32>
    %cst_10 = arith.constant dense<0.000000e+00> : vector<10x256xf32>
    %14 = tpu.matmul %11, %13, %cst_10 {dimension_numbers = #tpu.dot_dimension_numbers<[1], [0], [0], [1], [0, 0, 1, 1], [], []>, precision = #tpu.contract_precision<fp32>} : vector<10x64xf32>, vector<64x256xf32>, vector<10x256xf32> -> vector<10x256xf32>
    %15 = arith.addf %10, %14 : vector<10x256xf32>
    %c0_11 = arith.constant 0 : index
    %c0_12 = arith.constant 0 : index
    %16 = vector.load %arg3[%c0_11, %c0_12] : memref<1x256xf32, #tpu.memory_space<vmem>>, vector<1x256xf32>
    %17 = vector.broadcast %16 : vector<1x256xf32> to vector<10x256xf32>
    %18 = arith.addf %15, %17 : vector<10x256xf32>
    %19 = vector.extract_strided_slice %18 {offsets = [0, 0], sizes = [10, 128], strides = [1, 1]} : vector<10x256xf32> to vector<10x128xf32>
    %20 = vector.extract_strided_slice %18 {offsets = [0, 128], sizes = [10, 128], strides = [1, 1]} : vector<10x256xf32> to vector<10x128xf32>
    %21 = arith.negf %20 : vector<10x128xf32>
    %22 = math.exp %21 : vector<10x128xf32>
    %cst_13 = arith.constant 1.000000e+00 : f32
    %23 = vector.broadcast %cst_13 : f32 to vector<10x128xf32>
    %24 = arith.addf %23, %22 : vector<10x128xf32>
    %25 = arith.divf %23, %24 : vector<10x128xf32>
    %26 = arith.mulf %19, %25 : vector<10x128xf32>
    %c0_14 = arith.constant 0 : index
    %c0_15 = arith.constant 0 : index
    %27 = vector.load %arg4[%c0_14, %c0_15] : memref<128x256xf32, #tpu.memory_space<vmem>>, vector<128x256xf32>
    %cst_16 = arith.constant dense<0.000000e+00> : vector<10x256xf32>
    %28 = tpu.matmul %26, %27, %cst_16 {dimension_numbers = #tpu.dot_dimension_numbers<[1], [0], [0], [1], [0, 0, 1, 1], [], []>, precision = #tpu.contract_precision<fp32>} : vector<10x128xf32>, vector<128x256xf32>, vector<10x256xf32> -> vector<10x256xf32>
    %c0_17 = arith.constant 0 : index
    %c0_18 = arith.constant 0 : index
    %c0_19 = arith.constant 0 : index
    %29 = vector.load %arg6[%c0_17, %c0_18, %c0_19] : memref<1x10x256xf32, #tpu.memory_space<vmem>>, vector<1x10x256xf32>
    %30 = vector.shape_cast %29 : vector<1x10x256xf32> to vector<10x256xf32>
    %31 = vector.shape_cast %28 : vector<10x256xf32> to vector<1x10x256xf32>
    tpu.vector_store %arg6[%c0_17, %c0_18, %c0_19], %31 {strides = array<i32>} : memref<1x10x256xf32, #tpu.memory_space<vmem>>, vector<1x10x256xf32>,
    %c0_20 = arith.constant 0 : index
    %c0_21 = arith.constant 0 : index
    %32 = vector.load %arg5[%c0_20, %c0_21] : memref<128x256xf32, #tpu.memory_space<vmem>>, vector<128x256xf32>
    %cst_22 = arith.constant dense<0.000000e+00> : vector<10x256xf32>
    %33 = tpu.matmul %26, %32, %cst_22 {dimension_numbers = #tpu.dot_dimension_numbers<[1], [0], [0], [1], [0, 0, 1, 1], [], []>, precision = #tpu.contract_precision<fp32>} : vector<10x128xf32>, vector<128x256xf32>, vector<10x256xf32> -> vector<10x256xf32>
    %c0_23 = arith.constant 0 : index
    %c0_24 = arith.constant 0 : index
    %c0_25 = arith.constant 0 : index
    %34 = vector.load %arg7[%c0_23, %c0_24, %c0_25] : memref<1x10x256xf32, #tpu.memory_space<vmem>>, vector<1x10x256xf32>
    %35 = vector.shape_cast %34 : vector<1x10x256xf32> to vector<10x256xf32>
    %36 = vector.shape_cast %33 : vector<10x256xf32> to vector<1x10x256xf32>
    tpu.vector_store %arg7[%c0_23, %c0_24, %c0_25], %36 {strides = array<i32>} : memref<1x10x256xf32, #tpu.memory_space<vmem>>, vector<1x10x256xf32>,
    return
  }
  func.func @transform_0(%arg0: i32) -> (i32, i32, i32) {
    %c0_i32 = arith.constant 0 : i32
    %c0_i32_0 = arith.constant 0 : i32
    %c0_i32_1 = arith.constant 0 : i32
    return %arg0, %c0_i32, %c0_i32_0 : i32, i32, i32
  }
  func.func @transform_1(%arg0: i32) -> (i32, i32, i32) {
    %c0_i32 = arith.constant 0 : i32
    %c0_i32_0 = arith.constant 0 : i32
    %c0_i32_1 = arith.constant 0 : i32
    %c0_i32_2 = arith.constant 0 : i32
    return %c0_i32, %c0_i32_0, %c0_i32_1 : i32, i32, i32
  }
  func.func @transform_2(%arg0: i32) -> (i32, i32) {
    %c0_i32 = arith.constant 0 : i32
    %c0_i32_0 = arith.constant 0 : i32
    %c0_i32_1 = arith.constant 0 : i32
    return %c0_i32, %c0_i32_0 : i32, i32
  }
  func.func @transform_3(%arg0: i32) -> (i32, i32) {
    %c0_i32 = arith.constant 0 : i32
    %c0_i32_0 = arith.constant 0 : i32
    %c0_i32_1 = arith.constant 0 : i32
    return %c0_i32, %c0_i32_0 : i32, i32
  }
  func.func @transform_4(%arg0: i32) -> (i32, i32) {
    %c0_i32 = arith.constant 0 : i32
    %c0_i32_0 = arith.constant 0 : i32
    %c0_i32_1 = arith.constant 0 : i32
    return %c0_i32, %c0_i32_0 : i32, i32
  }
  func.func @transform_5(%arg0: i32) -> (i32, i32, i32) {
    %c0_i32 = arith.constant 0 : i32
    %c0_i32_0 = arith.constant 0 : i32
    %c0_i32_1 = arith.constant 0 : i32
    return %arg0, %c0_i32, %c0_i32_0 : i32, i32, i32
  }
  func.func @transform_6(%arg0: i32) -> (i32, i32, i32) {
    %c0_i32 = arith.constant 0 : i32
    %c0_i32_0 = arith.constant 0 : i32
    %c0_i32_1 = arith.constant 0 : i32
    return %arg0, %c0_i32, %c0_i32_0 : i32, i32, i32
  }
}

module attributes {stable_mosaic.version = 11 : i64} {
  func.func @graph_gc_kernel(%arg0: memref<16x16xf32, #tpu.memory_space<vmem>>, %arg1: memref<16x320xf32, #tpu.memory_space<vmem>>, %arg2: memref<16x320xf32, #tpu.memory_space<vmem>>, %arg3: memref<1x320xf32, #tpu.memory_space<vmem>>, %arg4: memref<16x320xf32, #tpu.memory_space<vmem>>) attributes {dimension_semantics = [], scalar_prefetch = 0 : i64, scratch_operands = 0 : i64, tpu.core_type = #tpu.core_type<tc>} {
    %c0 = arith.constant 0 : index
    %c0_0 = arith.constant 0 : index
    %0 = vector.load %arg0[%c0, %c0_0] : memref<16x16xf32, #tpu.memory_space<vmem>>, vector<16x16xf32>
    %c0_1 = arith.constant 0 : index
    %c0_2 = arith.constant 0 : index
    %1 = vector.load %arg1[%c0_1, %c0_2] : memref<16x320xf32, #tpu.memory_space<vmem>>, vector<16x320xf32>
    %cst = arith.constant dense<0.000000e+00> : vector<16x320xf32>
    %2 = tpu.matmul %0, %1, %cst {dimension_numbers = #tpu.dot_dimension_numbers<[1], [0], [0], [1], [0, 0, 1, 1], [], []>, precision = #tpu.contract_precision<fp32>} : vector<16x16xf32>, vector<16x320xf32>, vector<16x320xf32> -> vector<16x320xf32>
    %c0_3 = arith.constant 0 : index
    %c0_4 = arith.constant 0 : index
    %3 = vector.load %arg3[%c0_3, %c0_4] : memref<1x320xf32, #tpu.memory_space<vmem>>, vector<1x320xf32>
    %4 = vector.broadcast %3 : vector<1x320xf32> to vector<16x320xf32>
    %5 = arith.addf %2, %4 : vector<16x320xf32>
    %c0_5 = arith.constant 0 : index
    %c0_6 = arith.constant 0 : index
    %6 = vector.load %arg2[%c0_5, %c0_6] : memref<16x320xf32, #tpu.memory_space<vmem>>, vector<16x320xf32>
    %7 = arith.addf %5, %6 : vector<16x320xf32>
    %cst_7 = arith.constant 0.000000e+00 : f32
    %8 = vector.broadcast %cst_7 : f32 to vector<16x320xf32>
    %9 = arith.maximumf %7, %8 : vector<16x320xf32>
    %c0_8 = arith.constant 0 : index
    %c0_9 = arith.constant 0 : index
    %10 = vector.load %arg4[%c0_8, %c0_9] : memref<16x320xf32, #tpu.memory_space<vmem>>, vector<16x320xf32>
    tpu.vector_store %arg4[%c0_8, %c0_9], %9 {strides = array<i32>} : memref<16x320xf32, #tpu.memory_space<vmem>>, vector<16x320xf32>,
    return
  }
}

module attributes {stable_mosaic.version = 11 : i64} {
  func.func @tc2_ln_kernel(%arg0: i32, %arg1: memref<1x10x256xf32, #tpu.memory_space<vmem>>, %arg2: memref<3x256x128xf32, #tpu.memory_space<vmem>>, %arg3: memref<1x128xf32, #tpu.memory_space<vmem>>, %arg4: memref<1x128xf32, #tpu.memory_space<vmem>>, %arg5: memref<1x128xf32, #tpu.memory_space<vmem>>, %arg6: memref<1x8x128xf32, #tpu.memory_space<vmem>>) attributes {dimension_semantics = [#tpu.dimension_semantics<arbitrary>], iteration_bounds = array<i64: 2>, scalar_prefetch = 0 : i64, scratch_operands = 0 : i64, tpu.core_type = #tpu.core_type<tc>, window_params = [{transform_indices = @transform_0, window_bounds = array<i64: 1, 10, 256>}, {pipeline_mode = #tpu.pipeline_mode<synchronous>, transform_indices = @transform_1, window_bounds = array<i64: 3, 256, 128>}, {pipeline_mode = #tpu.pipeline_mode<synchronous>, transform_indices = @transform_2, window_bounds = array<i64: 1, 128>}, {pipeline_mode = #tpu.pipeline_mode<synchronous>, transform_indices = @transform_3, window_bounds = array<i64: 1, 128>}, {pipeline_mode = #tpu.pipeline_mode<synchronous>, transform_indices = @transform_4, window_bounds = array<i64: 1, 128>}, {transform_indices = @transform_5, window_bounds = array<i64: 1, 8, 128>}]} {
    %c0 = arith.constant 0 : index
    %c0_0 = arith.constant 0 : index
    %c0_1 = arith.constant 0 : index
    %0 = vector.load %arg1[%c0, %c0_0, %c0_1] : memref<1x10x256xf32, #tpu.memory_space<vmem>>, vector<1x10x256xf32>
    %1 = vector.shape_cast %0 : vector<1x10x256xf32> to vector<10x256xf32>
    %2 = vector.extract_strided_slice %1 {offsets = [0, 0], sizes = [8, 256], strides = [1, 1]} : vector<10x256xf32> to vector<8x256xf32>
    %c0_2 = arith.constant 0 : index
    %c0_3 = arith.constant 0 : index
    %c0_4 = arith.constant 0 : index
    %3 = vector.load %arg2[%c0_2, %c0_3, %c0_4] : memref<3x256x128xf32, #tpu.memory_space<vmem>>, vector<1x256x128xf32>
    %4 = vector.shape_cast %3 : vector<1x256x128xf32> to vector<256x128xf32>
    %cst = arith.constant dense<0.000000e+00> : vector<8x128xf32>
    %5 = tpu.matmul %2, %4, %cst {dimension_numbers = #tpu.dot_dimension_numbers<[1], [0], [0], [1], [0, 0, 1, 1], [], []>, precision = #tpu.contract_precision<fp32>} : vector<8x256xf32>, vector<256x128xf32>, vector<8x128xf32> -> vector<8x128xf32>
    %6 = vector.extract_strided_slice %1 {offsets = [1, 0], sizes = [8, 256], strides = [1, 1]} : vector<10x256xf32> to vector<8x256xf32>
    %c1 = arith.constant 1 : index
    %c0_5 = arith.constant 0 : index
    %c0_6 = arith.constant 0 : index
    %7 = vector.load %arg2[%c1, %c0_5, %c0_6] : memref<3x256x128xf32, #tpu.memory_space<vmem>>, vector<1x256x128xf32>
    %8 = vector.shape_cast %7 : vector<1x256x128xf32> to vector<256x128xf32>
    %cst_7 = arith.constant dense<0.000000e+00> : vector<8x128xf32>
    %9 = tpu.matmul %6, %8, %cst_7 {dimension_numbers = #tpu.dot_dimension_numbers<[1], [0], [0], [1], [0, 0, 1, 1], [], []>, precision = #tpu.contract_precision<fp32>} : vector<8x256xf32>, vector<256x128xf32>, vector<8x128xf32> -> vector<8x128xf32>
    %10 = arith.addf %5, %9 : vector<8x128xf32>
    %11 = vector.extract_strided_slice %1 {offsets = [2, 0], sizes = [8, 256], strides = [1, 1]} : vector<10x256xf32> to vector<8x256xf32>
    %c2 = arith.constant 2 : index
    %c0_8 = arith.constant 0 : index
    %c0_9 = arith.constant 0 : index
    %12 = vector.load %arg2[%c2, %c0_8, %c0_9] : memref<3x256x128xf32, #tpu.memory_space<vmem>>, vector<1x256x128xf32>
    %13 = vector.shape_cast %12 : vector<1x256x128xf32> to vector<256x128xf32>
    %cst_10 = arith.constant dense<0.000000e+00> : vector<8x128xf32>
    %14 = tpu.matmul %11, %13, %cst_10 {dimension_numbers = #tpu.dot_dimension_numbers<[1], [0], [0], [1], [0, 0, 1, 1], [], []>, precision = #tpu.contract_precision<fp32>} : vector<8x256xf32>, vector<256x128xf32>, vector<8x128xf32> -> vector<8x128xf32>
    %15 = arith.addf %10, %14 : vector<8x128xf32>
    %c0_11 = arith.constant 0 : index
    %c0_12 = arith.constant 0 : index
    %16 = vector.load %arg3[%c0_11, %c0_12] : memref<1x128xf32, #tpu.memory_space<vmem>>, vector<1x128xf32>
    %17 = vector.broadcast %16 : vector<1x128xf32> to vector<8x128xf32>
    %18 = arith.addf %15, %17 : vector<8x128xf32>
    %cst_13 = arith.constant 0.000000e+00 : f32
    %19 = vector.broadcast %cst_13 : f32 to vector<8x128xf32>
    %20 = arith.maximumf %18, %19 : vector<8x128xf32>
    %cst_14 = arith.constant dense<0.000000e+00> : vector<8xf32>
    %21 = vector.multi_reduction <add>, %20, %cst_14 [1] : vector<8x128xf32> to vector<8xf32>
    %22 = vector.shape_cast %21 : vector<8xf32> to vector<8x1xf32>
    %cst_15 = arith.constant 1.280000e+02 : f32
    %23 = vector.broadcast %cst_15 : f32 to vector<8x1xf32>
    %24 = arith.divf %22, %23 : vector<8x1xf32>
    %25 = vector.broadcast %24 : vector<8x1xf32> to vector<8x128xf32>
    %26 = arith.subf %20, %25 : vector<8x128xf32>
    %27 = arith.mulf %26, %26 : vector<8x128xf32>
    %cst_16 = arith.constant dense<0.000000e+00> : vector<8xf32>
    %28 = vector.multi_reduction <add>, %27, %cst_16 [1] : vector<8x128xf32> to vector<8xf32>
    %29 = vector.shape_cast %28 : vector<8xf32> to vector<8x1xf32>
    %cst_17 = arith.constant 1.280000e+02 : f32
    %30 = vector.broadcast %cst_17 : f32 to vector<8x1xf32>
    %31 = arith.divf %29, %30 : vector<8x1xf32>
    %cst_18 = arith.constant 9.99999974E-6 : f32
    %32 = vector.broadcast %cst_18 : f32 to vector<8x1xf32>
    %33 = arith.addf %31, %32 : vector<8x1xf32>
    %34 = math.rsqrt %33 : vector<8x1xf32>
    %35 = vector.broadcast %24 : vector<8x1xf32> to vector<8x128xf32>
    %36 = arith.subf %20, %35 : vector<8x128xf32>
    %37 = vector.broadcast %34 : vector<8x1xf32> to vector<8x128xf32>
    %38 = arith.mulf %36, %37 : vector<8x128xf32>
    %c0_19 = arith.constant 0 : index
    %c0_20 = arith.constant 0 : index
    %39 = vector.load %arg4[%c0_19, %c0_20] : memref<1x128xf32, #tpu.memory_space<vmem>>, vector<1x128xf32>
    %40 = vector.broadcast %39 : vector<1x128xf32> to vector<8x128xf32>
    %41 = arith.mulf %38, %40 : vector<8x128xf32>
    %c0_21 = arith.constant 0 : index
    %c0_22 = arith.constant 0 : index
    %42 = vector.load %arg5[%c0_21, %c0_22] : memref<1x128xf32, #tpu.memory_space<vmem>>, vector<1x128xf32>
    %43 = vector.broadcast %42 : vector<1x128xf32> to vector<8x128xf32>
    %44 = arith.addf %41, %43 : vector<8x128xf32>
    %c0_23 = arith.constant 0 : index
    %c0_24 = arith.constant 0 : index
    %c0_25 = arith.constant 0 : index
    %45 = vector.load %arg6[%c0_23, %c0_24, %c0_25] : memref<1x8x128xf32, #tpu.memory_space<vmem>>, vector<1x8x128xf32>
    %46 = vector.shape_cast %45 : vector<1x8x128xf32> to vector<8x128xf32>
    %47 = vector.shape_cast %44 : vector<8x128xf32> to vector<1x8x128xf32>
    tpu.vector_store %arg6[%c0_23, %c0_24, %c0_25], %47 {strides = array<i32>} : memref<1x8x128xf32, #tpu.memory_space<vmem>>, vector<1x8x128xf32>,
    return
  }
  func.func @transform_0(%arg0: i32) -> (i32, i32, i32) {
    %c0_i32 = arith.constant 0 : i32
    %c0_i32_0 = arith.constant 0 : i32
    %c0_i32_1 = arith.constant 0 : i32
    return %arg0, %c0_i32, %c0_i32_0 : i32, i32, i32
  }
  func.func @transform_1(%arg0: i32) -> (i32, i32, i32) {
    %c0_i32 = arith.constant 0 : i32
    %c0_i32_0 = arith.constant 0 : i32
    %c0_i32_1 = arith.constant 0 : i32
    %c0_i32_2 = arith.constant 0 : i32
    return %c0_i32, %c0_i32_0, %c0_i32_1 : i32, i32, i32
  }
  func.func @transform_2(%arg0: i32) -> (i32, i32) {
    %c0_i32 = arith.constant 0 : i32
    %c0_i32_0 = arith.constant 0 : i32
    %c0_i32_1 = arith.constant 0 : i32
    return %c0_i32, %c0_i32_0 : i32, i32
  }
  func.func @transform_3(%arg0: i32) -> (i32, i32) {
    %c0_i32 = arith.constant 0 : i32
    %c0_i32_0 = arith.constant 0 : i32
    %c0_i32_1 = arith.constant 0 : i32
    return %c0_i32, %c0_i32_0 : i32, i32
  }
  func.func @transform_4(%arg0: i32) -> (i32, i32) {
    %c0_i32 = arith.constant 0 : i32
    %c0_i32_0 = arith.constant 0 : i32
    %c0_i32_1 = arith.constant 0 : i32
    return %c0_i32, %c0_i32_0 : i32, i32
  }
  func.func @transform_5(%arg0: i32) -> (i32, i32, i32) {
    %c0_i32 = arith.constant 0 : i32
    %c0_i32_0 = arith.constant 0 : i32
    %c0_i32_1 = arith.constant 0 : i32
    return %arg0, %c0_i32, %c0_i32_0 : i32, i32, i32
  }
}

</mosaic_0001>

<bundles_post_ra>
// kernel: forward.4
= control target key start
LH: loop header
LB: loop body
LE: loop exit
PB: predicated region body
PF: predicated region fallthrough
CT: control target
= control target key end

     0   :  { %vm42_vm0 = vcmask 130048   ;;  %v1273_v3 = vmov 0.0   ;;  %vm1111_vm1 = vcmask 523264   ;;  %s1456_s1 = inlined_call_operand.vmem [shape: f32[16,320], index: 1, kind: input, shape index: {}]   ;;  %s1457_s0 = inlined_call_operand.vmem [shape: f32[16,16], index: 0, kind: input, shape index: {}]   ;;  %s1458_s3 = inlined_call_operand.vmem [shape: f32[1,320], index: 3, kind: input, shape index: {}]   ;;  %s1459_s2 = inlined_call_operand.vmem [shape: f32[16,320], index: 2, kind: input, shape index: {}]   ;;  %s1460_s4 = inlined_call_operand.vmem [shape: f32[16,320], index: 4, kind: output, shape index: {}]  }
   0x1   :  { %v20_v0 = vld [vmem:[%s1456_s1 + $0x8] sm:$0xff]  ;;  %v23_v1 = vld [vmem:[%s1456_s1 + $0x20] sm:$0xff]  ;;  %117 = vmatprep.mubr.f32.mxu1 %v1273_v3  ;;  %224 = vmatprep.mubr.f32.mxu0 %v1273_v3  ;;  %v22_v6 = vld [vmem:[%s1456_s1 + $0x18] sm:$0xff] }
   0x2   :  { %v19_v2 = vld [vmem:[%s1456_s1] sm:$0xff]  ;;  %v49_v4 = vand.u32 4294901760, %v20_v0  ;;  %v53_v5 = vand.u32 4294901760, %v23_v1  ;;  %v18_v9 = vld [vmem:[%s1457_s0 + $0x8] sm:$0xff]  ;;  %v55_v10 = vand.u32 4294901760, %v22_v6  ;;  %v21_v21 = vld [vmem:[%s1456_s1 + $0x10] sm:$0xff] }
   0x3   :  { %v51_v7 = vand.u32 4294901760, %v19_v2  ;;  %v17_v8 = vld [vmem:[%s1457_s0] sm:$0xff]  ;;  %v47_v12 = vsel %vm42_vm0, %v18_v9, 0  ;;  %v24_v25 = vld [vmem:[%s1456_s1 + $0x28] sm:$0xff]  ;;  %v590_v32 = vand.u32 4294901760, %v21_v21 }
   0x4   :  { %v44_v11 = vsel %vm42_vm0, %v17_v8, 0  ;;  %v1319_v13 = vpack.c.bf16 %v53_v5, %v49_v4  ;;  %v1321_v14 = vsub.f32 %v20_v0, %v49_v4  ;;  %v153_v15 = vsub.f32 %v23_v1, %v53_v5 }
   0x5   :  { %v1323_v16 = vsub.f32 %v19_v2, %v51_v7  ;;  %v1325_v17 = vpack.c.bf16 %v55_v10, %v51_v7  ;;  %v1327_v18 = vsub.f32 %v22_v6, %v55_v10  ;;  %v1329_v19 = vand.u32 4294901760, %v44_v11  ;;  %v25_v6 = vld [vmem:[%s1458_s3] sm:$0x7] }
   0x6   :  { %v1331_v20 = vand.u32 4294901760, %v47_v12  ;;  %1187 = vmatprep.subr.bf16.mxu1 %v1319_v13  ;;  %v142_v22 = vand.u32 4294901760, %v1321_v14  ;;  %v154_v23 = vand.u32 4294901760, %v153_v15  ;;  %v593_v36 = vand.u32 4294901760, %v24_v25 }
   0x7   :  { %v148_v24 = vand.u32 4294901760, %v1323_v16  ;;  %1189 = vmatpush1.bf16.msra.mxu1 %v1325_v17  ;;  %v1344_v26 = vsub.f32 %v44_v11, %v1329_v19  ;;  %v160_v27 = vand.u32 4294901760, %v1327_v18  ;;  %v1361_v40 = vsub.f32 %v21_v21, %v590_v32 }
   0x8   :  { %v1348_v28 = vsub.f32 %v47_v12, %v1331_v20  ;;  %v143_v29 = vsub.f32 %v1321_v14, %v142_v22  ;;  %v155_v30 = vsub.f32 %v153_v15, %v154_v23  ;;  %v1194_v45 = vpack.c.bf16 %v153_v15, %v1321_v14 }
   0x9   :  { %v149_v31 = vsub.f32 %v1323_v16, %v148_v24  ;;  %v1355_v33 = vand.u32 4294901760, %v1344_v26  ;;  %v161_v34 = vsub.f32 %v1327_v18, %v160_v27  ;;  %v685_v46 = vsub.f32 %v24_v25, %v593_v36 }
   0xa   :  { %v1359_v35 = vand.u32 4294901760, %v1348_v28  ;;  %v144_v37 = vand.u32 4294901760, %v143_v29  ;;  %v156_v38 = vand.u32 4294901760, %v155_v30  ;;  %v1368_v49 = vpack.c.bf16 %v593_v36, %v590_v32 }
   0xb   :  { %v150_v39 = vand.u32 4294901760, %v149_v31  ;;  %v121_v41 = vsub.f32 %v1344_v26, %v1355_v33  ;;  %v162_v42 = vand.u32 4294901760, %v161_v34  ;;  %v679_v50 = vand.u32 4294901760, %v1361_v40 }
   0xc   :  { %v132_v43 = vsub.f32 %v1348_v28, %v1359_v35  ;;  %v1190_v44 = vpack.c.bf16 %v156_v38, %v144_v37  ;;  %v686_v51 = vand.u32 4294901760, %v685_v46  ;;  %v1196_v53 = vpack.c.bf16 %v1327_v18, %v1323_v16  ;;  %v1092_v16 = vld [vmem:[%s1459_s2 + $0x8] sm:$0xff] }
   0xd   :  { %v122_v47 = vand.u32 4294901760, %v121_v41  ;;  %v1192_v48 = vpack.c.bf16 %v162_v42, %v150_v39  ;;  %v680_v54 = vsub.f32 %v1361_v40, %v679_v50  ;;  %v1202_v59 = vpack.c.bf16 %v154_v23, %v142_v22  ;;  %v1094_v23 = vld [vmem:[%s1459_s2 + $0x18] sm:$0xff]  ;;  %v1096_v37 = vld [vmem:[%s1459_s2 + $0x28] sm:$0xff] }
   0xe   :  { %1191 = vmatprep.subr.bf16.mxu0 %v1190_v44  ;;  %1234 = vmatprep.subr.bf16.mxu1 %v1190_v44  ;;  %v133_v52 = vand.u32 4294901760, %v132_v43  ;;  %v687_v55 = vsub.f32 %v685_v46, %v686_v51  ;;  %v1218_v60 = vpack.c.bf16 %v685_v46, %v1361_v40  ;;  %v1204_v61 = vpack.c.bf16 %v160_v27, %v148_v24  ;;  %v1095_v27 = vld [vmem:[%s1459_s2 + $0x20] sm:$0xff]  ;;  %v1093_v40 = vld [vmem:[%s1459_s2 + $0x10] sm:$0xff] }
   0xf   :  { %123 = vmatmul.mubr.f32.vlgmr.msra.gmra.mrb[0].mxu1 %v122_v47  ;;  %1193 = vmatpush1.bf16.msra.mxu0 %v1192_v48  ;;  %v681_v56 = vand.u32 4294901760, %v680_v54  ;;  %v1226_v62 = vpack.c.bf16 %v686_v51, %v679_v50 }
  0x10   :  { %1235 = vmatpush1.bf16.msra.mxu1 %v1192_v48  ;;  %128 = vmatprep.mubr.f32.mxu1 %v1273_v3  ;;  %v688_v57 = vand.u32 4294901760, %v687_v55 }
  0x11   :  { %1195 = vmatprep.subr.bf16.mxu0 %v1194_v45  ;;  %1211 = vmatprep.subr.bf16.mxu1 %v1368_v49 }
  0x12   :  { %226 = vmatmul.mubr.f32.vlgmr.msra.gmra.mrb[0].mxu0 %v1329_v19  ;;  %v1214_v58 = vpack.c.bf16 %v688_v57, %v681_v56 }
  0x13   :  { %134 = vmatmul.mubr.f32.gmra.mrb[2].mxu1 %v133_v52  ;;  %1197 = vmatpush1.bf16.msra.mxu0 %v1196_v53 }
  0x14   :  { %231 = vmatprep.mubr.f32.mxu1 %v1273_v3  ;;  %311 = vmatprep.mubr.f32.mxu0 %v1273_v3 }
  0x15   :  { %1199 = vmatprep.subr.bf16.mxu0 %v1319_v13 }
  0x1a   :  { %314 = vmatmul.mubr.f32.vlgmr.msra.gmra.mrb[0].mxu0 %v1344_v26 }
  0x1b   :  { %233 = vmatmul.mubr.f32.vlgmr.msra.gmra.mrb[2].mxu1 %v1331_v20  ;;  %319 = vmatprep.mubr.f32.mxu0 %v1273_v3 }
  0x1c   :  { %1213 = vmatpush3.bf16.msra.mxu1 %v1368_v49  ;;  %1148 = vmatprep.mubr.f32.mxu1 %v122_v47 }
  0x1d   :  { %1215 = vmatprep.subr.bf16.mxu1 %v1214_v58  ;;  %1201 = vmatpush1.bf16.msra.mxu0 %v1325_v17 }
  0x1e   :  { %322 = vmatmul.mubr.f32.gmra.mrb[2].mxu0 %v1348_v28  ;;  %1203 = vmatprep.subr.bf16.mxu0 %v1202_v59 }
  0x1f   :  { %1149 = vmatmul.mubr.f32.vlgmr.msra.gmra.mrb[4].mxu1 %v133_v52  ;;  %396 = vmatprep.mubr.f32.mxu0 %v1273_v3 }
  0x20   :  { %1217 = vmatpush3.bf16.msra.mxu1 %v1214_v58  ;;  %1155 = vmatprep.mubr.f32.mxu1 %v1329_v19 }
  0x21   :  { %1219 = vmatprep.subr.bf16.mxu1 %v1218_v60 }
  0x22   :  { %400 = vmatmul.mubr.f32.vlgmr.msra.gmra.mrb[0].mxu0 %v1355_v33 }
  0x23   :  { %405 = vmatprep.mubr.f32.mxu0 %v1273_v3  ;;  %1205 = vmatpush1.bf16.msra.mxu0 %v1204_v61 }
  0x24   :  { %1207 = vmatprep.subr.bf16.mxu0 %v1319_v13  ;;  %v1091_v13 = vld [vmem:[%s1459_s2] sm:$0xff] }
  0x26   :  { %409 = vmatmul.mubr.f32.gmra.mrb[2].mxu0 %v1359_v35 }
  0x27   :  { %1156 = vmatmul.mubr.f32.vlgmr.msra.gmra.mrb[4].mxu1 %v1331_v20  ;;  %491 = vmatprep.mubr.f32.mxu0 %v1273_v3 }
  0x28   :  { %1221 = vmatpush3.bf16.msra.mxu1 %v1218_v60  ;;  %1162 = vmatprep.mubr.f32.mxu1 %v1344_v26 }
  0x29   :  { %1223 = vmatprep.subr.bf16.mxu1 %v1368_v49 }
  0x2a   :  { %493 = vmatmul.mubr.f32.vlgmr.msra.gmra.mrb[0].mxu0 %v1329_v19 }
  0x2b   :  { %498 = vmatprep.mubr.f32.mxu0 %v1273_v3  ;;  %1209 = vmatpush1.bf16.msra.mxu0 %v1325_v17 }
  0x2e   :  { %500 = vmatmul.mubr.f32.gmra.mrb[2].mxu0 %v1331_v20 }
  0x2f   :  { %1163 = vmatmul.mubr.f32.vlgmr.msra.gmra.mrb[4].mxu1 %v1348_v28  ;;  %574 = vmatprep.mubr.f32.mxu0 %v1273_v3 }
  0x30   :  { %1225 = vmatpush3.bf16.msra.mxu1 %v1368_v49  ;;  %1169 = vmatprep.mubr.f32.mxu1 %v1355_v33 }
  0x31   :  { %1227 = vmatprep.subr.bf16.mxu1 %v1226_v62 }
  0x32   :  { %576 = vmatmul.mubr.f32.vlgmr.msra.gmra.mrb[0].mxu0 %v1329_v19 }
  0x33   :  { %581 = vmatprep.mubr.f32.mxu0 %v1273_v3  ;;  %v27_v3 = vlaneseq }
  0x35   :  { %v28_v4 = vshrl.u32 %v27_v3, 7 }
  0x36   :  { %583 = vmatmul.mubr.f32.gmra.mrb[2].mxu0 %v1331_v20 }
  0x37   :  { %1170 = vmatmul.mubr.f32.vlgmr.msra.gmra.mrb[4].mxu1 %v1359_v35  ;;  %v29_v5 = vsub.s32 0, %v28_v4  ;;  %v33_v7 = vsub.s32 1, %v28_v4  ;;  %v37_v34 = vsub.s32 2, %v28_v4 }
  0x38   :  { %1229 = vmatpush3.bf16.msra.mxu1 %v1226_v62  ;;  %1176 = vmatprep.mubr.f32.mxu1 %v1329_v19 }
  0x39   :  { %1231 = vmatprep.subr.bf16.mxu1 %v1368_v49  ;;  %v30_v8 = vrot.slane %v25_v6, %v29_v5  ;;  %v34_v9 = vrot.slane %v25_v6, %v33_v7  ;;  %v38_v35 = vrot.slane %v25_v6, %v37_v34 }
  0x3f   :  { %1177 = vmatmul.mubr.f32.vlgmr.msra.gmra.mrb[4].mxu1 %v1331_v20 }
  0x40   :  { %1233 = vmatpush3.bf16.msra.mxu1 %v1368_v49  ;;  %1183 = vmatprep.mubr.f32.mxu1 %v1329_v19 }
  0x47   :  { %1184 = vmatmul.mubr.f32.vlgmr.msra.gmra.mrb[4].mxu1 %v1331_v20 }
  0xe2   :  { %v124_v63 = vpop.f32.mrb[0].mxu1 }
  0xe3   :  { %v126_v0 = vpop.f32.mrb[1].mxu1  ;;  %v125_v10 = vadd.f32 %v124_v63, %v30_v8 }
  0xe4   :  { %v127_v11 = vadd.f32 %v126_v0, %v34_v9 }
  0xee   :  { %v234_v1 = vpop.f32.mrb[2].mxu1 }
  0xef   :  { %v236_v2 = vpop.f32.mrb[3].mxu1  ;;  %v1240_v18 = vadd.f32 %v234_v1, %v30_v8 }
  0xf0   :  { %v1242_v20 = vadd.f32 %v236_v2, %v34_v9 }
 0x105   :  { %v577_v12 = vpop.f32.mrb[0].mxu0 }
 0x106   :  { %v1237_v14 = vadd.f32 %v577_v12, %v125_v10  ;;  %v579_v15 = vpop.f32.mrb[1].mxu0 }
 0x107   :  { %v1239_v17 = vadd.f32 %v579_v15, %v127_v11 }
 0x108   :  { %v1097_v19 = vadd.f32 %v1237_v14, %v1091_v13 }
 0x109   :  { %v1098_v21 = vadd.f32 %v1239_v17, %v1092_v16  ;;  %v584_v22 = vpop.f32.mrb[2].mxu0 }
 0x10a   :  { %v1103_v24 = vmax.f32 %v1097_v19, 0.0  ;;  %v1241_v25 = vadd.f32 %v1240_v18, %v584_v22  ;;  %v586_v26 = vpop.f32.mrb[3].mxu0 }
 0x10b   :  { %v1104_v28 = vmax.f32 %v1098_v21, 0.0  ;;  %v1243_v29 = vadd.f32 %v1242_v20, %v586_v26 }
 0x10c   :  { %1109 = vst [vmem:[%s1460_s4] sm:$0xff] %v1103_v24  ;;  %v1100_v30 = vadd.f32 %v1241_v25, %v1094_v23 }
 0x10d   :  { %1110 = vst [vmem:[%s1460_s4 + $0x8] sm:$0xff] %v1104_v28  ;;  %v1101_v31 = vadd.f32 %v1243_v29, %v1095_v27 }
 0x10e   :  { %v1106_v32 = vmax.f32 %v1100_v30, 0.0 }
 0x10f   :  { %v1107_v33 = vmax.f32 %v1101_v31, 0.0 }
 0x110   :  { %1113 = vst [vmem:[%s1460_s4 + $0x18] sm:$0xff] %v1106_v32 }
 0x111   :  { %1114 = vst [vmem:[%s1460_s4 + $0x20] sm:$0xff] %v1107_v33 }
 0x11a   :  { %v1185_v36 = vpop.f32.mrb[4].mxu1 }
 0x11b   :  { %v1244_v38 = vadd.f32 %v1185_v36, %v38_v35  ;;  %v1081_v39 = vpop.f32.mrb[5].mxu1 }
 0x11c   :  { %v1245_v41 = vadd.f32 %v1081_v39, %v38_v35 }
 0x11d   :  { %v1102_v42 = vadd.f32 %v1244_v38, %v1096_v37 }
 0x11e   :  { %v1099_v43 = vadd.f32 %v1245_v41, %v1093_v40 }
 0x11f   :  { %v1108_v44 = vmax.f32 %v1102_v42, 0.0 }
 0x120   :  { %v1105_v45 = vmax.f32 %v1099_v43, 0.0 }
 0x121   :  { %1115 = vst.msk [vmem:[%s1460_s4 + $0x28] sm:$0xff] %vm1111_vm1, %v1108_v44 }
 0x122   :  { %1112 = vst.msk [vmem:[%s1460_s4 + $0x10] sm:$0xff] %vm1111_vm1, %v1105_v45 }

// kernel: forward.5
= control target key start
LH: loop header
LB: loop body
LE: loop exit
PB: predicated region body
PF: predicated region fallthrough
CT: control target
= control target key end

     0   :  { %s4361_s18 = smov 0   ;;  %s6560_s0 = inlined_call_operand.vmem [shape: f32[2,10,256], index: 0, kind: input, shape index: {}]   ;;  %s6561_s1 = inlined_call_operand.vmem [shape: f32[3,256,128], index: 1, kind: input, shape index: {}]   ;;  %s6562_s2 = inlined_call_operand.vmem [shape: f32[1,128], index: 2, kind: input, shape index: {}]   ;;  %s6563_s3 = inlined_call_operand.vmem [shape: f32[1,128], index: 3, kind: input, shape index: {}]   ;;  %s6564_s4 = inlined_call_operand.vmem [shape: f32[1,128], index: 4, kind: input, shape index: {}]   ;;  %s6565_s5 = inlined_call_operand.vmem [shape: f32[2,8,128], index: 5, kind: output, shape index: {}]  }
   0x1 LB: > { %s3025_s19 = sadd.s32 4294967295, %s4329_s18   ;;  %p3029_p0 = scmp.ge.s32.totalorder %s4329_s18, 1  ;;  %s4329_s18 = sphi %s4361_s18, %s15_s18  }
   0x2   : > { %p187_p1 = scmp.lt.s32.totalorder %s4329_s18, 3 }
   0x4   : > { %p188_p2 = pnand %p3029_p0, %p187_p1 }
   0x6   : > { %191 = sbr.rel (%p188_p2) target bundleno = 883 (0x373), region = 40 }
   0xd   : > { %v3049_v0 = vld [vmem:[%s6561_s1 + $0x180] sm:$0xff]  ;;  %v3050_v1 = vld [vmem:[%s6561_s1 + $0x188] sm:$0xff]  ;;  %v3051_v7 = vld [vmem:[%s6561_s1 + $0x190] sm:$0xff]  ;;  %p4557_p3 = scmp.lt.s32.totalorder %s3025_s19, 1  ;;  %vm296_vm0 = vcmask 1046528   ;;  %vm2062_vm1 = vcmask 1045504  }
   0xe   : > { %v3033_v2 = vld [vmem:[%s6561_s1 + $0x100] sm:$0xff]  ;;  %v354_v3 = vand.u32 4294901760, %v3049_v0  ;;  %v357_v4 = vand.u32 4294901760, %v3050_v1  ;;  %v3034_v5 = vld [vmem:[%s6561_s1 + $0x108] sm:$0xff]  ;;  %v3052_v8 = vld [vmem:[%s6561_s1 + $0x198] sm:$0xff]  ;;  %v360_v10 = vand.u32 4294901760, %v3051_v7 }
   0xf   : > { %v306_v6 = vand.u32 4294901760, %v3033_v2  ;;  %v309_v9 = vand.u32 4294901760, %v3034_v5  ;;  %v363_v11 = vand.u32 4294901760, %v3052_v8  ;;  %v3035_v12 = vld [vmem:[%s6561_s1 + $0x110] sm:$0xff]  ;;  %v3036_v13 = vld [vmem:[%s6561_s1 + $0x118] sm:$0xff]  ;;  %v3053_v18 = vld [vmem:[%s6561_s1 + $0x1a0] sm:$0xff] }
  0x10   : > { %v4393_v14 = vpack.c.bf16 %v357_v4, %v354_v3  ;;  %v312_v16 = vand.u32 4294901760, %v3035_v12  ;;  %v315_v17 = vand.u32 4294901760, %v3036_v13  ;;  %v3054_v19 = vld [vmem:[%s6561_s1 + $0x1a8] sm:$0xff]  ;;  %v3037_v23 = vld [vmem:[%s6561_s1 + $0x120] sm:$0xff]  ;;  %v4416_v25 = vsub.f32 %v3051_v7, %v360_v10  ;;  %v3055_v36 = vld [vmem:[%s6561_s1 + $0x1b0] sm:$0xff]  ;;  %s7267_s19 = smov (!%p4557_p3, %s3025_s19), 1 }
  0x11   : > { %v4395_v15 = vsub.f32 %v3033_v2, %v306_v6  ;;  %v4403_v20 = vpack.c.bf16 %v309_v9, %v306_v6  ;;  %v4405_v21 = vsub.f32 %v3034_v5, %v309_v9  ;;  %v4407_v22 = vpack.c.bf16 %v363_v11, %v360_v10  ;;  %v3038_v24 = vld [vmem:[%s6561_s1 + $0x128] sm:$0xff]  ;;  %v3056_v40 = vld [vmem:[%s6561_s1 + $0x1b8] sm:$0xff]  ;;  %v3039_v53 = vld [vmem:[%s6561_s1 + $0x130] sm:$0xff]  ;;  %s3102_s10 = sshll.u32 %s7267_s19, 5  ;;  %s3032_s16 = sshll.u32 %s7267_s19, 3 }
  0x12   : > { %3734 = vmatprep.subr.bf16.mxu0 %v4393_v14  ;;  %v4418_v26 = vsub.f32 %v3052_v8, %v363_v11  ;;  %v4420_v27 = vpack.c.bf16 %v315_v17, %v312_v16  ;;  %v366_v28 = vand.u32 4294901760, %v3053_v18  ;;  %v369_v29 = vand.u32 4294901760, %v3054_v19  ;;  %v3040_v54 = vld [vmem:[%s6561_s1 + $0x138] sm:$0xff]  ;;  %v3041_v9 = vld [vmem:[%s6561_s1 + $0x140] sm:$0xff]  ;;  %s4652_s17 = scalar_lea.vmem %s6560_s0, %s3102_s10  ;;  %s222_s24 = scalar_lea.vmem %s6565_s5, %s3032_s16 }
  0x13   : > { %3736 = vmatpush3.bf16.msra.mxu0 %v4403_v20  ;;  %v4423_v30 = vsub.f32 %v3049_v0, %v354_v3  ;;  %v4425_v31 = vsub.f32 %v3050_v1, %v357_v4  ;;  %v318_v32 = vand.u32 4294901760, %v3037_v23  ;;  %v321_v33 = vand.u32 4294901760, %v3038_v24  ;;  %v3057_v3 = vld [vmem:[%s6561_s1 + $0x1c0] sm:$0xff]  ;;  %v3058_v4 = vld [vmem:[%s6561_s1 + $0x1c8] sm:$0xff] }
  0x14   : > { %3738 = vmatprep.subr.bf16.mxu0 %v4407_v22  ;;  %v6583_v34 = vand.u32 4294901760, %v4395_v15  ;;  %v6580_v35 = vand.u32 4294901760, %v4405_v21  ;;  %v4433_v37 = vsub.f32 %v3035_v12, %v312_v16  ;;  %v4435_v38 = vpack.c.bf16 %v369_v29, %v366_v28 }
  0x15   : > { %v6585_v39 = vand.u32 4294901760, %v4423_v30  ;;  %v4441_v41 = vsub.f32 %v3036_v13, %v315_v17  ;;  %v4443_v42 = vsub.f32 %v3053_v18, %v366_v28  ;;  %v6584_v43 = vand.u32 4294901760, %v4425_v31 }
  0x16   : > { %v4446_v44 = vpack.c.bf16 %v321_v33, %v318_v32  ;;  %v421_v46 = vsub.f32 %v4395_v15, %v6583_v34  ;;  %v428_v47 = vsub.f32 %v4405_v21, %v6580_v35  ;;  %v372_v48 = vand.u32 4294901760, %v3055_v36 }
  0x17   : > { %3740 = vmatpush3.bf16.msra.mxu0 %v4420_v27  ;;  %v533_v45 = vsub.f32 %v4423_v30, %v6585_v39  ;;  %v540_v49 = vsub.f32 %v4425_v31, %v6584_v43  ;;  %v375_v50 = vand.u32 4294901760, %v3056_v40  ;;  %v6579_v51 = vand.u32 4294901760, %v4416_v25 }
  0x18   : > { %3742 = vmatprep.subr.bf16.mxu0 %v4435_v38  ;;  %v6576_v52 = vand.u32 4294901760, %v4418_v26  ;;  %v4470_v55 = vsub.f32 %v3054_v19, %v369_v29  ;;  %v422_v57 = vand.u32 4294901760, %v421_v46  ;;  %v429_v58 = vand.u32 4294901760, %v428_v47 }
  0x19   : > { %v534_v56 = vand.u32 4294901760, %v533_v45  ;;  %v541_v59 = vand.u32 4294901760, %v540_v49  ;;  %v4472_v60 = vsub.f32 %v3037_v23, %v318_v32  ;;  %v4474_v61 = vpack.c.bf16 %v375_v50, %v372_v48  ;;  %v3042_v23 = vld [vmem:[%s6561_s1 + $0x148] sm:$0xff] }
  0x1a   : > { %v547_v62 = vsub.f32 %v4416_v25, %v6579_v51  ;;  %v3767_v63 = vpack.c.bf16 %v429_v58, %v422_v57  ;;  %v554_v0 = vsub.f32 %v4418_v26, %v6576_v52  ;;  %v324_v1 = vand.u32 4294901760, %v3039_v53 }
  0x1b   : > { %3744 = vmatpush3.bf16.msra.mxu0 %v4446_v44  ;;  %v327_v2 = vand.u32 4294901760, %v3040_v54  ;;  %v3765_v5 = vpack.c.bf16 %v541_v59, %v534_v56  ;;  %v6575_v7 = vand.u32 4294901760, %v4433_v37  ;;  %v6573_v8 = vand.u32 4294901760, %v4441_v41 }
  0x1c   : > { %3746 = vmatprep.subr.bf16.mxu0 %v4474_v61  ;;  %v548_v6 = vand.u32 4294901760, %v547_v62  ;;  %v4495_v10 = vsub.f32 %v3038_v24, %v321_v33  ;;  %v4497_v11 = vsub.f32 %v3055_v36, %v372_v48  ;;  %v555_v12 = vand.u32 4294901760, %v554_v0  ;;  %v3043_v62 = vld [vmem:[%s6561_s1 + $0x150] sm:$0xff] }
  0x1d   : > { %v4499_v13 = vpack.c.bf16 %v327_v2, %v324_v1  ;;  %3766 = vmatprep.subr.bf16.mxu1 %v3765_v5  ;;  %v435_v16 = vsub.f32 %v4433_v37, %v6575_v7  ;;  %v442_v17 = vsub.f32 %v4441_v41, %v6573_v8  ;;  %v378_v18 = vand.u32 4294901760, %v3057_v3 }
  0x1e   : > { %v381_v19 = vand.u32 4294901760, %v3058_v4  ;;  %3768 = vmatpush3.bf16.msra.mxu1 %v3767_v63  ;;  %v3769_v24 = vpack.c.bf16 %v555_v12, %v548_v6  ;;  %v6572_v28 = vand.u32 4294901760, %v4443_v42  ;;  %v6570_v29 = vand.u32 4294901760, %v4470_v55 }
  0x1f   : > { %3748 = vmatpush3.bf16.msra.mxu0 %v4499_v13  ;;  %v330_v32 = vand.u32 4294901760, %v3041_v9  ;;  %v4513_v33 = vsub.f32 %v3056_v40, %v375_v50  ;;  %v436_v36 = vand.u32 4294901760, %v435_v16  ;;  %v443_v45 = vand.u32 4294901760, %v442_v17  ;;  %v3059_v40 = vld [vmem:[%s6561_s1 + $0x1d0] sm:$0xff]  ;;  %v3060_v50 = vld [vmem:[%s6561_s1 + $0x1d8] sm:$0xff] }
  0x20   : > { %v4515_v46 = vpack.c.bf16 %v381_v19, %v378_v18  ;;  %3770 = vmatprep.subr.bf16.mxu1 %v3769_v24  ;;  %v4517_v47 = vsub.f32 %v3039_v53, %v324_v1  ;;  %v561_v48 = vsub.f32 %v4443_v42, %v6572_v28  ;;  %v568_v49 = vsub.f32 %v4470_v55, %v6570_v29 }
  0x21   : > { %v333_v56 = vand.u32 4294901760, %v3042_v23  ;;  %v4531_v57 = vsub.f32 %v3040_v54, %v327_v2  ;;  %v3771_v53 = vpack.c.bf16 %v443_v45, %v436_v36  ;;  %v6569_v58 = vand.u32 4294901760, %v4472_v60 }
  0x22   : > { %3750 = vmatprep.subr.bf16.mxu0 %v4515_v46  ;;  %v6566_v59 = vand.u32 4294901760, %v4495_v10  ;;  %v4539_v63 = vsub.f32 %v3057_v3, %v378_v18  ;;  %v562_v0 = vand.u32 4294901760, %v561_v48  ;;  %v569_v1 = vand.u32 4294901760, %v568_v49  ;;  %v3044_v3 = vld [vmem:[%s6561_s1 + $0x158] sm:$0xff] }
  0x23   : > { %v4541_v5 = vpack.c.bf16 %v333_v56, %v330_v32  ;;  %3772 = vmatpush3.bf16.msra.mxu1 %v3771_v53  ;;  %v449_v54 = vsub.f32 %v4472_v60, %v6569_v58  ;;  %v384_v6 = vand.u32 4294901760, %v3059_v40  ;;  %v387_v12 = vand.u32 4294901760, %v3060_v50 }
  0x24   : > { %v456_v2 = vsub.f32 %v4495_v10, %v6566_v59  ;;  %v3773_v16 = vpack.c.bf16 %v569_v1, %v562_v0  ;;  %v6568_v17 = vand.u32 4294901760, %v4497_v11  ;;  %v6567_v18 = vand.u32 4294901760, %v4513_v33 }
  0x25   : > { %6734 = vst [vmem:[#allocation2_spill] sm:$0xff] %v4541_v5  ;;  %3752 = vmatpush3.bf16.msra.mxu0 %v4541_v5  ;;  %v336_v24 = vand.u32 4294901760, %v3043_v62  ;;  %v4561_v36 = vsub.f32 %v3058_v4, %v381_v19  ;;  %v450_v45 = vand.u32 4294901760, %v449_v54  ;;  %v4563_v49 = vpack.c.bf16 %v387_v12, %v384_v6  ;;  %v3061_v4 = vld [vmem:[%s6561_s1 + $0x1e0] sm:$0xff] }
  0x26   : > { %v457_v48 = vand.u32 4294901760, %v456_v2  ;;  %3774 = vmatprep.subr.bf16.mxu1 %v3773_v16  ;;  %v4565_v53 = vsub.f32 %v3041_v9, %v330_v32  ;;  %v575_v0 = vsub.f32 %v4497_v11, %v6568_v17  ;;  %v582_v1 = vsub.f32 %v4513_v33, %v6567_v18  ;;  %v3062_v9 = vld [vmem:[%s6561_s1 + $0x1e8] sm:$0xff]  ;;  %v3045_v16 = vld [vmem:[%s6561_s1 + $0x160] sm:$0xff] }
  0x27   : > { %6736 = vst [vmem:[#allocation3_spill] sm:$0xff] %v4563_v49  ;;  %v339_v59 = vand.u32 4294901760, %v3044_v3  ;;  %v4579_v19 = vsub.f32 %v3042_v23, %v333_v56  ;;  %3754 = vmatprep.subr.bf16.mxu0 %v4563_v49  ;;  %v6571_v54 = vand.u32 4294901760, %v4517_v47  ;;  %v6574_v2 = vand.u32 4294901760, %v4531_v57 }
  0x28   : > { %v3775_v32 = vpack.c.bf16 %v457_v48, %v450_v45  ;;  %v4587_v18 = vsub.f32 %v3059_v40, %v384_v6  ;;  %v576_v17 = vand.u32 4294901760, %v575_v0  ;;  %v583_v58 = vand.u32 4294901760, %v582_v1  ;;  %v3046_v6 = vld [vmem:[%s6561_s1 + $0x168] sm:$0xff] }
  0x29   : > { %v4589_v29 = vpack.c.bf16 %v339_v59, %v336_v24  ;;  %v463_v23 = vsub.f32 %v4517_v47, %v6571_v54  ;;  %v470_v56 = vsub.f32 %v4531_v57, %v6574_v2  ;;  %v390_v45 = vand.u32 4294901760, %v3061_v4 }
  0x2a   : > { %3776 = vmatpush3.bf16.msra.mxu1 %v3775_v32  ;;  %v393_v40 = vand.u32 4294901760, %v3062_v9  ;;  %v3777_v48 = vpack.c.bf16 %v583_v58, %v576_v17  ;;  %v6578_v0 = vand.u32 4294901760, %v4539_v63  ;;  %v6577_v1 = vand.u32 4294901760, %v4561_v36 }
  0x2b   : > { %6737 = vst [vmem:[#allocation4_spill] sm:$0xff] %v4589_v29  ;;  %3756 = vmatpush3.bf16.msra.mxu0 %v4589_v29  ;;  %v342_v32 = vand.u32 4294901760, %v3045_v16  ;;  %v4609_v54 = vsub.f32 %v3060_v50, %v387_v12  ;;  %v464_v28 = vand.u32 4294901760, %v463_v23  ;;  %v471_v8 = vand.u32 4294901760, %v470_v56  ;;  %v3063_v50 = vld [vmem:[%s6561_s1 + $0x1f0] sm:$0xff]  ;;  %v3064_v12 = vld [vmem:[%s6561_s1 + $0x1f8] sm:$0xff] }
  0x2c   : > { %v4611_v2 = vpack.c.bf16 %v393_v40, %v390_v45  ;;  %3778 = vmatprep.subr.bf16.mxu1 %v3777_v48  ;;  %v4613_v7 = vsub.f32 %v3043_v62, %v336_v24  ;;  %v589_v58 = vsub.f32 %v4539_v63, %v6578_v0  ;;  %v596_v17 = vsub.f32 %v4561_v36, %v6577_v1  ;;  %v3047_v48 = vld [vmem:[%s6561_s1 + $0x170] sm:$0xff] }
  0x2d   : > { %v345_v52 = vand.u32 4294901760, %v3046_v6  ;;  %v4628_v62 = vsub.f32 %v3044_v3, %v339_v59  ;;  %v3779_v24 = vpack.c.bf16 %v471_v8, %v464_v28  ;;  %v6582_v23 = vand.u32 4294901760, %v4565_v53 }
  0x2e   : > { %6738 = vst [vmem:[#allocation5_spill] sm:$0xff] %v4611_v2  ;;  %3758 = vmatprep.subr.bf16.mxu0 %v4611_v2  ;;  %v6581_v56 = vand.u32 4294901760, %v4579_v19  ;;  %v4636_v1 = vsub.f32 %v3061_v4, %v390_v45  ;;  %v590_v0 = vand.u32 4294901760, %v589_v58  ;;  %v597_v51 = vand.u32 4294901760, %v596_v17  ;;  %v3048_v4 = vld [vmem:[%s6561_s1 + $0x178] sm:$0xff]  ;;  %v4670_v2 = vld [vmem:[%s4652_s17 + $0x8] sm:$0xff] }
  0x2f   : > { %v4638_v35 = vpack.c.bf16 %v345_v52, %v342_v32  ;;  %3780 = vmatpush3.bf16.msra.mxu1 %v3779_v24  ;;  %v477_v8 = vsub.f32 %v4565_v53, %v6582_v23  ;;  %v396_v59 = vand.u32 4294901760, %v3063_v50  ;;  %v399_v3 = vand.u32 4294901760, %v3064_v12  ;;  %6741 = vst [vmem:[#allocation8_spill] sm:$0xff] %v4670_v2 }
  0x30   : > { %v484_v28 = vsub.f32 %v4579_v19, %v6581_v56  ;;  %v3781_v45 = vpack.c.bf16 %v597_v51, %v590_v0  ;;  %v6590_v58 = vand.u32 4294901760, %v4587_v18  ;;  %v6591_v17 = vand.u32 4294901760, %v4609_v54 }
  0x31   : > { %6739 = vst [vmem:[#allocation6_spill] sm:$0xff] %v4638_v35  ;;  %3760 = vmatpush3.bf16.msra.mxu0 %v4638_v35  ;;  %v348_v24 = vand.u32 4294901760, %v3047_v48  ;;  %v4657_v56 = vsub.f32 %v3062_v9, %v393_v40  ;;  %v478_v23 = vand.u32 4294901760, %v477_v8  ;;  %v4659_v43 = vpack.c.bf16 %v399_v3, %v396_v59  ;;  %v226_v9 = vld [vmem:[%s4652_s17 + $0x18] sm:$0x3] }
  0x32   : > { %v485_v34 = vand.u32 4294901760, %v484_v28  ;;  %3782 = vmatprep.subr.bf16.mxu1 %v3781_v45  ;;  %v4661_v39 = vsub.f32 %v3045_v16, %v342_v32  ;;  %v603_v51 = vsub.f32 %v4587_v18, %v6590_v58  ;;  %v610_v0 = vsub.f32 %v4609_v54, %v6591_v17 }
  0x33   : > { %6740 = vst [vmem:[#allocation7_spill] sm:$0xff] %v4659_v43  ;;  %v351_v35 = vand.u32 4294901760, %v3048_v4  ;;  %v4673_v40 = vsub.f32 %v3046_v6, %v345_v52  ;;  %3762 = vmatprep.subr.bf16.mxu0 %v4659_v43  ;;  %v6594_v16 = vand.u32 4294901760, %v4613_v7  ;;  %v6599_v32 = vand.u32 4294901760, %v4628_v62  ;;  %v4690_v43 = vld [vmem:[%s4652_s17] sm:$0xff] }
  0x34   : > { %v3783_v8 = vpack.c.bf16 %v485_v34, %v478_v23  ;;  %v4678_v28 = vsub.f32 %v3063_v50, %v396_v59  ;;  %v604_v45 = vand.u32 4294901760, %v603_v51  ;;  %v611_v58 = vand.u32 4294901760, %v610_v0  ;;  %6744 = vst [vmem:[#allocation11_spill] sm:$0xff] %v4690_v43 }
  0x35   : > { %v4680_v17 = vpack.c.bf16 %v351_v35, %v348_v24  ;;  %v491_v52 = vsub.f32 %v4613_v7, %v6594_v16  ;;  %v498_v34 = vsub.f32 %v4628_v62, %v6599_v32  ;;  %v300_v6 = vrot.slane %v4670_v2, 1 }
  0x36   : > { %6742 = vst [vmem:[#allocation9_spill] sm:$0xff] %v4678_v28  ;;  %3784 = vmatpush3.bf16.msra.mxu1 %v3783_v8  ;;  %v301_v23 = vrot.slane %v226_v9, 1  ;;  %v4692_v50 = vsub.f32 %v3064_v12, %v399_v3  ;;  %v3785_v59 = vpack.c.bf16 %v611_v58, %v604_v45  ;;  %v6602_v51 = vand.u32 4294901760, %v4636_v1  ;;  %v225_v8 = vld [vmem:[%s4652_s17 + $0x10] sm:$0x3] }
  0x37   : > { %6743 = vst [vmem:[#allocation10_spill] sm:$0xff] %v4680_v17  ;;  %3764 = vmatpush3.bf16.msra.mxu0 %v4680_v17  ;;  %v6606_v0 = vand.u32 4294901760, %v4657_v56  ;;  %v492_v16 = vand.u32 4294901760, %v491_v52  ;;  %v499_v29 = vand.u32 4294901760, %v498_v34  ;;  %v3797_v32 = vpack.c.bf16 %v4425_v31, %v4423_v30 }
  0x38   : > { %6745 = vst [vmem:[#allocation12_spill] sm:$0xff] %v4692_v50  ;;  %v302_v49 = vsel %vm296_vm0, %v300_v6, %v301_v23  ;;  %3786 = vmatprep.subr.bf16.mxu1 %v3785_v59  ;;  %v617_v12 = vsub.f32 %v4636_v1, %v6602_v51  ;;  %v297_v58 = vrot.slane %v4690_v43, 1  ;;  %v4710_v45 = vsub.f32 %v3047_v48, %v348_v24 }
  0x39   : > { %v4701_v9 = vand.u32 4294901760, %v302_v49  ;;  %v624_v3 = vsub.f32 %v4657_v56, %v6606_v0  ;;  %v3787_v52 = vpack.c.bf16 %v499_v29, %v492_v16  ;;  %3798 = vmatprep.subr.bf16.mxu0 %v3797_v32  ;;  %v298_v34 = vrot.slane %v225_v8, 1 }
  0x3a   : > { %v6605_v6 = vand.u32 4294901760, %v4661_v39  ;;  %v618_v59 = vand.u32 4294901760, %v617_v12  ;;  %v511_v51 = vand.u32 4294901760, %v4673_v40  ;;  %v4718_v17 = vsub.f32 %v3048_v4, %v351_v35 }
  0x3b   : > { %6746 = vst [vmem:[#allocation13_spill] sm:$0xff] %v4701_v9  ;;  %v4714_v23 = vsub.f32 %v302_v49, %v4701_v9  ;;  %v625_v2 = vand.u32 4294901760, %v624_v3  ;;  %642 = vmatprep.mubr.f32.mxu1 %v4701_v9  ;;  %3788 = vmatpush3.bf16.msra.mxu1 %v3787_v52  ;;  %v299_v48 = vsel %vm296_vm0, %v297_v58, %v298_v34  ;;  %v630_v24 = vand.u32 4294901760, %v4678_v28 }
  0x3c   : > { %v505_v29 = vsub.f32 %v4661_v39, %v6605_v6  ;;  %v4726_v32 = vand.u32 4294901760, %v299_v48  ;;  %v512_v8 = vsub.f32 %v4673_v40, %v511_v51  ;;  %v637_v4 = vand.u32 4294901760, %v4692_v50 }
  0x3d   : > { %v403_v49 = vand.u32 4294901760, %v4714_v23  ;;  %v3789_v16 = vpack.c.bf16 %v625_v2, %v618_v59  ;;  %v631_v35 = vsub.f32 %v4678_v28, %v630_v24  ;;  %v518_v34 = vand.u32 4294901760, %v4710_v45 }
  0x3e   : > { %v506_v12 = vand.u32 4294901760, %v505_v29  ;;  %v4733_v58 = vsub.f32 %v299_v48, %v4726_v32  ;;  %v513_v52 = vand.u32 4294901760, %v512_v8  ;;  %v638_v2 = vsub.f32 %v4692_v50, %v637_v4 }
  0x3f   : > { %v404_v3 = vsub.f32 %v4714_v23, %v403_v49  ;;  %3790 = vmatprep.subr.bf16.mxu1 %v3789_v16  ;;  %v632_v6 = vand.u32 4294901760, %v631_v35  ;;  %v525_v59 = vand.u32 4294901760, %v4718_v17  ;;  %v519_v9 = vsub.f32 %v4710_v45, %v518_v34 }
  0x40   : > { %v6615_v29 = vand.u32 4294901760, %v4733_v58  ;;  %v3791_v43 = vpack.c.bf16 %v513_v52, %v506_v12  ;;  %v639_v28 = vand.u32 4294901760, %v638_v2  ;;  %v3799_v35 = vpack.c.bf16 %v4405_v21, %v4395_v15 }
  0x41   : > { %v405_v0 = vand.u32 4294901760, %v404_v3  ;;  %v526_v16 = vsub.f32 %v4718_v17, %v525_v59  ;;  %v520_v8 = vand.u32 4294901760, %v519_v9  ;;  %v3801_v12 = vpack.c.bf16 %v4418_v26, %v4416_v25 }
  0x42   : > { %v410_v48 = vsub.f32 %v4733_v58, %v6615_v29  ;;  %3792 = vmatpush3.bf16.msra.mxu1 %v3791_v43  ;;  %v3793_v50 = vpack.c.bf16 %v639_v28, %v632_v6  ;;  %v3805_v2 = vpack.c.bf16 %v4470_v55, %v4443_v42  ;;  %v6747_v43 = vand.u32 4294901760, %v4423_v30 }
  0x43   : > { %406 = vmatprep.mubr.f32.mxu0 %v405_v0  ;;  %v527_v3 = vand.u32 4294901760, %v526_v16  ;;  %v3803_v0 = vpack.c.bf16 %v4441_v41, %v4433_v37  ;;  %v6748_v9 = vand.u32 4294901760, %v4425_v31  ;;  %v6749_v28 = vand.u32 4294901760, %v4395_v15 }
  0x44   : > { %v411_v5 = vand.u32 4294901760, %v410_v48  ;;  %3794 = vmatprep.subr.bf16.mxu1 %v3793_v50  ;;  %v6750_v6 = vand.u32 4294901760, %v4405_v21  ;;  %v6751_v50 = vand.u32 4294901760, %v4416_v25  ;;  %v6752_v48 = vand.u32 4294901760, %v4418_v26 }
  0x45   : > { %v3795_v52 = vpack.c.bf16 %v527_v3, %v520_v8  ;;  %v4756_v29 = vpack.c.bf16 %v6748_v9, %v6747_v43  ;;  %v6754_v30 = vand.u32 4294901760, %v4441_v41  ;;  %v6755_v15 = vand.u32 4294901760, %v4443_v42 }
  0x46   : > { %412 = vmatmul.mubr.f32.vlgmr.msra.gmra.mrb[0].mxu0 %v411_v5  ;;  %v4762_v16 = vpack.c.bf16 %v6750_v6, %v6749_v28  ;;  %v4768_v8 = vpack.c.bf16 %v6752_v48, %v6751_v50  ;;  %v6753_v5 = vand.u32 4294901760, %v4433_v37  ;;  %v6756_v21 = vand.u32 4294901760, %v4470_v55 }
  0x47   : > { %3800 = vmatpush3.bf16.msra.mxu0 %v3799_v35  ;;  %3796 = vmatpush3.bf16.msra.mxu1 %v3795_v52  ;;  %v6757_v25 = vand.u32 4294901760, %v4472_v60  ;;  %v6758_v26 = vand.u32 4294901760, %v4495_v10  ;;  %v6759_v37 = vand.u32 4294901760, %v4497_v11  ;;  %v6760_v41 = vand.u32 4294901760, %v4513_v33 }
  0x48   : > { %v4774_v3 = vpack.c.bf16 %v6754_v30, %v6753_v5  ;;  %v4780_v31 = vpack.c.bf16 %v6756_v21, %v6755_v15  ;;  %3802 = vmatprep.subr.bf16.mxu0 %v3801_v12  ;;  %3830 = vmatprep.subr.bf16.mxu1 %v4393_v14  ;;  %v6761_v42 = vand.u32 4294901760, %v4517_v47  ;;  %v6762_v55 = vand.u32 4294901760, %v4531_v57 }
  0x49   : > { %v4786_v43 = vpack.c.bf16 %v6758_v26, %v6757_v25  ;;  %v4792_v9 = vpack.c.bf16 %v6760_v41, %v6759_v37  ;;  %v6763_v52 = vand.u32 4294901760, %v4539_v63  ;;  %v6764_v28 = vand.u32 4294901760, %v4561_v36  ;;  %779 = vmatprep.mubr.f32.mxu0 %v4714_v23 }
  0x4a   : > { %v4799_v35 = vpack.c.bf16 %v6762_v55, %v6761_v42  ;;  %v6765_v50 = vand.u32 4294901760, %v4565_v53  ;;  %v6766_v48 = vand.u32 4294901760, %v4579_v19  ;;  %v6767_v12 = vand.u32 4294901760, %v4587_v18  ;;  %644 = vmatmul.mubr.f32.vlgmr.msra.gmra.mrb[0].mxu1 %v4726_v32 }
  0x4b   : > { %v4805_v6 = vpack.c.bf16 %v6764_v28, %v6763_v52  ;;  %v6768_v30 = vand.u32 4294901760, %v4609_v54  ;;  %v6769_v21 = vand.u32 4294901760, %v4613_v7  ;;  %v6770_v25 = vand.u32 4294901760, %v4628_v62  ;;  %3804 = vmatpush3.bf16.msra.mxu0 %v3803_v0  ;;  %3832 = vmatpush3.bf16.msra.mxu1 %v4403_v20 }
  0x4c   : > { %v4811_v5 = vpack.c.bf16 %v6766_v48, %v6765_v50  ;;  %v6771_v37 = vand.u32 4294901760, %v4636_v1  ;;  %v6772_v41 = vand.u32 4294901760, %v4657_v56  ;;  %v6773_v23 = vand.u32 4294901760, %v4661_v39  ;;  %3806 = vmatprep.subr.bf16.mxu0 %v3805_v2  ;;  %3834 = vmatprep.subr.bf16.mxu1 %v4407_v22  ;;  %v245_v2 = vld [vmem:[%s6561_s1 + $0x90] sm:$0xff] }
  0x4d   : > { %v4818_v15 = vpack.c.bf16 %v6768_v30, %v6767_v12  ;;  %v4824_v26 = vpack.c.bf16 %v6770_v25, %v6769_v21  ;;  %v4837_v52 = vpack.c.bf16 %v637_v4, %v630_v24  ;;  %v4839_v28 = vpack.c.bf16 %v525_v59, %v518_v34  ;;  %886 = vmatprep.mubr.f32.mxu1 %v403_v49  ;;  %v6778_v4 = vld [vmem:[#allocation4_spill] sm:$0xff]  ;;  %v6779_v34 = vld [vmem:[#allocation5_spill] sm:$0xff] }
  0x4e   : > { %v4830_v42 = vpack.c.bf16 %v6772_v41, %v6771_v37  ;;  %v4834_v55 = vpack.c.bf16 %v511_v51, %v6773_v23  ;;  %v3807_v50 = vpack.c.bf16 %v4495_v10, %v4472_v60  ;;  %v3809_v48 = vpack.c.bf16 %v4513_v33, %v4497_v11  ;;  %v4905_v25 = vld [vmem:[%s6561_s1 + $0x10] sm:$0xff]  ;;  %v6781_v37 = vld [vmem:[#allocation7_spill] sm:$0xff]  ;;  %v4912_v41 = vld [vmem:[%s6561_s1 + $0x18] sm:$0xff] }
  0x4f   : > { %v3811_v51 = vpack.c.bf16 %v4531_v57, %v4517_v47  ;;  %3836 = vmatpush3.bf16.msra.mxu1 %v4420_v27  ;;  %v3813_v24 = vpack.c.bf16 %v4561_v36, %v4539_v63  ;;  %v3815_v60 = vpack.c.bf16 %v4579_v19, %v4565_v53  ;;  %v3817_v10 = vpack.c.bf16 %v4609_v54, %v4587_v18  ;;  %v243_v47 = vld [vmem:[%s6561_s1 + $0x80] sm:$0xff]  ;;  %v244_v57 = vld [vmem:[%s6561_s1 + $0x88] sm:$0xff]  ;;  %v6775_v53 = vld [vmem:[#allocation9_spill] sm:$0xff] }
  0x50   : > { %3808 = vmatpush3.bf16.msra.mxu0 %v3807_v50  ;;  %3838 = vmatprep.subr.bf16.mxu1 %v4435_v38  ;;  %v3819_v11 = vpack.c.bf16 %v4628_v62, %v4613_v7  ;;  %v3821_v33 = vpack.c.bf16 %v4657_v56, %v4636_v1  ;;  %v3823_v7 = vpack.c.bf16 %v4673_v40, %v4661_v39  ;;  %v6774_v63 = vld [vmem:[#allocation2_spill] sm:$0xff]  ;;  %v228_v36 = vld [vmem:[%s6561_s1 + $0x8] sm:$0xff]  ;;  %v6776_v19 = vld [vmem:[#allocation12_spill] sm:$0xff]  ;;  %v1216_v62 = vand.u32 4294901760, %v243_v47 }
  0x51   : > { %3810 = vmatprep.subr.bf16.mxu0 %v3809_v48  ;;  %v227_v18 = vld [vmem:[%s6561_s1] sm:$0xff]  ;;  %v3825_v54 = vpack.c.bf16 %v6776_v19, %v6775_v53  ;;  %v6777_v1 = vld [vmem:[#allocation3_spill] sm:$0xff]  ;;  %v1219_v56 = vand.u32 4294901760, %v244_v57  ;;  %v1171_v39 = vand.u32 4294901760, %v228_v36  ;;  %v3827_v40 = vpack.c.bf16 %v4718_v17, %v4710_v45  ;;  %v246_v17 = vld [vmem:[%s6561_s1 + $0x98] sm:$0xff] }
  0x52   : > { %v1168_v49 = vand.u32 4294901760, %v227_v18  ;;  %v4887_v59 = vsub.f32 %v243_v47, %v1216_v62  ;;  %v6780_v45 = vld [vmem:[#allocation6_spill] sm:$0xff]  ;;  %v1222_v21 = vand.u32 4294901760, %v245_v2  ;;  %v4922_v50 = vld [vmem:[%s6561_s1 + $0xa8] sm:$0xff] }
  0x53   : > { %3840 = vmatpush3.bf16.msra.mxu1 %v4446_v44  ;;  %v4889_v0 = vsub.f32 %v244_v57, %v1219_v56  ;;  %v4896_v30 = vsub.f32 %v228_v36, %v1171_v39  ;;  %v4917_v23 = vld [vmem:[%s6561_s1 + $0xa0] sm:$0xff]  ;;  %6783 = vst [vmem:[#allocation9_spill] sm:$0xff] %v4922_v50 }
  0x54   : > { %3812 = vmatpush3.bf16.msra.mxu0 %v3811_v51  ;;  %3842 = vmatprep.subr.bf16.mxu1 %v4474_v61  ;;  %v4894_v12 = vsub.f32 %v227_v18, %v1168_v49  ;;  %6782 = vst [vmem:[#allocation2_spill] sm:$0xff] %v4917_v23  ;;  %v6616_v48 = vand.u32 4294901760, %v4887_v59  ;;  %v1225_v51 = vand.u32 4294901760, %v246_v17  ;;  %v6786_v47 = vld [vmem:[#allocation10_spill] sm:$0xff]  ;;  %v4942_v57 = vsub.f32 %v245_v2, %v1222_v21 }
  0x55   : > { %3814 = vmatprep.subr.bf16.mxu0 %v3813_v24  ;;  %v4929_v24 = vld [vmem:[%s6561_s1 + $0x20] sm:$0xff]  ;;  %v6620_v18 = vand.u32 4294901760, %v4917_v23  ;;  %v4959_v2 = vpack.c.bf16 %v1171_v39, %v1168_v49  ;;  %v4996_v39 = vld [vmem:[%s6561_s1 + $0x30] sm:$0xff] }
  0x56   : > { %6784 = vst [vmem:[#allocation12_spill] sm:$0xff] %v4929_v24  ;;  %v1395_v53 = vsub.f32 %v4887_v59, %v6616_v48  ;;  %v6622_v19 = vand.u32 4294901760, %v4929_v24  ;;  %v4961_v36 = vsub.f32 %v246_v17, %v1225_v51  ;;  %v6791_v48 = vand.u32 4294901760, %v4733_v58  ;;  %6796 = vst [vmem:[#allocation16_spill] sm:$0xff] %v4996_v39 }
  0x57   : > { %3844 = vmatpush3.bf16.msra.mxu1 %v4499_v13  ;;  %6789 = vst [vmem:[#allocation5_spill] sm:$0xff] %v4959_v2 }
  0x58   : > { %3816 = vmatpush3.bf16.msra.mxu0 %v3815_v60  ;;  %3846 = vmatprep.subr.bf16.mxu1 %v4515_v46  ;;  %v6618_v60 = vand.u32 4294901760, %v4905_v25 }
  0x59   : > { %3818 = vmatprep.subr.bf16.mxu0 %v3817_v10  ;;  %v4936_v10 = vld [vmem:[%s6561_s1 + $0x28] sm:$0xff] }
  0x5a   : > { %6785 = vst [vmem:[#allocation3_spill] sm:$0xff] %v4936_v10 }
  0x5b   : > { %3848 = vmatpush3.bf16.msra.mxu1 %v6774_v63 }
  0x5c   : > { %3820 = vmatpush3.bf16.msra.mxu0 %v3819_v11  ;;  %3850 = vmatprep.subr.bf16.mxu1 %v6777_v1  ;;  %v6623_v11 = vand.u32 4294901760, %v4894_v12 }
  0x5d   : > { %3822 = vmatprep.subr.bf16.mxu0 %v3821_v33  ;;  %v6621_v33 = vand.u32 4294901760, %v4896_v30 }
  0x5f   : > { %3852 = vmatpush3.bf16.msra.mxu1 %v6778_v4  ;;  %v4986_v49 = vsub.f32 %v4896_v30, %v6621_v33  ;;  %v5032_v33 = vld [vmem:[%s6561_s1 + $0xc0] sm:$0xff] }
  0x60   : > { %3824 = vmatpush3.bf16.msra.mxu0 %v3823_v7  ;;  %3854 = vmatprep.subr.bf16.mxu1 %v6779_v34  ;;  %v6619_v7 = vand.u32 4294901760, %v4912_v41  ;;  %6800 = vst [vmem:[#allocation19_spill] sm:$0xff] %v5032_v33 }
  0x61   : > { %3826 = vmatprep.subr.bf16.mxu0 %v3825_v54  ;;  %v6787_v54 = vld [vmem:[#allocation13_spill] sm:$0xff]  ;;  %6794 = vst [vmem:[#allocation14_spill] sm:$0xff] %v4986_v49 }
  0x62   : > { %v5003_v17 = vsub.f32 %v4912_v41, %v6619_v7  ;;  %v5201_v49 = vld [vmem:[%s6561_s1 + $0xf8] sm:$0xff] }
  0x63   : > { %3856 = vmatpush3.bf16.msra.mxu1 %v6780_v45  ;;  %6828 = vst [vmem:[#allocation33_spill] sm:$0xff] %v5201_v49 }
  0x64   : > { %3828 = vmatpush3.bf16.msra.mxu0 %v3827_v40  ;;  %3858 = vmatprep.subr.bf16.mxu1 %v6781_v37  ;;  %v4957_v40 = vpack.c.bf16 %v1219_v56, %v1216_v62  ;;  %v4976_v62 = vsub.f32 %v4905_v25, %v6618_v60  ;;  %v4981_v56 = vsub.f32 %v4894_v12, %v6623_v11  ;;  %v5070_v60 = vld [vmem:[%s6561_s1 + $0x48] sm:$0xff] }
  0x65   : > { %3862 = vmatprep.subr.bf16.mxu0 %v4756_v29  ;;  %v6617_v29 = vand.u32 4294901760, %v4889_v0  ;;  %6806 = vst [vmem:[#allocation24_spill] sm:$0xff] %v5070_v60 }
  0x66   : > { %6788 = vst [vmem:[#allocation4_spill] sm:$0xff] %v4957_v40  ;;  %6793 = vst [vmem:[#allocation13_spill] sm:$0xff] %v4981_v56 }
  0x67   : > { %782 = vmatmul.mubr.f32.vlgmr.msra.gmra.mrb[2].mxu0 %v4733_v58  ;;  %3860 = vmatpush3.bf16.msra.mxu1 %v6786_v47  ;;  %v4991_v58 = vld [vmem:[%s6561_s1 + $0xb8] sm:$0xff] }
  0x68   : > { %3864 = vmatpush3.bf16.msra.mxu0 %v4762_v16  ;;  %3894 = vmatprep.subr.bf16.mxu1 %v4393_v14  ;;  %v1402_v16 = vsub.f32 %v4889_v0, %v6617_v29  ;;  %v6625_v14 = vand.u32 4294901760, %v4936_v10  ;;  %v4971_v29 = vpack.c.bf16 %v1225_v51, %v1222_v21  ;;  %6795 = vst [vmem:[#allocation15_spill] sm:$0xff] %v4991_v58 }
  0x69   : > { %3866 = vmatprep.subr.bf16.mxu0 %v4768_v8  ;;  %1056 = vmatprep.mubr.f32.mxu0 %v6787_v54  ;;  %v4967_v8 = vld [vmem:[%s6561_s1 + $0xb0] sm:$0xff]  ;;  %v5008_v21 = vsub.f32 %v4917_v23, %v6620_v18  ;;  %v5026_v18 = vsub.f32 %v4929_v24, %v6622_v19 }
  0x6a   : > { %6790 = vst [vmem:[#allocation6_spill] sm:$0xff] %v4967_v8  ;;  %890 = vmatmul.mubr.f32.vlgmr.msra.gmra.mrb[2].mxu1 %v6791_v48  ;;  %6792 = vst [vmem:[#allocation7_spill] sm:$0xff] %v4971_v29  ;;  %v6797_v48 = vand.u32 4294901760, %v4922_v50  ;;  %v1403_v7 = vand.u32 4294901760, %v1402_v16 }
  0x6b   : > { %3896 = vmatpush3.bf16.msra.mxu1 %v4403_v20  ;;  %v5019_v20 = vld [vmem:[%s6561_s1 + $0x38] sm:$0xff]  ;;  %6799 = vst [vmem:[#allocation18_spill] sm:$0xff] %v5026_v18  ;;  %1160 = vmatprep.mubr.f32.mxu1 %v6787_v54  ;;  %v5055_v54 = vld [vmem:[%s6561_s1 + $0x40] sm:$0xff] }
  0x6c   : > { %3868 = vmatpush3.bf16.msra.mxu0 %v4774_v3  ;;  %v5013_v51 = vsub.f32 %v4922_v50, %v6797_v48  ;;  %6798 = vst [vmem:[#allocation17_spill] sm:$0xff] %v5019_v20  ;;  %3898 = vmatprep.subr.bf16.mxu1 %v4407_v22  ;;  %v1396_v3 = vand.u32 4294901760, %v1395_v53  ;;  %v5043_v22 = vsub.f32 %v4936_v10, %v6625_v14  ;;  %v6626_v53 = vand.u32 4294901760, %v4991_v58 }
  0x6d   : > { %3870 = vmatprep.subr.bf16.mxu0 %v4780_v31  ;;  %v5037_v31 = vld [vmem:[%s6561_s1 + $0xc8] sm:$0xff]  ;;  %6803 = vst [vmem:[#allocation22_spill] sm:$0xff] %v5055_v54  ;;  %v6804_v14 = vand.u32 4294901760, %v4942_v57  ;;  %v6812_v11 = vand.u32 4294901760, %v5019_v20 }
  0x6e   : > { %6801 = vst [vmem:[#allocation20_spill] sm:$0xff] %v5037_v31  ;;  %6802 = vst [vmem:[#allocation21_spill] sm:$0xff] %v5043_v22  ;;  %v5091_v16 = vsub.f32 %v4991_v58, %v6626_v53  ;;  %v6813_v53 = vand.u32 4294901760, %v4976_v62 }
  0x6f   : > { %3900 = vmatpush3.bf16.msra.mxu1 %v4420_v27  ;;  %v5062_v19 = vsub.f32 %v4942_v57, %v6804_v14  ;;  %v5075_v27 = vld [vmem:[%s6561_s1 + $0xd0] sm:$0xff]  ;;  %v6808_v14 = vand.u32 4294901760, %v4967_v8  ;;  %v5107_v48 = vsub.f32 %v5019_v20, %v6812_v11  ;;  %v6815_v20 = vand.u32 4294901760, %v5032_v33 }
  0x70   : > { %3872 = vmatpush3.bf16.msra.mxu0 %v4786_v43  ;;  %3902 = vmatprep.subr.bf16.mxu1 %v4435_v38  ;;  %v5079_v43 = vpack.c.bf16 %v1403_v7, %v1396_v3  ;;  %v6811_v7 = vand.u32 4294901760, %v4996_v39  ;;  %v5112_v58 = vsub.f32 %v4976_v62, %v6813_v53  ;;  %v6814_v53 = vand.u32 4294901760, %v5003_v17 }
  0x71   : > { %6805 = vst [vmem:[#allocation23_spill] sm:$0xff] %v5062_v19  ;;  %3874 = vmatprep.subr.bf16.mxu0 %v4792_v9  ;;  %v5084_v24 = vsub.f32 %v4967_v8, %v6808_v14  ;;  %v6810_v9 = vand.u32 4294901760, %v4961_v36  ;;  %v5118_v8 = vld [vmem:[%s6561_s1 + $0xd8] sm:$0xff]  ;;  %v5124_v14 = vld [vmem:[%s6561_s1 + $0x50] sm:$0xff] }
  0x72   : > { %6807 = vst [vmem:[#allocation25_spill] sm:$0xff] %v5079_v43  ;;  %v5101_v3 = vsub.f32 %v4996_v39, %v6811_v7  ;;  %v5137_v7 = vsub.f32 %v5032_v33, %v6815_v20  ;;  %v6816_v39 = vand.u32 4294901760, %v5037_v31  ;;  %v6818_v20 = vand.u32 4294901760, %v5008_v21  ;;  %v5170_v33 = vld [vmem:[%s6561_s1 + $0xe8] sm:$0xff] }
  0x73   : > { %6809 = vst [vmem:[#allocation26_spill] sm:$0xff] %v5084_v24  ;;  %v5096_v38 = vsub.f32 %v4961_v36, %v6810_v9  ;;  %3904 = vmatpush3.bf16.msra.mxu1 %v4446_v44  ;;  %v5132_v9 = vsub.f32 %v5003_v17, %v6814_v53  ;;  %v5147_v44 = vld [vmem:[%s6561_s1 + $0x58] sm:$0xff]  ;;  %v6830_v43 = vand.u32 4294901760, %v5070_v60 }
  0x74   : > { %3876 = vmatpush3.bf16.msra.mxu0 %v4799_v35  ;;  %v5142_v10 = vsub.f32 %v5037_v31, %v6816_v39  ;;  %6817 = vst [vmem:[#allocation27_spill] sm:$0xff] %v5147_v44  ;;  %v5152_v35 = vld [vmem:[%s6561_s1 + $0xe0] sm:$0xff]  ;;  %3906 = vmatprep.subr.bf16.mxu1 %v4474_v61  ;;  %v5159_v53 = vsub.f32 %v5008_v21, %v6818_v20  ;;  %v6820_v39 = vand.u32 4294901760, %v5013_v51  ;;  %v6824_v20 = vld [vmem:[#allocation8_spill] sm:$0xff]  ;;  %v6826_v31 = vand.u32 4294901760, %v5055_v54 }
  0x75   : > { %3878 = vmatprep.subr.bf16.mxu0 %v4805_v6  ;;  %v5175_v61 = vld [vmem:[%s6561_s1 + $0x60] sm:$0xff]  ;;  %v5180_v6 = vld [vmem:[%s6561_s1 + $0x68] sm:$0xff]  ;;  %v5211_v29 = vsub.f32 %v5070_v60, %v6830_v43  ;;  %v6642_v56 = vand.u32 4294901760, %v5147_v44  ;;  %v6833_v60 = vand.u32 4294901760, %v5118_v8 }
  0x76   : > { %6819 = vst [vmem:[#allocation28_spill] sm:$0xff] %v5159_v53  ;;  %v5164_v11 = vsub.f32 %v5013_v51, %v6820_v39  ;;  %6822 = vst [vmem:[#allocation30_spill] sm:$0xff] %v5175_v61  ;;  %v5183_v39 = vand.u32 4294901760, %v6824_v20  ;;  %v5188_v19 = vsub.f32 %v5055_v54, %v6826_v31  ;;  %v5196_v53 = vld [vmem:[%s6561_s1 + $0xf0] sm:$0xff] }
  0x77   : > { %6823 = vst [vmem:[#allocation31_spill] sm:$0xff] %v5180_v6  ;;  %6827 = vst [vmem:[#allocation32_spill] sm:$0xff] %v5196_v53  ;;  %v5206_v31 = vld [vmem:[%s6561_s1 + $0x70] sm:$0xff]  ;;  %3908 = vmatpush3.bf16.msra.mxu1 %v4499_v13  ;;  %v5243_v47 = vsub.f32 %v5118_v8, %v6833_v60  ;;  %v5255_v23 = vsub.f32 %v5147_v44, %v6642_v56 }
  0x78   : > { %6821 = vst [vmem:[#allocation29_spill] sm:$0xff] %v5164_v11  ;;  %6825 = vst [vmem:[#allocation8_spill] sm:$0xff] %v5183_v39  ;;  %v6831_v11 = vand.u32 4294901760, %v5075_v27  ;;  %3880 = vmatpush3.bf16.msra.mxu0 %v4811_v5  ;;  %3910 = vmatprep.subr.bf16.mxu1 %v4515_v46  ;;  %v5238_v43 = vsub.f32 %v6824_v20, %v5183_v39  ;;  %v6836_v5 = vand.u32 4294901760, %v5152_v35  ;;  %v6838_v20 = vand.u32 4294901760, %v5175_v61 }
  0x79   : > { %6829 = vst [vmem:[#allocation34_spill] sm:$0xff] %v5206_v31  ;;  %3882 = vmatprep.subr.bf16.mxu0 %v4818_v15  ;;  %6834 = vst [vmem:[#allocation36_spill] sm:$0xff] %v5243_v47  ;;  %v6835_v15 = vand.u32 4294901760, %v5124_v14 }
  0x7a   : > { %v5216_v54 = vsub.f32 %v5075_v27, %v6831_v11  ;;  %v5229_v11 = vld [vmem:[%s6561_s1 + $0x78] sm:$0xff]  ;;  %6832 = vst [vmem:[#allocation35_spill] sm:$0xff] %v5238_v43  ;;  %v5261_v60 = vsub.f32 %v5152_v35, %v6836_v5  ;;  %v5275_v44 = vsub.f32 %v5175_v61, %v6838_v20  ;;  %v6839_v5 = vand.u32 4294901760, %v5180_v6 }
  0x7b   : > { %v5249_v46 = vsub.f32 %v5124_v14, %v6835_v15  ;;  %3912 = vmatpush3.bf16.msra.mxu1 %v6774_v63  ;;  %v6837_v15 = vand.u32 4294901760, %v5170_v33  ;;  %v6842_v20 = vand.u32 4294901760, %v5206_v31 }
  0x7c   : > { %3884 = vmatpush3.bf16.msra.mxu0 %v4824_v26  ;;  %v5280_v50 = vsub.f32 %v5180_v6, %v6839_v5  ;;  %3914 = vmatprep.subr.bf16.mxu1 %v6777_v1  ;;  %v6840_v26 = vand.u32 4294901760, %v5196_v53  ;;  %v6649_v5 = vand.u32 4294901760, %v5238_v43  ;;  %v6844_v6 = vand.u32 4294901760, %v4887_v59 }
  0x7d   : > { %v5269_v13 = vsub.f32 %v5170_v33, %v6837_v15  ;;  %3886 = vmatprep.subr.bf16.mxu0 %v4830_v42  ;;  %v6841_v15 = vand.u32 4294901760, %v5201_v49  ;;  %v5297_v61 = vsub.f32 %v5206_v31, %v6842_v20  ;;  %v6853_v1 = vand.u32 4294901760, %v4976_v62 }
  0x7e   : > { %v5287_v63 = vsub.f32 %v5196_v53, %v6840_v26  ;;  %v6845_v26 = vand.u32 4294901760, %v4889_v0 }
  0x7f   : > { %v5292_v56 = vsub.f32 %v5201_v49, %v6841_v15  ;;  %v6843_v15 = vand.u32 4294901760, %v5229_v11  ;;  %3916 = vmatpush3.bf16.msra.mxu1 %v6778_v4  ;;  %v6854_v4 = vand.u32 4294901760, %v5003_v17 }
  0x80   : > { %3888 = vmatpush3.bf16.msra.mxu0 %v4834_v55  ;;  %3918 = vmatprep.subr.bf16.mxu1 %v6779_v34  ;;  %v5330_v31 = vpack.c.bf16 %v6845_v26, %v6844_v6  ;;  %v6848_v34 = vand.u32 4294901760, %v4896_v30  ;;  %v6851_v55 = vand.u32 4294901760, %v4961_v36  ;;  %v6856_v6 = vand.u32 4294901760, %v5008_v21 }
  0x81   : > { %v5308_v49 = vsub.f32 %v5229_v11, %v6843_v15  ;;  %3890 = vmatprep.subr.bf16.mxu0 %v4837_v52  ;;  %v1266_v15 = vsub.f32 %v5238_v43, %v6649_v5  ;;  %v6847_v52 = vand.u32 4294901760, %v4894_v12  ;;  %v6850_v5 = vand.u32 4294901760, %v4942_v57  ;;  %v6908_v43 = vld [vmem:[#allocation29_spill] sm:$0xff] }
  0x82   : > { %6846 = vst [vmem:[#allocation37_spill] sm:$0xff] %v5330_v31  ;;  %v5348_v42 = vpack.c.bf16 %v6854_v4, %v6853_v1  ;;  %v6857_v26 = vand.u32 4294901760, %v5013_v51  ;;  %v6865_v1 = vand.u32 4294901760, %v5101_v3  ;;  %v6866_v4 = vand.u32 4294901760, %v5107_v48 }
  0x83   : > { %v5336_v53 = vpack.c.bf16 %v6848_v34, %v6847_v52  ;;  %v5342_v20 = vpack.c.bf16 %v6851_v55, %v6850_v5  ;;  %v6859_v52 = vand.u32 4294901760, %v5026_v18  ;;  %v6860_v34 = vand.u32 4294901760, %v5043_v22  ;;  %3920 = vmatpush3.bf16.msra.mxu1 %v6780_v45 }
  0x84   : > { %6855 = vst [vmem:[#allocation40_spill] sm:$0xff] %v5348_v42  ;;  %v5354_v31 = vpack.c.bf16 %v6857_v26, %v6856_v6  ;;  %v6862_v5 = vand.u32 4294901760, %v5084_v24  ;;  %v6863_v55 = vand.u32 4294901760, %v5091_v16  ;;  %v5372_v42 = vpack.c.bf16 %v6866_v4, %v6865_v1  ;;  %3892 = vmatpush3.bf16.msra.mxu0 %v4839_v28  ;;  %3922 = vmatprep.subr.bf16.mxu1 %v6781_v37 }
  0x85   : > { %6849 = vst [vmem:[#allocation38_spill] sm:$0xff] %v5336_v53  ;;  %6852 = vst [vmem:[#allocation39_spill] sm:$0xff] %v5342_v20  ;;  %v5360_v53 = vpack.c.bf16 %v6860_v34, %v6859_v52  ;;  %v6868_v26 = vand.u32 4294901760, %v5137_v7  ;;  %v6869_v52 = vand.u32 4294901760, %v5142_v10  ;;  %v6874_v1 = vand.u32 4294901760, %v5216_v54  ;;  %3926 = vmatprep.subr.bf16.mxu0 %v4957_v40 }
  0x86   : > { %6858 = vst [vmem:[#allocation41_spill] sm:$0xff] %v5354_v31  ;;  %v5366_v20 = vpack.c.bf16 %v6863_v55, %v6862_v5  ;;  %6867 = vst [vmem:[#allocation44_spill] sm:$0xff] %v5372_v42  ;;  %v6871_v5 = vand.u32 4294901760, %v5188_v19  ;;  %v6872_v55 = vand.u32 4294901760, %v5211_v29  ;;  %v6875_v28 = vand.u32 4294901760, %v5243_v47 }
  0x87   : > { %6861 = vst [vmem:[#allocation42_spill] sm:$0xff] %v5360_v53  ;;  %v5381_v34 = vpack.c.bf16 %v6869_v52, %v6868_v26  ;;  %v1417_v45 = vand.u32 4294901760, %v5096_v38  ;;  %v6877_v26 = vand.u32 4294901760, %v5249_v46  ;;  %v6878_v52 = vand.u32 4294901760, %v5255_v23  ;;  %1058 = vmatmul.mubr.f32.vlgmr.msra.gmra.mrb[4].mxu0 %v4726_v32 }
  0x88   : > { %6864 = vst [vmem:[#allocation43_spill] sm:$0xff] %v5366_v20  ;;  %v5387_v20 = vpack.c.bf16 %v6872_v55, %v6871_v5  ;;  %v5393_v4 = vpack.c.bf16 %v6875_v28, %v6874_v1  ;;  %v6880_v5 = vand.u32 4294901760, %v5261_v60  ;;  %v6881_v55 = vand.u32 4294901760, %v5269_v13  ;;  %3928 = vmatpush3.bf16.msra.mxu0 %v4959_v2  ;;  %v6910_v2 = vld [vmem:[#allocation25_spill] sm:$0xff] }
  0x89   : > { %6870 = vst [vmem:[#allocation45_spill] sm:$0xff] %v5381_v34  ;;  %v5402_v6 = vpack.c.bf16 %v6878_v52, %v6877_v26  ;;  %v6883_v1 = vand.u32 4294901760, %v5275_v44  ;;  %v6884_v28 = vand.u32 4294901760, %v5280_v50  ;;  %v6886_v37 = vand.u32 4294901760, %v4905_v25 }
  0x8a   : > { %6873 = vst [vmem:[#allocation46_spill] sm:$0xff] %v5387_v20  ;;  %6876 = vst [vmem:[#allocation47_spill] sm:$0xff] %v5393_v4  ;;  %v5408_v20 = vpack.c.bf16 %v6881_v55, %v6880_v5  ;;  %v6887_v38 = vand.u32 4294901760, %v4912_v41  ;;  %v1267_v26 = vand.u32 4294901760, %v1266_v15  ;;  %v6889_v52 = vand.u32 4294901760, %v5287_v63 }
  0x8b   : > { %6879 = vst [vmem:[#allocation48_spill] sm:$0xff] %v5402_v6  ;;  %v5414_v4 = vpack.c.bf16 %v6884_v28, %v6883_v1  ;;  %v6890_v6 = vand.u32 4294901760, %v5292_v56  ;;  %v6892_v5 = vand.u32 4294901760, %v5297_v61  ;;  %v6893_v55 = vand.u32 4294901760, %v5308_v49 }
  0x8c   : > { %6882 = vst [vmem:[#allocation49_spill] sm:$0xff] %v5408_v20  ;;  %v5420_v34 = vpack.c.bf16 %v6887_v38, %v6886_v37  ;;  %v1298_v25 = vand.u32 4294901760, %v5112_v58  ;;  %v1305_v41 = vand.u32 4294901760, %v5132_v9  ;;  %v6895_v15 = vand.u32 4294901760, %v5026_v18  ;;  %v6897_v37 = vld [vmem:[#allocation10_spill] sm:$0xff]  ;;  %v6903_v58 = vld [vmem:[#allocation13_spill] sm:$0xff]  ;;  %1268 = vmatprep.mubr.f32.mxu0 %v1267_v26 }
  0x8d   : > { %6885 = vst [vmem:[#allocation50_spill] sm:$0xff] %v5414_v4  ;;  %v5426_v42 = vpack.c.bf16 %v6890_v6, %v6889_v52  ;;  %v5432_v20 = vpack.c.bf16 %v6893_v55, %v6892_v5  ;;  %v6896_v28 = vand.u32 4294901760, %v5043_v22  ;;  %3924 = vmatpush3.bf16.msra.mxu1 %v6897_v37  ;;  %v6898_v38 = vld [vmem:[#allocation2_spill] sm:$0xff]  ;;  %v6900_v5 = vld [vmem:[#allocation9_spill] sm:$0xff]  ;;  %v6904_v9 = vand.u32 4294901760, %v6903_v58  ;;  %v6911_v37 = vld [vmem:[#allocation23_spill] sm:$0xff] }
  0x8e   : > { %6888 = vst [vmem:[#allocation51_spill] sm:$0xff] %v5420_v34  ;;  %v1311_v1 = vsub.f32 %v5026_v18, %v6895_v15  ;;  %v6899_v52 = vand.u32 4294901760, %v6898_v38  ;;  %v6901_v55 = vand.u32 4294901760, %v6900_v5  ;;  %v6907_v15 = vld [vmem:[#allocation28_spill] sm:$0xff]  ;;  %v1431_v40 = vand.u32 4294901760, %v6908_v43  ;;  %3958 = vmatprep.subr.bf16.mxu1 %v6910_v2  ;;  %v6920_v2 = vld [vmem:[#allocation6_spill] sm:$0xff] }
  0x8f   : > { %6891 = vst [vmem:[#allocation52_spill] sm:$0xff] %v5426_v42  ;;  %6894 = vst [vmem:[#allocation53_spill] sm:$0xff] %v5432_v20  ;;  %v1318_v6 = vsub.f32 %v5043_v22, %v6896_v28  ;;  %v6905_v42 = vld [vmem:[#allocation14_spill] sm:$0xff]  ;;  %v1424_v31 = vand.u32 4294901760, %v6907_v15  ;;  %v6909_v28 = vld [vmem:[#allocation7_spill] sm:$0xff]  ;;  %v6912_v22 = vand.u32 4294901760, %v6911_v37 }
  0x90   : > { %v5449_v20 = vpack.c.bf16 %v6901_v55, %v6899_v52  ;;  %v6906_v4 = vand.u32 4294901760, %v6905_v42  ;;  %3930 = vmatprep.subr.bf16.mxu0 %v6909_v28  ;;  %v6913_v5 = vand.u32 4294901760, %v5084_v24  ;;  %v6914_v55 = vand.u32 4294901760, %v5091_v16  ;;  %1162 = vmatmul.mubr.f32.vlgmr.msra.gmra.mrb[4].mxu1 %v4726_v32 }
  0x91   : > { %v3961_v38 = vpack.c.bf16 %v1417_v45, %v6912_v22  ;;  %v6921_v37 = vand.u32 4294901760, %v6920_v2  ;;  %v6922_v22 = vld [vmem:[#allocation15_spill] sm:$0xff]  ;;  %v1319_v18 = vand.u32 4294901760, %v1318_v6  ;;  %3932 = vmatpush3.bf16.msra.mxu0 %v5420_v34  ;;  %v6926_v26 = vand.u32 4294901760, %v5107_v48  ;;  %1504 = vmatprep.mubr.f32.mxu1 %v5183_v39  ;;  %v6931_v6 = vld [vmem:[#allocation17_spill] sm:$0xff] }
  0x92   : > { %6902 = vst [vmem:[#allocation10_spill] sm:$0xff] %v5449_v20  ;;  %v3959_v53 = vpack.c.bf16 %v6906_v4, %v6904_v9  ;;  %v1437_v52 = vsub.f32 %v5084_v24, %v6913_v5  ;;  %v1444_v42 = vsub.f32 %v5091_v16, %v6914_v55  ;;  %v6915_v4 = vld [vmem:[#allocation12_spill] sm:$0xff]  ;;  %v6917_v9 = vld [vmem:[#allocation3_spill] sm:$0xff]  ;;  %v6923_v45 = vand.u32 4294901760, %v6922_v22  ;;  %3934 = vmatprep.subr.bf16.mxu0 %v5449_v20 }
  0x93   : > { %v6916_v58 = vand.u32 4294901760, %v6915_v4  ;;  %v6918_v15 = vand.u32 4294901760, %v6917_v9  ;;  %v3963_v5 = vpack.c.bf16 %v1305_v41, %v1298_v25  ;;  %v1312_v24 = vand.u32 4294901760, %v1311_v1  ;;  %v6945_v34 = vld [vmem:[#allocation11_spill] sm:$0xff] }
  0x94   : > { %v5478_v28 = vpack.c.bf16 %v6923_v45, %v6921_v37  ;;  %3960 = vmatpush3.bf16.msra.mxu1 %v3959_v53  ;;  %v3965_v55 = vpack.c.bf16 %v1431_v40, %v1424_v31  ;;  %v6925_v4 = vand.u32 4294901760, %v5101_v3  ;;  %v1332_v32 = vsub.f32 %v5107_v48, %v6926_v26  ;;  %v6929_v31 = vld [vmem:[#allocation16_spill] sm:$0xff] }
  0x95   : > { %v5471_v43 = vpack.c.bf16 %v6918_v15, %v6916_v58  ;;  %3962 = vmatprep.subr.bf16.mxu1 %v3961_v38  ;;  %v1438_v9 = vand.u32 4294901760, %v1437_v52  ;;  %v1445_v15 = vand.u32 4294901760, %v1444_v42  ;;  %v6927_v25 = vand.u32 4294901760, %v5137_v7 }
  0x96   : > { %6924 = vst [vmem:[#allocation9_spill] sm:$0xff] %v5478_v28  ;;  %v1325_v58 = vsub.f32 %v5101_v3, %v6925_v4  ;;  %v6928_v53 = vand.u32 4294901760, %v5142_v10  ;;  %v6930_v1 = vand.u32 4294901760, %v6929_v31  ;;  %v6932_v2 = vand.u32 4294901760, %v6931_v6  ;;  %v6939_v6 = vld [vmem:[#allocation20_spill] sm:$0xff] }
  0x97   : > { %6919 = vst [vmem:[#allocation2_spill] sm:$0xff] %v5471_v43  ;;  %v1451_v41 = vsub.f32 %v5137_v7, %v6927_v25  ;;  %v3967_v22 = vpack.c.bf16 %v1319_v18, %v1312_v24  ;;  %v6933_v38 = vand.u32 4294901760, %v5188_v19  ;;  %v6934_v42 = vand.u32 4294901760, %v5211_v29  ;;  %3936 = vmatpush3.bf16.msra.mxu0 %v5471_v43  ;;  %v6937_v18 = vld [vmem:[#allocation19_spill] sm:$0xff]  ;;  %v6943_v43 = vld [vmem:[#allocation24_spill] sm:$0xff] }
  0x98   : > { %v1458_v40 = vsub.f32 %v5142_v10, %v6928_v53  ;;  %v5499_v37 = vpack.c.bf16 %v6932_v2, %v6930_v1  ;;  %3964 = vmatpush3.bf16.msra.mxu1 %v3963_v5  ;;  %v1326_v4 = vand.u32 4294901760, %v1325_v58  ;;  %v1333_v26 = vand.u32 4294901760, %v1332_v32  ;;  %3938 = vmatprep.subr.bf16.mxu0 %v5478_v28 }
  0x99   : > { %v1339_v52 = vsub.f32 %v5188_v19, %v6933_v38  ;;  %v1346_v45 = vsub.f32 %v5211_v29, %v6934_v42  ;;  %v6935_v25 = vand.u32 4294901760, %v5216_v54  ;;  %v6936_v31 = vand.u32 4294901760, %v5243_v47  ;;  %3966 = vmatprep.subr.bf16.mxu1 %v3965_v55  ;;  %v6941_v42 = vld [vmem:[#allocation22_spill] sm:$0xff] }
  0x9a   : > { %v6938_v1 = vand.u32 4294901760, %v6937_v18  ;;  %v6940_v2 = vand.u32 4294901760, %v6939_v6  ;;  %v3969_v5 = vpack.c.bf16 %v1445_v15, %v1438_v9  ;;  %v1452_v58 = vand.u32 4294901760, %v1451_v41 }
  0x9b   : > { %v1465_v53 = vsub.f32 %v5216_v54, %v6935_v25  ;;  %v1472_v24 = vsub.f32 %v5243_v47, %v6936_v31  ;;  %v1459_v32 = vand.u32 4294901760, %v1458_v40  ;;  %v6942_v39 = vand.u32 4294901760, %v6941_v42  ;;  %3940 = vmatpush3.bf16.msra.mxu0 %v5499_v37 }
  0x9c   : > { %v5519_v38 = vpack.c.bf16 %v6940_v2, %v6938_v1  ;;  %v6944_v25 = vand.u32 4294901760, %v6943_v43  ;;  %v5528_v31 = vand.u32 4294901760, %v6945_v34  ;;  %v1340_v28 = vand.u32 4294901760, %v1339_v52  ;;  %3968 = vmatpush3.bf16.msra.mxu1 %v3967_v22 }
  0x9d   : > { %v1347_v47 = vand.u32 4294901760, %v1346_v45  ;;  %v6947_v18 = vand.u32 4294901760, %v5249_v46  ;;  %v6948_v55 = vand.u32 4294901760, %v5255_v23  ;;  %v6949_v43 = vand.u32 4294901760, %v5075_v27  ;;  %3970 = vmatprep.subr.bf16.mxu1 %v3969_v5 }
  0x9e   : > { %v5525_v20 = vpack.c.bf16 %v6944_v25, %v6942_v39  ;;  %6946 = vst [vmem:[#allocation13_spill] sm:$0xff] %v5528_v31  ;;  %v6950_v39 = vand.u32 4294901760, %v5118_v8  ;;  %v3971_v41 = vpack.c.bf16 %v1333_v26, %v1326_v4  ;;  %v1466_v40 = vand.u32 4294901760, %v1465_v53  ;;  %3942 = vmatprep.subr.bf16.mxu0 %v5519_v38  ;;  %v6954_v8 = vld [vmem:[#allocation27_spill] sm:$0xff] }
  0x9f   : > { %v1353_v1 = vsub.f32 %v5249_v46, %v6947_v18  ;;  %v1360_v9 = vsub.f32 %v5255_v23, %v6948_v55  ;;  %v1473_v52 = vand.u32 4294901760, %v1472_v24  ;;  %v3973_v45 = vpack.c.bf16 %v1459_v32, %v1452_v58 }
  0xa0   : > { %v5541_v15 = vpack.c.bf16 %v6950_v39, %v6949_v43  ;;  %v6951_v6 = vand.u32 4294901760, %v5261_v60  ;;  %v6952_v42 = vand.u32 4294901760, %v5269_v13  ;;  %v6953_v27 = vand.u32 4294901760, %v5124_v14  ;;  %3944 = vmatpush3.bf16.msra.mxu0 %v5525_v20  ;;  %3972 = vmatpush3.bf16.msra.mxu1 %v3971_v41 }
  0xa1   : > { %v6955_v25 = vand.u32 4294901760, %v6954_v8  ;;  %v5558_v4 = vsub.f32 %v6945_v34, %v5528_v31  ;;  %v6957_v26 = vand.u32 4294901760, %v5152_v35  ;;  %v6958_v53 = vand.u32 4294901760, %v5170_v33  ;;  %3974 = vmatprep.subr.bf16.mxu1 %v3973_v45 }
  0xa2   : > { %v1479_v2 = vsub.f32 %v5261_v60, %v6951_v6  ;;  %v1486_v22 = vsub.f32 %v5269_v13, %v6952_v42  ;;  %v3975_v5 = vpack.c.bf16 %v1347_v47, %v1340_v28  ;;  %v1354_v58 = vand.u32 4294901760, %v1353_v1  ;;  %3946 = vmatprep.subr.bf16.mxu0 %v5541_v15  ;;  %v6965_v6 = vld [vmem:[#allocation31_spill] sm:$0xff] }
  0xa3   : > { %v5554_v18 = vpack.c.bf16 %v6955_v25, %v6953_v27  ;;  %6956 = vst [vmem:[#allocation14_spill] sm:$0xff] %v5558_v4  ;;  %v5564_v24 = vpack.c.bf16 %v6958_v53, %v6957_v26  ;;  %v1361_v32 = vand.u32 4294901760, %v1360_v9  ;;  %v3977_v14 = vpack.c.bf16 %v1473_v52, %v1466_v40  ;;  %v6963_v40 = vld [vmem:[#allocation30_spill] sm:$0xff] }
  0xa4   : > { %v6959_v55 = vand.u32 4294901760, %v5275_v44  ;;  %v6960_v34 = vand.u32 4294901760, %v5280_v50  ;;  %v1480_v33 = vand.u32 4294901760, %v1479_v2  ;;  %v1487_v35 = vand.u32 4294901760, %v1486_v22  ;;  %3976 = vmatpush3.bf16.msra.mxu1 %v3975_v5 }
  0xa5   : > { %v6961_v47 = vand.u32 4294901760, %v5287_v63  ;;  %v6962_v1 = vand.u32 4294901760, %v5292_v56  ;;  %v6675_v41 = vand.u32 4294901760, %v5558_v4  ;;  %v6964_v52 = vand.u32 4294901760, %v6963_v40  ;;  %3948 = vmatpush3.bf16.msra.mxu0 %v5554_v18  ;;  %3978 = vmatprep.subr.bf16.mxu1 %v3977_v14  ;;  %v5607_v40 = vld [vmem:[%s6561_s1 + $0x280] sm:$0xff] }
  0xa6   : > { %v1367_v43 = vsub.f32 %v5275_v44, %v6959_v55  ;;  %v1374_v39 = vsub.f32 %v5280_v50, %v6960_v34  ;;  %v6966_v42 = vand.u32 4294901760, %v6965_v6  ;;  %v3979_v8 = vpack.c.bf16 %v1361_v32, %v1354_v58  ;;  %3950 = vmatprep.subr.bf16.mxu0 %v5564_v24  ;;  %v6970_v55 = vld [vmem:[#allocation32_spill] sm:$0xff]  ;;  %6975 = vst [vmem:[#allocation25_spill] sm:$0xff] %v5607_v40  ;;  %v6977_v14 = vld [vmem:[#allocation34_spill] sm:$0xff] }
  0xa7   : > { %v1493_v28 = vsub.f32 %v5287_v63, %v6961_v47  ;;  %v1500_v9 = vsub.f32 %v5292_v56, %v6962_v1  ;;  %v6968_v22 = vand.u32 4294901760, %v5297_v61  ;;  %v6969_v26 = vand.u32 4294901760, %v5308_v49  ;;  %v6972_v47 = vld [vmem:[#allocation33_spill] sm:$0xff] }
  0xa8   : > { %v5585_v27 = vpack.c.bf16 %v6966_v42, %v6964_v52  ;;  %v1368_v45 = vand.u32 4294901760, %v1367_v43  ;;  %v1375_v2 = vand.u32 4294901760, %v1374_v39  ;;  %v6971_v34 = vand.u32 4294901760, %v6970_v55  ;;  %v5612_v52 = vld [vmem:[%s6561_s1 + $0x288] sm:$0xff]  ;;  %3980 = vmatpush3.bf16.msra.mxu1 %v3979_v8 }
  0xa9   : > { %v1381_v25 = vsub.f32 %v5297_v61, %v6968_v22  ;;  %v1388_v53 = vsub.f32 %v5308_v49, %v6969_v26  ;;  %v6973_v1 = vand.u32 4294901760, %v6972_v47  ;;  %v3981_v5 = vpack.c.bf16 %v1487_v35, %v1480_v33  ;;  %6976 = vst [vmem:[#allocation23_spill] sm:$0xff] %v5612_v52 }
  0xaa   : > { %6967 = vst [vmem:[#allocation28_spill] sm:$0xff] %v5585_v27  ;;  %v1494_v32 = vand.u32 4294901760, %v1493_v28  ;;  %v1501_v43 = vand.u32 4294901760, %v1500_v9  ;;  %v1272_v39 = vsub.f32 %v5558_v4, %v6675_v41  ;;  %3952 = vmatpush3.bf16.msra.mxu0 %v5585_v27  ;;  %v6978_v33 = vand.u32 4294901760, %v6977_v14  ;;  %v5700_v41 = vld [vmem:[%s6561_s1 + $0x2a8] sm:$0xff]  ;;  %v5971_v4 = vld [vmem:[%s6561_s1 + $0x278] sm:$0xff] }
  0xab   : > { %v5599_v58 = vpack.c.bf16 %v6973_v1, %v6971_v34  ;;  %v6979_v35 = vand.u32 4294901760, %v5229_v11  ;;  %v3983_v9 = vpack.c.bf16 %v1375_v2, %v1368_v45  ;;  %v1382_v6 = vand.u32 4294901760, %v1381_v25  ;;  %3982 = vmatprep.subr.bf16.mxu1 %v3981_v5  ;;  %v5633_v45 = vld [vmem:[%s6561_s1 + $0x200] sm:$0xff]  ;;  %v5661_v5 = vld [vmem:[%s6561_s1 + $0x298] sm:$0xff]  ;;  %6992 = vst [vmem:[#allocation22_spill] sm:$0xff] %v5700_v41 }
  0xac   : > { %v1389_v42 = vand.u32 4294901760, %v1388_v53  ;;  %v3989_v22 = vpack.c.bf16 %v4889_v0, %v4887_v59  ;;  %v3985_v26 = vpack.c.bf16 %v1501_v43, %v1494_v32  ;;  %v6674_v55 = vand.u32 4294901760, %v5607_v40  ;;  %6981 = vst [vmem:[#allocation3_spill] sm:$0xff] %v5633_v45  ;;  %v5638_v59 = vld [vmem:[%s6561_s1 + $0x208] sm:$0xff]  ;;  %v6985_v2 = vld [vmem:[#allocation26_spill] sm:$0xff]  ;;  %v5651_v53 = vld [vmem:[%s6561_s1 + $0x290] sm:$0xff] }
  0xad   : > { %6974 = vst [vmem:[#allocation29_spill] sm:$0xff] %v5599_v58  ;;  %v5619_v28 = vpack.c.bf16 %v6979_v35, %v6978_v33  ;;  %3954 = vmatprep.subr.bf16.mxu0 %v5599_v58  ;;  %v1273_v34 = vand.u32 4294901760, %v1272_v39  ;;  %v3991_v47 = vpack.c.bf16 %v4896_v30, %v4894_v12  ;;  %v3993_v11 = vpack.c.bf16 %v4961_v36, %v4942_v57  ;;  %v6983_v30 = vld [vmem:[#allocation18_spill] sm:$0xff]  ;;  %v6984_v57 = vld [vmem:[#allocation21_spill] sm:$0xff]  ;;  %v5666_v32 = vld [vmem:[%s6561_s1 + $0x210] sm:$0xff] }
  0xae   : > { %v6676_v8 = vand.u32 4294901760, %v5612_v52  ;;  %6982 = vst [vmem:[#allocation6_spill] sm:$0xff] %v5638_v59  ;;  %v3995_v0 = vpack.c.bf16 %v5003_v17, %v4976_v62  ;;  %6986 = vst [vmem:[#allocation15_spill] sm:$0xff] %v5651_v53  ;;  %3984 = vmatpush3.bf16.msra.mxu1 %v3983_v9  ;;  %v3987_v1 = vpack.c.bf16 %v1389_v42, %v1382_v6  ;;  %v6677_v14 = vand.u32 4294901760, %v5633_v45  ;;  %v5680_v35 = vld [vmem:[%s6561_s1 + $0x218] sm:$0xff]  ;;  %v5685_v9 = vld [vmem:[%s6561_s1 + $0x2a0] sm:$0xff] }
  0xaf   : > { %6980 = vst [vmem:[#allocation12_spill] sm:$0xff] %v5619_v28  ;;  %3956 = vmatpush3.bf16.msra.mxu0 %v5619_v28  ;;  %6987 = vst [vmem:[#allocation16_spill] sm:$0xff] %v5661_v5  ;;  %3986 = vmatprep.subr.bf16.mxu1 %v3985_v26  ;;  %v5673_v39 = vsub.f32 %v5607_v40, %v6674_v55  ;;  %v6678_v33 = vand.u32 4294901760, %v5638_v59  ;;  %v6991_v6 = vld [vmem:[#allocation36_spill] sm:$0xff]  ;;  %v6681_v55 = vand.u32 4294901760, %v5651_v53  ;;  %v5716_v62 = vld [vmem:[%s6561_s1 + $0x228] sm:$0xff] }
  0xb0   : > { %6988 = vst [vmem:[#allocation17_spill] sm:$0xff] %v5666_v32  ;;  %3990 = vmatprep.subr.bf16.mxu0 %v3989_v22  ;;  %6989 = vst [vmem:[#allocation19_spill] sm:$0xff] %v5680_v35  ;;  %v5694_v26 = vsub.f32 %v5612_v52, %v6676_v8  ;;  %v5711_v8 = vld [vmem:[%s6561_s1 + $0x220] sm:$0xff]  ;;  %v5727_v36 = vld [vmem:[%s6561_s1 + $0x2b0] sm:$0xff]  ;;  %v5738_v42 = vsub.f32 %v5633_v45, %v6677_v14  ;;  %v7012_v17 = vand.u32 4294901760, %v5685_v9 }
  0xb1   : > { %6990 = vst [vmem:[#allocation20_spill] sm:$0xff] %v5685_v9  ;;  %6993 = vst [vmem:[#allocation24_spill] sm:$0xff] %v5711_v8  ;;  %v5755_v43 = vld [vmem:[%s6561_s1 + $0x238] sm:$0xff]  ;;  %v7000_v14 = vld [vmem:[#allocation35_spill] sm:$0xff]  ;;  %v7014_v40 = vpack.c.bf16 %v5013_v51, %v5008_v21  ;;  %v7019_v52 = vand.u32 4294901760, %v5711_v8  ;;  %v7020_v51 = vand.u32 4294901760, %v5716_v62 }
  0xb2   : > { %1274 = vmatmul.mubr.f32.vlgmr.msra.gmra.mrb[6].mxu0 %v1273_v34  ;;  %6994 = vst [vmem:[#allocation11_spill] sm:$0xff] %v5716_v62  ;;  %3988 = vmatpush3.bf16.msra.mxu1 %v3987_v1  ;;  %6995 = vst [vmem:[#allocation27_spill] sm:$0xff] %v5727_v36  ;;  %v6997_v1 = vld [vmem:[#allocation4_spill] sm:$0xff]  ;;  %v5743_v34 = vsub.f32 %v5638_v59, %v6678_v33  ;;  %v5761_v33 = vsub.f32 %v5651_v53, %v6681_v55  ;;  %v5769_v22 = vld [vmem:[%s6561_s1 + $0x2c0] sm:$0xff]  ;;  %v7003_v59 = vand.u32 4294901760, %v5661_v5 }
  0xb3   : > { %3992 = vmatpush3.bf16.msra.mxu0 %v3991_v47  ;;  %v5732_v47 = vld [vmem:[%s6561_s1 + $0x2b8] sm:$0xff]  ;;  %4022 = vmatprep.subr.bf16.mxu1 %v6997_v1  ;;  %6999 = vst [vmem:[#allocation32_spill] sm:$0xff] %v5755_v43  ;;  %7002 = vst [vmem:[#allocation34_spill] sm:$0xff] %v5769_v22  ;;  %v7005_v55 = vand.u32 4294901760, %v5666_v32  ;;  %v5787_v53 = vld [vmem:[%s6561_s1 + $0x2c8] sm:$0xff]  ;;  %v5803_v25 = vsub.f32 %v5685_v9, %v7012_v17  ;;  %v5824_v21 = vsub.f32 %v5711_v8, %v7019_v52 }
  0xb4   : > { %6996 = vst [vmem:[#allocation30_spill] sm:$0xff] %v5732_v47  ;;  %3994 = vmatprep.subr.bf16.mxu0 %v3993_v11  ;;  %v5750_v11 = vld [vmem:[%s6561_s1 + $0x230] sm:$0xff]  ;;  %1641 = vmatprep.mubr.f32.mxu0 %v7000_v14  ;;  %7001 = vst [vmem:[#allocation33_spill] sm:$0xff] %v5761_v33  ;;  %v5775_v45 = vsub.f32 %v5661_v5, %v7003_v59  ;;  %v7009_v59 = vld [vmem:[#allocation5_spill] sm:$0xff]  ;;  %v7018_v5 = vand.u32 4294901760, %v7000_v14  ;;  %v7023_v52 = vand.u32 4294901760, %v5732_v47 }
  0xb5   : > { %6998 = vst [vmem:[#allocation31_spill] sm:$0xff] %v5750_v11  ;;  %1506 = vmatmul.mubr.f32.vlgmr.msra.gmra.mrb[6].mxu1 %v5528_v31  ;;  %v5780_v12 = vsub.f32 %v5666_v32, %v7005_v55  ;;  %7007 = vst [vmem:[#allocation26_spill] sm:$0xff] %v5787_v53  ;;  %v5792_v31 = vld [vmem:[%s6561_s1 + $0x240] sm:$0xff]  ;;  %v7010_v55 = vand.u32 4294901760, %v5680_v35  ;;  %v5835_v17 = vld [vmem:[%s6561_s1 + $0x248] sm:$0xff] }
  0xb6   : > { %7004 = vst [vmem:[#allocation18_spill] sm:$0xff] %v5775_v45  ;;  %7008 = vst [vmem:[#allocation36_spill] sm:$0xff] %v5792_v31  ;;  %4024 = vmatpush3.bf16.msra.mxu1 %v7009_v59  ;;  %v7016_v59 = vand.u32 4294901760, %v5700_v41  ;;  %1748 = vmatprep.mubr.f32.mxu1 %v7018_v5  ;;  %v7022_v5 = vand.u32 4294901760, %v5727_v36  ;;  %v5846_v9 = vsub.f32 %v5732_v47, %v7023_v52  ;;  %v5858_v14 = vld [vmem:[%s6561_s1 + $0x2d8] sm:$0xff]  ;;  %v7026_v52 = vld [vmem:[#allocation51_spill] sm:$0xff] }
  0xb7   : > { %7006 = vst [vmem:[#allocation21_spill] sm:$0xff] %v5780_v12  ;;  %3996 = vmatpush3.bf16.msra.mxu0 %v3995_v0  ;;  %v5798_v32 = vsub.f32 %v5680_v35, %v7010_v55  ;;  %7013 = vst [vmem:[#allocation54_spill] sm:$0xff] %v5803_v25  ;;  %v7015_v0 = vld [vmem:[#allocation7_spill] sm:$0xff]  ;;  %v7028_v47 = vand.u32 4294901760, %v5755_v43  ;;  %v5938_v1 = vld [vmem:[%s6561_s1 + $0x2f8] sm:$0xff] }
  0xb8   : > { %3998 = vmatprep.subr.bf16.mxu0 %v7014_v40  ;;  %4026 = vmatprep.subr.bf16.mxu1 %v7015_v0  ;;  %v5814_v55 = vsub.f32 %v5700_v41, %v7016_v59  ;;  %v5829_v40 = vsub.f32 %v5716_v62, %v7020_v51  ;;  %7021 = vst [vmem:[#allocation56_spill] sm:$0xff] %v5835_v17  ;;  %v5853_v62 = vld [vmem:[%s6561_s1 + $0x2d0] sm:$0xff]  ;;  %v7027_v51 = vand.u32 4294901760, %v5750_v11  ;;  %v7032_v41 = vand.u32 4294901760, %v5769_v22  ;;  %v5906_v0 = vld [vmem:[%s6561_s1 + $0x2e8] sm:$0xff]  ;;  %v7041_v28 = vld [vmem:[#allocation2_spill] sm:$0xff] }
  0xb9   : > { %7011 = vst [vmem:[#allocation35_spill] sm:$0xff] %v5798_v32  ;;  %v5841_v35 = vsub.f32 %v5727_v36, %v7022_v5  ;;  %7024 = vst [vmem:[#allocation57_spill] sm:$0xff] %v5853_v62  ;;  %v7025_v5 = vpack.c.bf16 %v6984_v57, %v6983_v30  ;;  %v5872_v36 = vsub.f32 %v5755_v43, %v7028_v47  ;;  %v5879_v30 = vld [vmem:[%s6561_s1 + $0x250] sm:$0xff]  ;;  %v5884_v57 = vld [vmem:[%s6561_s1 + $0x258] sm:$0xff] }
  0xba   : > { %7017 = vst [vmem:[#allocation55_spill] sm:$0xff] %v5814_v55  ;;  %4028 = vmatpush3.bf16.msra.mxu1 %v7026_v52  ;;  %v5867_v59 = vsub.f32 %v5750_v11, %v7027_v51  ;;  %7029 = vst [vmem:[#allocation58_spill] sm:$0xff] %v5884_v57  ;;  %v5889_v51 = vld [vmem:[%s6561_s1 + $0x2e0] sm:$0xff]  ;;  %v7030_v47 = vpack.c.bf16 %v5091_v16, %v6985_v2  ;;  %v5898_v8 = vsub.f32 %v5769_v22, %v7032_v41  ;;  %v5916_v41 = vld [vmem:[%s6561_s1 + $0x268] sm:$0xff] }
  0xbb   : > { %4000 = vmatpush3.bf16.msra.mxu0 %v7025_v5  ;;  %v7031_v5 = vld [vmem:[#allocation10_spill] sm:$0xff]  ;;  %7034 = vst [vmem:[#allocation60_spill] sm:$0xff] %v5916_v41  ;;  %v7035_v2 = vand.u32 4294901760, %v5787_v53  ;;  %v7036_v11 = vand.u32 4294901760, %v5792_v31  ;;  %7039 = vst [vmem:[#allocation63_spill] sm:$0xff] %v5938_v1  ;;  %v7042_v52 = vpack.c.bf16 %v5142_v10, %v5137_v7  ;;  %v7043_v22 = vld [vmem:[#allocation9_spill] sm:$0xff] }
  0xbc   : > { %4002 = vmatprep.subr.bf16.mxu0 %v7030_v47  ;;  %4030 = vmatprep.subr.bf16.mxu1 %v7031_v5  ;;  %v5911_v16 = vld [vmem:[%s6561_s1 + $0x260] sm:$0xff]  ;;  %v5933_v5 = vld [vmem:[%s6561_s1 + $0x2f0] sm:$0xff]  ;;  %v7046_v10 = vand.u32 4294901760, %v5853_v62  ;;  %v7049_v27 = vand.u32 4294901760, %v5879_v30 }
  0xbd   : > { %7033 = vst [vmem:[#allocation59_spill] sm:$0xff] %v5911_v16  ;;  %v5921_v47 = vsub.f32 %v5787_v53, %v7035_v2  ;;  %v5926_v43 = vsub.f32 %v5792_v31, %v7036_v11  ;;  %7038 = vst [vmem:[#allocation62_spill] sm:$0xff] %v5933_v5  ;;  %v5943_v2 = vld [vmem:[%s6561_s1 + $0x270] sm:$0xff]  ;;  %v7040_v53 = vpack.c.bf16 %v5107_v48, %v5101_v3  ;;  %v7044_v31 = vand.u32 4294901760, %v5835_v17 }
  0xbe   : > { %4032 = vmatpush3.bf16.msra.mxu1 %v7041_v28  ;;  %v5977_v7 = vsub.f32 %v5853_v62, %v7046_v10  ;;  %v5989_v58 = vsub.f32 %v5879_v30, %v7049_v27  ;;  %v7050_v11 = vand.u32 4294901760, %v5884_v57  ;;  %v7051_v62 = vand.u32 4294901760, %v5889_v51 }
  0xbf   : > { %7037 = vst [vmem:[#allocation61_spill] sm:$0xff] %v5926_v43  ;;  %4004 = vmatpush3.bf16.msra.mxu0 %v7040_v53  ;;  %4034 = vmatprep.subr.bf16.mxu1 %v7043_v22  ;;  %v5964_v48 = vsub.f32 %v5835_v17, %v7044_v31  ;;  %v7052_v53 = vpack.c.bf16 %v5211_v29, %v5188_v19  ;;  %v7053_v27 = vand.u32 4294901760, %v5906_v0  ;;  %v7059_v29 = vand.u32 4294901760, %v5943_v2 }
  0xc0   : > { %4006 = vmatprep.subr.bf16.mxu0 %v7042_v52  ;;  %7047 = vst [vmem:[#allocation9_spill] sm:$0xff] %v5977_v7  ;;  %v7048_v52 = vand.u32 4294901760, %v5858_v14  ;;  %v5994_v17 = vsub.f32 %v5884_v57, %v7050_v11  ;;  %v7054_v11 = vand.u32 4294901760, %v5911_v16  ;;  %v7055_v57 = vand.u32 4294901760, %v5916_v41 }
  0xc1   : > { %7045 = vst [vmem:[#allocation2_spill] sm:$0xff] %v5964_v48  ;;  %v6009_v3 = vsub.f32 %v5906_v0, %v7053_v27  ;;  %v7056_v19 = vpack.c.bf16 %v6991_v6, %v5216_v54  ;;  %v7057_v27 = vand.u32 4294901760, %v5933_v5  ;;  %v7061_v6 = vand.u32 4294901760, %v5971_v4 }
  0xc2   : > { %v5982_v31 = vsub.f32 %v5858_v14, %v7048_v52  ;;  %v6000_v52 = vsub.f32 %v5889_v51, %v7051_v62  ;;  %4036 = vmatpush3.bf16.msra.mxu1 %v5499_v37  ;;  %v6014_v10 = vsub.f32 %v5911_v16, %v7054_v11  ;;  %v6019_v62 = vsub.f32 %v5916_v41, %v7055_v57 }
  0xc3   : > { %4008 = vmatpush3.bf16.msra.mxu0 %v7052_v53  ;;  %4038 = vmatprep.subr.bf16.mxu1 %v5519_v38  ;;  %v6030_v11 = vsub.f32 %v5933_v5, %v7057_v27  ;;  %v7058_v16 = vand.u32 4294901760, %v5938_v1  ;;  %v6040_v41 = vsub.f32 %v5943_v2, %v7059_v29  ;;  %v7060_v29 = vpack.c.bf16 %v5255_v23, %v5249_v46 }
  0xc4   : > { %4010 = vmatprep.subr.bf16.mxu0 %v7056_v19  ;;  %v6057_v19 = vsub.f32 %v5971_v4, %v7061_v6  ;;  %v7063_v53 = vand.u32 4294901760, %v5673_v39  ;;  %v7064_v27 = vand.u32 4294901760, %v5694_v26  ;;  %v7066_v5 = vand.u32 4294901760, %v5738_v42 }
  0xc5   : > { %v6035_v57 = vsub.f32 %v5938_v1, %v7058_v16  ;;  %v7062_v1 = vpack.c.bf16 %v5269_v13, %v5261_v60  ;;  %v7067_v13 = vand.u32 4294901760, %v5743_v34  ;;  %v7070_v46 = vand.u32 4294901760, %v5775_v45 }
  0xc6   : > { %4040 = vmatpush3.bf16.msra.mxu1 %v5525_v20  ;;  %v6074_v16 = vpack.c.bf16 %v7064_v27, %v7063_v53  ;;  %v7072_v6 = vand.u32 4294901760, %v5780_v12  ;;  %v7075_v53 = vand.u32 4294901760, %v5803_v25  ;;  %v7076_v27 = vand.u32 4294901760, %v5814_v55 }
  0xc7   : > { %4012 = vmatpush3.bf16.msra.mxu0 %v7060_v29  ;;  %4042 = vmatprep.subr.bf16.mxu1 %v5541_v15  ;;  %v6080_v60 = vpack.c.bf16 %v7067_v13, %v7066_v5  ;;  %v7073_v29 = vand.u32 4294901760, %v5798_v32  ;;  %v7078_v5 = vand.u32 4294901760, %v5824_v21  ;;  %v7079_v13 = vand.u32 4294901760, %v5829_v40 }
  0xc8   : > { %4014 = vmatprep.subr.bf16.mxu0 %v7062_v1  ;;  %7065 = vst [vmem:[#allocation64_spill] sm:$0xff] %v6074_v16  ;;  %v7069_v1 = vand.u32 4294901760, %v5761_v33  ;;  %v6098_v16 = vpack.c.bf16 %v7076_v27, %v7075_v53  ;;  %v7087_v53 = vpack.c.bf16 %v5280_v50, %v5275_v44  ;;  %v7095_v50 = vand.u32 4294901760, %v5982_v31 }
  0xc9   : > { %7068 = vst [vmem:[#allocation65_spill] sm:$0xff] %v6080_v60  ;;  %v6092_v54 = vpack.c.bf16 %v7073_v29, %v7072_v6  ;;  %v6104_v60 = vpack.c.bf16 %v7079_v13, %v7078_v5  ;;  %v7084_v29 = vand.u32 4294901760, %v5867_v59  ;;  %v7085_v6 = vand.u32 4294901760, %v5872_v36 }
  0xca   : > { %v6086_v23 = vpack.c.bf16 %v7070_v46, %v7069_v1  ;;  %7077 = vst [vmem:[#allocation68_spill] sm:$0xff] %v6098_v16  ;;  %v7081_v46 = vand.u32 4294901760, %v5841_v35  ;;  %v7082_v1 = vand.u32 4294901760, %v5846_v9  ;;  %4044 = vmatpush3.bf16.msra.mxu1 %v5554_v18  ;;  %v7088_v5 = vand.u32 4294901760, %v5898_v8 }
  0xcb   : > { %7074 = vst [vmem:[#allocation67_spill] sm:$0xff] %v6092_v54  ;;  %7080 = vst [vmem:[#allocation69_spill] sm:$0xff] %v6104_v60  ;;  %v6116_v54 = vpack.c.bf16 %v7085_v6, %v7084_v29  ;;  %4016 = vmatpush3.bf16.msra.mxu0 %v7087_v53  ;;  %v7089_v13 = vand.u32 4294901760, %v5921_v47  ;;  %v7094_v6 = vand.u32 4294901760, %v5977_v7  ;;  %v7097_v53 = vpack.c.bf16 %v5292_v56, %v5287_v63  ;;  %v7158_v60 = vld [vmem:[#allocation53_spill] sm:$0xff] }
  0xcc   : > { %7071 = vst [vmem:[#allocation66_spill] sm:$0xff] %v6086_v23  ;;  %v6110_v23 = vpack.c.bf16 %v7082_v1, %v7081_v46  ;;  %v7091_v1 = vand.u32 4294901760, %v5926_v43  ;;  %4046 = vmatprep.subr.bf16.mxu1 %v5564_v24  ;;  %v7107_v63 = vand.u32 4294901760, %v6030_v11 }
  0xcd   : > { %7086 = vst [vmem:[#allocation71_spill] sm:$0xff] %v6116_v54  ;;  %v6127_v46 = vpack.c.bf16 %v7089_v13, %v7088_v5  ;;  %v6139_v44 = vpack.c.bf16 %v7095_v50, %v7094_v6  ;;  %4018 = vmatprep.subr.bf16.mxu0 %v7097_v53  ;;  %v7098_v5 = vand.u32 4294901760, %v5989_v58  ;;  %v7099_v13 = vand.u32 4294901760, %v5994_v17  ;;  %v7129_v54 = vld [vmem:[#allocation51_spill] sm:$0xff] }
  0xce   : > { %7083 = vst [vmem:[#allocation70_spill] sm:$0xff] %v6110_v23  ;;  %v7092_v23 = vand.u32 4294901760, %v5964_v48  ;;  %v7104_v6 = vand.u32 4294901760, %v6014_v10  ;;  %v7105_v50 = vand.u32 4294901760, %v6019_v62  ;;  %v7108_v53 = vand.u32 4294901760, %v6035_v57 }
  0xcf   : > { %7090 = vst [vmem:[#allocation72_spill] sm:$0xff] %v6127_v46  ;;  %7096 = vst [vmem:[#allocation74_spill] sm:$0xff] %v6139_v44  ;;  %v6149_v27 = vpack.c.bf16 %v7099_v13, %v7098_v5  ;;  %v7110_v5 = vand.u32 4294901760, %v6040_v41  ;;  %v7111_v13 = vand.u32 4294901760, %v6057_v19 }
  0xd0   : > { %v6133_v29 = vpack.c.bf16 %v7092_v23, %v7091_v1  ;;  %v7101_v23 = vand.u32 4294901760, %v6000_v52  ;;  %v7102_v1 = vand.u32 4294901760, %v6009_v3  ;;  %v6161_v56 = vpack.c.bf16 %v7105_v50, %v7104_v6  ;;  %v7115_v6 = vld [vmem:[#allocation37_spill] sm:$0xff] }
  0xd1   : > { %7100 = vst [vmem:[#allocation75_spill] sm:$0xff] %v6149_v27  ;;  %v6167_v44 = vpack.c.bf16 %v7108_v53, %v7107_v63  ;;  %v6173_v27 = vpack.c.bf16 %v7111_v13, %v7110_v5  ;;  %v7116_v50 = vld [vmem:[#allocation29_spill] sm:$0xff]  ;;  %v7117_v63 = vld [vmem:[#allocation14_spill] sm:$0xff]  ;;  %v7120_v5 = vld [vmem:[#allocation39_spill] sm:$0xff] }
  0xd2   : > { %7093 = vst [vmem:[#allocation73_spill] sm:$0xff] %v6133_v29  ;;  %v6155_v29 = vpack.c.bf16 %v7102_v1, %v7101_v23  ;;  %7106 = vst [vmem:[#allocation77_spill] sm:$0xff] %v6161_v56  ;;  %v7113_v23 = vpack.c.bf16 %v5308_v49, %v5297_v61  ;;  %v7114_v1 = vld [vmem:[#allocation28_spill] sm:$0xff]  ;;  %v7118_v53 = vld [vmem:[#allocation38_spill] sm:$0xff]  ;;  %v7123_v61 = vand.u32 4294901760, %v7117_v63 }
  0xd3   : > { %7109 = vst [vmem:[#allocation78_spill] sm:$0xff] %v6167_v44  ;;  %7112 = vst [vmem:[#allocation79_spill] sm:$0xff] %v6173_v27  ;;  %4048 = vmatpush3.bf16.msra.mxu1 %v7114_v1  ;;  %v7119_v44 = vld [vmem:[#allocation12_spill] sm:$0xff]  ;;  %v7126_v27 = vld [vmem:[#allocation41_spill] sm:$0xff] }
  0xd4   : > { %7103 = vst [vmem:[#allocation76_spill] sm:$0xff] %v6155_v29  ;;  %4020 = vmatpush3.bf16.msra.mxu0 %v7113_v23  ;;  %4050 = vmatprep.subr.bf16.mxu1 %v7116_v50  ;;  %v7121_v13 = vld [vmem:[#allocation4_spill] sm:$0xff]  ;;  %v7127_v56 = vld [vmem:[#allocation7_spill] sm:$0xff] }
  0xd5   : > { %4054 = vmatprep.subr.bf16.mxu0 %v7115_v6  ;;  %v7122_v49 = vld [vmem:[#allocation8_spill] sm:$0xff]  ;;  %v7125_v6 = vld [vmem:[#allocation5_spill] sm:$0xff] }
  0xd6   : > { %v7124_v23 = vld [vmem:[#allocation40_spill] sm:$0xff] }
  0xd7   : > { %1644 = vmatmul.mubr.f32.vlgmr.msra.gmra.mrb[8].mxu0 %v7117_v63  ;;  %4052 = vmatpush3.bf16.msra.mxu1 %v7119_v44  ;;  %v7130_v63 = vld [vmem:[#allocation43_spill] sm:$0xff] }
  0xd8   : > { %4056 = vmatpush3.bf16.msra.mxu0 %v7118_v53  ;;  %4086 = vmatprep.subr.bf16.mxu1 %v7121_v13  ;;  %v4319_v53 = vld [vmem:[%s4652_s17 + $0x18] sm:$0x3]  ;;  %v7128_v13 = vld [vmem:[#allocation42_spill] sm:$0xff] }
  0xd9   : > { %4058 = vmatprep.subr.bf16.mxu0 %v7120_v5  ;;  %1918 = vmatprep.mubr.f32.mxu0 %v7122_v49  ;;  %v2067_v29 = vrot.slane %v4319_v53, 2  ;;  %v4320_v5 = vld [vmem:[%s4652_s17 + $0x8] sm:$0xff] }
  0xda   : > { %1752 = vmatmul.mubr.f32.vlgmr.msra.gmra.mrb[8].mxu1 %v7123_v61  ;;  %v2066_v46 = vrot.slane %v4320_v5, 2  ;;  %v7131_v61 = vld [vmem:[#allocation10_spill] sm:$0xff] }
  0xdb   : > { %4088 = vmatpush3.bf16.msra.mxu1 %v7125_v6  ;;  %2022 = vmatprep.mubr.f32.mxu1 %v7122_v49  ;;  %v7135_v6 = vld [vmem:[#allocation46_spill] sm:$0xff] }
  0xdc   : > { %4060 = vmatpush3.bf16.msra.mxu0 %v7124_v23  ;;  %4090 = vmatprep.subr.bf16.mxu1 %v7127_v56  ;;  %v2068_v23 = vsel %vm2062_vm1, %v2066_v46, %v2067_v29  ;;  %v7133_v56 = vld [vmem:[#allocation45_spill] sm:$0xff]  ;;  %v7138_v29 = vld [vmem:[#allocation48_spill] sm:$0xff] }
  0xdd   : > { %4062 = vmatprep.subr.bf16.mxu0 %v7126_v27  ;;  %v7132_v27 = vld [vmem:[#allocation44_spill] sm:$0xff]  ;;  %v6205_v49 = vand.u32 4294901760, %v2068_v23 }
  0xdf   : > { %4092 = vmatpush3.bf16.msra.mxu1 %v7129_v54  ;;  %7134 = vst [vmem:[#allocation28_spill] sm:$0xff] %v6205_v49  ;;  %v7136_v54 = vld [vmem:[#allocation47_spill] sm:$0xff]  ;;  %v6212_v46 = vsub.f32 %v2068_v23, %v6205_v49  ;;  %v7144_v23 = vld [vmem:[#allocation50_spill] sm:$0xff] }
  0xe0   : > { %4064 = vmatpush3.bf16.msra.mxu0 %v7128_v13  ;;  %4094 = vmatprep.subr.bf16.mxu1 %v7131_v61  ;;  %v7142_v13 = vand.u32 4294901760, %v5738_v42 }
  0xe1   : > { %4066 = vmatprep.subr.bf16.mxu0 %v7130_v63  ;;  %7137 = vst [vmem:[#allocation37_spill] sm:$0xff] %v6212_v46 }
  0xe2   : > { %v2187_v63 = vsub.f32 %v5738_v42, %v7142_v13 }
  0xe3   : > { %4096 = vmatpush3.bf16.msra.mxu1 %v7041_v28  ;;  %v7139_v28 = vld [vmem:[#allocation49_spill] sm:$0xff] }
  0xe4   : > { %4068 = vmatpush3.bf16.msra.mxu0 %v7132_v27  ;;  %4098 = vmatprep.subr.bf16.mxu1 %v7043_v22  ;;  %v7140_v22 = vand.u32 4294901760, %v5673_v39 }
  0xe5   : > { %4070 = vmatprep.subr.bf16.mxu0 %v7133_v56  ;;  %v7147_v56 = vld [vmem:[#allocation23_spill] sm:$0xff] }
  0xe6   : > { %v2299_v53 = vsub.f32 %v5673_v39, %v7140_v22 }
  0xe7   : > { %4100 = vmatpush3.bf16.msra.mxu1 %v5499_v37  ;;  %v7141_v37 = vand.u32 4294901760, %v5694_v26 }
  0xe8   : > { %4072 = vmatpush3.bf16.msra.mxu0 %v7135_v6  ;;  %4102 = vmatprep.subr.bf16.mxu1 %v5519_v38  ;;  %v6716_v38 = vand.u32 4294901760, %v6212_v46  ;;  %v7148_v6 = vand.u32 4294901760, %v7147_v56  ;;  %v7155_v56 = vld [vmem:[#allocation6_spill] sm:$0xff] }
  0xe9   : > { %4074 = vmatprep.subr.bf16.mxu0 %v7136_v54  ;;  %v2306_v5 = vsub.f32 %v5694_v26, %v7141_v37  ;;  %v7151_v37 = vand.u32 4294901760, %v5761_v33 }
  0xeb   : > { %4104 = vmatpush3.bf16.msra.mxu1 %v5525_v20  ;;  %v7143_v20 = vand.u32 4294901760, %v5743_v34  ;;  %v2307_v22 = vand.u32 4294901760, %v2306_v5  ;;  %v2313_v13 = vsub.f32 %v5761_v33, %v7151_v37  ;;  %v7157_v5 = vand.u32 4294901760, %v5780_v12  ;;  %v7173_v33 = vld [vmem:[#allocation22_spill] sm:$0xff] }
  0xec   : > { %4076 = vmatpush3.bf16.msra.mxu0 %v7138_v29  ;;  %4106 = vmatprep.subr.bf16.mxu1 %v5541_v15  ;;  %v7145_v15 = vld [vmem:[#allocation25_spill] sm:$0xff]  ;;  %v7150_v29 = vld [vmem:[#allocation52_spill] sm:$0xff] }
  0xed   : > { %4078 = vmatprep.subr.bf16.mxu0 %v7139_v28  ;;  %v2194_v61 = vsub.f32 %v5743_v34, %v7143_v20  ;;  %v7146_v27 = vand.u32 4294901760, %v7145_v15  ;;  %v2300_v28 = vand.u32 4294901760, %v2299_v53  ;;  %v7152_v20 = vand.u32 4294901760, %v5775_v45  ;;  %v7153_v15 = vld [vmem:[#allocation3_spill] sm:$0xff] }
  0xee   : > { %v2201_v37 = vsub.f32 %v5780_v12, %v7157_v5 }
  0xef   : > { %4108 = vmatpush3.bf16.msra.mxu1 %v5554_v18  ;;  %v6237_v54 = vpack.c.bf16 %v7148_v6, %v7146_v27  ;;  %v2320_v18 = vsub.f32 %v5775_v45, %v7152_v20  ;;  %v7154_v27 = vand.u32 4294901760, %v7153_v15  ;;  %v7156_v6 = vand.u32 4294901760, %v7155_v56 }
  0xf0   : > { %4080 = vmatpush3.bf16.msra.mxu0 %v7144_v23  ;;  %4110 = vmatprep.subr.bf16.mxu1 %v5564_v24  ;;  %v2170_v23 = vsub.f32 %v6212_v46, %v6716_v38  ;;  %v2188_v24 = vand.u32 4294901760, %v2187_v63  ;;  %v2195_v53 = vand.u32 4294901760, %v2194_v61  ;;  %v7159_v20 = vand.u32 4294901760, %v5798_v32  ;;  %v7162_v61 = vld [vmem:[#allocation15_spill] sm:$0xff] }
  0xf1   : > { %7149 = vst [vmem:[#allocation29_spill] sm:$0xff] %v6237_v54  ;;  %4082 = vmatprep.subr.bf16.mxu0 %v7150_v29  ;;  %v6254_v29 = vpack.c.bf16 %v7156_v6, %v7154_v27  ;;  %v7160_v15 = vand.u32 4294901760, %v5803_v25  ;;  %v7161_v27 = vand.u32 4294901760, %v5814_v55  ;;  %v7164_v6 = vld [vmem:[#allocation16_spill] sm:$0xff]  ;;  %v4149_v16 = vpack.c.bf16 %v2307_v22, %v2300_v28 }
  0xf2   : > { %v2208_v38 = vsub.f32 %v5798_v32, %v7159_v20  ;;  %v2314_v20 = vand.u32 4294901760, %v2313_v13  ;;  %v2321_v46 = vand.u32 4294901760, %v2320_v18  ;;  %v7166_v32 = vld [vmem:[#allocation17_spill] sm:$0xff]  ;;  %v7175_v28 = vand.u32 4294901760, %v5824_v21 }
  0xf3   : > { %4112 = vmatpush3.bf16.msra.mxu1 %v7114_v1  ;;  %v2327_v56 = vsub.f32 %v5803_v25, %v7160_v15  ;;  %v2334_v63 = vsub.f32 %v5814_v55, %v7161_v27  ;;  %v7165_v1 = vand.u32 4294901760, %v7164_v6  ;;  %v7167_v12 = vand.u32 4294901760, %v7166_v32  ;;  %v7168_v15 = vld [vmem:[#allocation19_spill] sm:$0xff]  ;;  %v7170_v55 = vld [vmem:[#allocation13_spill] sm:$0xff] }
  0xf4   : > { %4084 = vmatpush3.bf16.msra.mxu0 %v7158_v60  ;;  %4114 = vmatprep.subr.bf16.mxu1 %v7116_v50  ;;  %v7163_v60 = vand.u32 4294901760, %v7162_v61  ;;  %v7169_v25 = vand.u32 4294901760, %v7168_v15  ;;  %v2171_v27 = vand.u32 4294901760, %v2170_v23  ;;  %v7174_v61 = vand.u32 4294901760, %v7173_v33  ;;  %v4321_v15 = vld [vmem:[%s4652_s17 + $0x10] sm:$0x3] }
  0xf5   : > { %4118 = vmatprep.subr.bf16.mxu0 %v6237_v54  ;;  %v7171_v54 = vld [vmem:[#allocation20_spill] sm:$0xff]  ;;  %v2215_v22 = vsub.f32 %v5824_v21, %v7175_v28  ;;  %v7176_v32 = vand.u32 4294901760, %v5829_v40  ;;  %v2328_v13 = vand.u32 4294901760, %v2327_v56  ;;  %v2335_v33 = vand.u32 4294901760, %v2334_v63 }
  0xf6   : > { %v6276_v5 = vpack.c.bf16 %v7165_v1, %v7163_v60  ;;  %v6282_v45 = vpack.c.bf16 %v7169_v25, %v7167_v12  ;;  %v7172_v50 = vand.u32 4294901760, %v7171_v54  ;;  %v4151_v60 = vpack.c.bf16 %v2195_v53, %v2188_v24 }
  0xf7   : > { %1920 = vmatmul.mubr.f32.vlgmr.msra.gmra.mrb[10].mxu0 %v7170_v55  ;;  %v2222_v12 = vsub.f32 %v5829_v40, %v7176_v32  ;;  %4116 = vmatpush3.bf16.msra.mxu1 %v7119_v44  ;;  %v2202_v25 = vand.u32 4294901760, %v2201_v37  ;;  %v2209_v54 = vand.u32 4294901760, %v2208_v38  ;;  %v4153_v18 = vpack.c.bf16 %v2321_v46, %v2314_v20  ;;  %v7179_v44 = vld [vmem:[#allocation24_spill] sm:$0xff]  ;;  %v7181_v38 = vld [vmem:[#allocation11_spill] sm:$0xff]  ;;  %v7186_v20 = vld [vmem:[#allocation30_spill] sm:$0xff] }
  0xf8   : > { %v6289_v6 = vpack.c.bf16 %v7174_v61, %v7172_v50  ;;  %4120 = vmatpush3.bf16.msra.mxu0 %v6254_v29  ;;  %4150 = vmatprep.subr.bf16.mxu1 %v4149_v16  ;;  %v7177_v23 = vand.u32 4294901760, %v5841_v35  ;;  %v7178_v53 = vand.u32 4294901760, %v5846_v9  ;;  %v2064_v50 = vrot.slane %v4321_v15, 2  ;;  %v7184_v16 = vld [vmem:[#allocation27_spill] sm:$0xff] }
  0xf9   : > { %4122 = vmatprep.subr.bf16.mxu0 %v6276_v5  ;;  %v7180_v37 = vand.u32 4294901760, %v7179_v44  ;;  %v7182_v56 = vand.u32 4294901760, %v7181_v38  ;;  %2172 = vmatprep.mubr.f32.mxu0 %v2171_v27  ;;  %v7185_v46 = vand.u32 4294901760, %v7184_v16  ;;  %v7187_v61 = vand.u32 4294901760, %v7186_v20  ;;  %v4322_v38 = vld [vmem:[%s4652_s17] sm:$0xff] }
  0xfa   : > { %v2341_v24 = vsub.f32 %v5841_v35, %v7177_v23  ;;  %v2348_v1 = vsub.f32 %v5846_v9, %v7178_v53  ;;  %2024 = vmatmul.mubr.f32.vlgmr.msra.gmra.mrb[10].mxu1 %v7170_v55  ;;  %v2216_v32 = vand.u32 4294901760, %v2215_v22  ;;  %v2223_v23 = vand.u32 4294901760, %v2222_v12 }
  0xfb   : > { %v6311_v63 = vpack.c.bf16 %v7182_v56, %v7180_v37  ;;  %v6318_v28 = vpack.c.bf16 %v7187_v61, %v7185_v46  ;;  %v7188_v53 = vand.u32 4294901760, %v5867_v59  ;;  %4152 = vmatpush3.bf16.msra.mxu1 %v4151_v60  ;;  %v4155_v44 = vpack.c.bf16 %v2209_v54, %v2202_v25  ;;  %2408 = vmatprep.mubr.f32.mxu1 %v6205_v49  ;;  %v7195_v61 = vld [vmem:[#allocation32_spill] sm:$0xff] }
  0xfc   : > { %4124 = vmatpush3.bf16.msra.mxu0 %v6282_v45  ;;  %v4157_v37 = vpack.c.bf16 %v2335_v33, %v2328_v13  ;;  %v7189_v27 = vand.u32 4294901760, %v5872_v36  ;;  %v2063_v56 = vrot.slane %v4322_v38, 2  ;;  %4154 = vmatprep.subr.bf16.mxu1 %v4153_v18  ;;  %v2342_v22 = vand.u32 4294901760, %v2341_v24  ;;  %v7193_v13 = vld [vmem:[#allocation31_spill] sm:$0xff] }
  0xfd   : > { %7183 = vst [vmem:[#allocation14_spill] sm:$0xff] %v6311_v63  ;;  %v2229_v15 = vsub.f32 %v5867_v59, %v7188_v53  ;;  %4126 = vmatprep.subr.bf16.mxu0 %v6289_v6  ;;  %v2349_v12 = vand.u32 4294901760, %v2348_v1  ;;  %v7190_v16 = vand.u32 4294901760, %v5898_v8  ;;  %v7191_v20 = vand.u32 4294901760, %v5921_v47 }
  0xfe   : > { %v2236_v55 = vsub.f32 %v5872_v36, %v7189_v27  ;;  %v7192_v25 = vand.u32 4294901760, %v5926_v43  ;;  %v7194_v33 = vand.u32 4294901760, %v7193_v13  ;;  %v7196_v18 = vand.u32 4294901760, %v7195_v61 }
  0xff   : > { %v2355_v46 = vsub.f32 %v5898_v8, %v7190_v16  ;;  %v2362_v60 = vsub.f32 %v5921_v47, %v7191_v20  ;;  %v4159_v1 = vpack.c.bf16 %v2223_v23, %v2216_v32  ;;  %v2230_v53 = vand.u32 4294901760, %v2229_v15  ;;  %4156 = vmatpush3.bf16.msra.mxu1 %v4155_v44  ;;  %v7200_v32 = vld [vmem:[#allocation34_spill] sm:$0xff] }
 0x100   : > { %v2243_v54 = vsub.f32 %v5926_v43, %v7192_v25  ;;  %v6343_v24 = vpack.c.bf16 %v7196_v18, %v7194_v33  ;;  %v7197_v27 = vand.u32 4294901760, %v5964_v48  ;;  %4128 = vmatpush3.bf16.msra.mxu0 %v6311_v63  ;;  %v2237_v16 = vand.u32 4294901760, %v2236_v55  ;;  %v7202_v15 = vld [vmem:[#allocation26_spill] sm:$0xff]  ;;  %4158 = vmatprep.subr.bf16.mxu1 %v4157_v37  ;;  %v7204_v63 = vld [vmem:[#allocation36_spill] sm:$0xff] }
 0x101   : > { %v7198_v20 = vand.u32 4294901760, %v5977_v7  ;;  %v7199_v13 = vand.u32 4294901760, %v5982_v31  ;;  %v2065_v33 = vsel %vm2062_vm1, %v2063_v56, %v2064_v50  ;;  %4130 = vmatprep.subr.bf16.mxu0 %v6318_v28  ;;  %v7201_v23 = vand.u32 4294901760, %v7200_v32 }
 0x102   : > { %v2250_v38 = vsub.f32 %v5964_v48, %v7197_v27  ;;  %v7203_v18 = vand.u32 4294901760, %v7202_v15  ;;  %v4161_v44 = vpack.c.bf16 %v2349_v12, %v2342_v22  ;;  %v2356_v55 = vand.u32 4294901760, %v2355_v46 }
 0x103   : > { %v2369_v25 = vsub.f32 %v5977_v7, %v7198_v20  ;;  %v2376_v61 = vsub.f32 %v5982_v31, %v7199_v13  ;;  %v2363_v49 = vand.u32 4294901760, %v2362_v60  ;;  %v7205_v20 = vand.u32 4294901760, %v7204_v63  ;;  %v7206_v7 = vld [vmem:[#allocation56_spill] sm:$0xff]  ;;  %4160 = vmatpush3.bf16.msra.mxu1 %v4159_v1  ;;  %v7210_v63 = vld [vmem:[#allocation57_spill] sm:$0xff] }
 0x104   : > { %v6361_v27 = vpack.c.bf16 %v7203_v18, %v7201_v23  ;;  %v7207_v48 = vand.u32 4294901760, %v7206_v7  ;;  %v2244_v13 = vand.u32 4294901760, %v2243_v54  ;;  %v2251_v50 = vand.u32 4294901760, %v2250_v38  ;;  %4132 = vmatpush3.bf16.msra.mxu0 %v6343_v24  ;;  %4162 = vmatprep.subr.bf16.mxu1 %v4161_v44 }
 0x105   : > { %v7208_v56 = vand.u32 4294901760, %v5989_v58  ;;  %v7209_v15 = vand.u32 4294901760, %v5994_v17  ;;  %v6375_v37 = vand.u32 4294901760, %v2065_v33  ;;  %v7211_v22 = vand.u32 4294901760, %v7210_v63 }
 0x106   : > { %v6367_v43 = vpack.c.bf16 %v7207_v48, %v7205_v20  ;;  %v7212_v48 = vand.u32 4294901760, %v5858_v14  ;;  %v4163_v12 = vpack.c.bf16 %v2237_v16, %v2230_v53  ;;  %v2370_v46 = vand.u32 4294901760, %v2369_v25  ;;  %4134 = vmatprep.subr.bf16.mxu0 %v6361_v27  ;;  %v7216_v14 = vld [vmem:[#allocation58_spill] sm:$0xff] }
 0x107   : > { %v2257_v32 = vsub.f32 %v5989_v58, %v7208_v56  ;;  %v2264_v23 = vsub.f32 %v5994_v17, %v7209_v15  ;;  %v2377_v60 = vand.u32 4294901760, %v2376_v61  ;;  %v4165_v54 = vpack.c.bf16 %v2363_v49, %v2356_v55 }
 0x108   : > { %v6382_v7 = vpack.c.bf16 %v7212_v48, %v7211_v22  ;;  %v7213_v38 = vand.u32 4294901760, %v6000_v52  ;;  %v7214_v20 = vand.u32 4294901760, %v6009_v3  ;;  %v7215_v56 = vand.u32 4294901760, %v5879_v30  ;;  %4136 = vmatpush3.bf16.msra.mxu0 %v6367_v43  ;;  %4164 = vmatpush3.bf16.msra.mxu1 %v4163_v12 }
 0x109   : > { %v7217_v15 = vand.u32 4294901760, %v7216_v14  ;;  %v7218_v53 = vand.u32 4294901760, %v5889_v51  ;;  %v7219_v16 = vand.u32 4294901760, %v5906_v0  ;;  %v4167_v49 = vpack.c.bf16 %v2251_v50, %v2244_v13  ;;  %4166 = vmatprep.subr.bf16.mxu1 %v4165_v54 }
 0x10a   : > { %v2383_v18 = vsub.f32 %v6000_v52, %v7213_v38  ;;  %v2390_v1 = vsub.f32 %v6009_v3, %v7214_v20  ;;  %v2258_v61 = vand.u32 4294901760, %v2257_v32  ;;  %v2265_v44 = vand.u32 4294901760, %v2264_v23  ;;  %4138 = vmatprep.subr.bf16.mxu0 %v6382_v7  ;;  %v7226_v38 = vld [vmem:[#allocation60_spill] sm:$0xff] }
 0x10b   : > { %v6395_v63 = vpack.c.bf16 %v7217_v15, %v7215_v56  ;;  %v6401_v25 = vpack.c.bf16 %v7219_v16, %v7218_v53  ;;  %v6404_v55 = vsub.f32 %v2065_v33, %v6375_v37  ;;  %v4169_v30 = vpack.c.bf16 %v2377_v60, %v2370_v46  ;;  %v7224_v46 = vld [vmem:[#allocation59_spill] sm:$0xff] }
 0x10c   : > { %v7220_v22 = vand.u32 4294901760, %v6014_v10  ;;  %v7221_v51 = vand.u32 4294901760, %v6019_v62  ;;  %v2384_v13 = vand.u32 4294901760, %v2383_v18  ;;  %v2391_v50 = vand.u32 4294901760, %v2390_v1  ;;  %4168 = vmatpush3.bf16.msra.mxu1 %v4167_v49 }
 0x10d   : > { %v7222_v33 = vand.u32 4294901760, %v6030_v11  ;;  %v7223_v23 = vand.u32 4294901760, %v6035_v57  ;;  %v7225_v60 = vand.u32 4294901760, %v7224_v46  ;;  %v7227_v20 = vand.u32 4294901760, %v7226_v38  ;;  %4140 = vmatpush3.bf16.msra.mxu0 %v6395_v63  ;;  %4170 = vmatprep.subr.bf16.mxu1 %v4169_v30 }
 0x10e   : > { %v2271_v48 = vsub.f32 %v6014_v10, %v7220_v22  ;;  %v2278_v0 = vsub.f32 %v6019_v62, %v7221_v51  ;;  %v4171_v14 = vpack.c.bf16 %v2265_v44, %v2258_v61  ;;  %v2175_v15 = vand.u32 4294901760, %v6404_v55  ;;  %4142 = vmatprep.subr.bf16.mxu0 %v6401_v25  ;;  %v7230_v51 = vld [vmem:[#allocation62_spill] sm:$0xff]  ;;  %v7232_v61 = vld [vmem:[#allocation63_spill] sm:$0xff] }
 0x10f   : > { %v2397_v32 = vsub.f32 %v6030_v11, %v7222_v33  ;;  %v2404_v12 = vsub.f32 %v6035_v57, %v7223_v23  ;;  %v6424_v56 = vpack.c.bf16 %v7227_v20, %v7225_v60  ;;  %v7228_v1 = vand.u32 4294901760, %v6040_v41 }
 0x110   : > { %v2272_v54 = vand.u32 4294901760, %v2271_v48  ;;  %v2279_v18 = vand.u32 4294901760, %v2278_v0  ;;  %v7229_v16 = vand.u32 4294901760, %v6057_v19  ;;  %v7231_v33 = vand.u32 4294901760, %v7230_v51  ;;  %4172 = vmatpush3.bf16.msra.mxu1 %v4171_v14 }
 0x111   : > { %v2285_v53 = vsub.f32 %v6040_v41, %v7228_v1  ;;  %v7233_v44 = vand.u32 4294901760, %v7232_v61  ;;  %v4173_v49 = vpack.c.bf16 %v2391_v50, %v2384_v13  ;;  %v2398_v48 = vand.u32 4294901760, %v2397_v32  ;;  %4144 = vmatpush3.bf16.msra.mxu0 %v6424_v56  ;;  %v7236_v32 = vld [vmem:[#allocation33_spill] sm:$0xff] }
 0x112   : > { %v2292_v22 = vsub.f32 %v6057_v19, %v7229_v16  ;;  %v2405_v0 = vand.u32 4294901760, %v2404_v12  ;;  %v2176_v46 = vsub.f32 %v6404_v55, %v2175_v15  ;;  %v7234_v60 = vand.u32 4294901760, %v5943_v2  ;;  %v7237_v12 = vld [vmem:[#allocation18_spill] sm:$0xff]  ;;  %v7243_v61 = vld [vmem:[#allocation37_spill] sm:$0xff] }
 0x113   : > { %v6439_v23 = vpack.c.bf16 %v7233_v44, %v7231_v33  ;;  %v7235_v38 = vand.u32 4294901760, %v5971_v4  ;;  %v4175_v1 = vpack.c.bf16 %v2279_v18, %v2272_v54  ;;  %v2286_v16 = vand.u32 4294901760, %v2285_v53  ;;  %4174 = vmatprep.subr.bf16.mxu1 %v4173_v49  ;;  %v7238_v54 = vld [vmem:[#allocation21_spill] sm:$0xff]  ;;  %v7239_v18 = vld [vmem:[#allocation35_spill] sm:$0xff] }
 0x114   : > { %v2293_v51 = vand.u32 4294901760, %v2292_v22  ;;  %v4181_v30 = vpack.c.bf16 %v5694_v26, %v5673_v39  ;;  %v4177_v13 = vpack.c.bf16 %v2405_v0, %v2398_v48  ;;  %v2177_v50 = vand.u32 4294901760, %v2176_v46  ;;  %v7240_v26 = vld [vmem:[#allocation54_spill] sm:$0xff]  ;;  %v7241_v53 = vld [vmem:[#allocation55_spill] sm:$0xff]  ;;  %v7242_v33 = vld [vmem:[#allocation29_spill] sm:$0xff] }
 0x115   : > { %v6449_v20 = vpack.c.bf16 %v7235_v38, %v7234_v60  ;;  %4146 = vmatprep.subr.bf16.mxu0 %v6439_v23  ;;  %4176 = vmatpush3.bf16.msra.mxu1 %v4175_v1  ;;  %v4183_v4 = vpack.c.bf16 %v5743_v34, %v5738_v42  ;;  %v4185_v14 = vpack.c.bf16 %v7237_v12, %v7236_v32  ;;  %v7244_v44 = vand.u32 4294901760, %v7243_v61  ;;  %v7247_v48 = vld [vmem:[#allocation14_spill] sm:$0xff]  ;;  %v7248_v0 = vld [vmem:[#allocation9_spill] sm:$0xff]  ;;  %v7254_v1 = vld [vmem:[#allocation68_spill] sm:$0xff] }
 0x116   : > { %v4179_v2 = vpack.c.bf16 %v2293_v51, %v2286_v16  ;;  %4178 = vmatprep.subr.bf16.mxu1 %v4177_v13  ;;  %v4187_v39 = vpack.c.bf16 %v7239_v18, %v7238_v54  ;;  %v4189_v22 = vpack.c.bf16 %v7241_v53, %v7240_v26  ;;  %v4191_v42 = vpack.c.bf16 %v5829_v40, %v5824_v21  ;;  %v7245_v40 = vld [vmem:[#allocation61_spill] sm:$0xff]  ;;  %v7256_v51 = vld [vmem:[#allocation70_spill] sm:$0xff] }
 0x117   : > { %4148 = vmatpush3.bf16.msra.mxu0 %v6449_v20  ;;  %v4193_v34 = vpack.c.bf16 %v5846_v9, %v5841_v35  ;;  %v4195_v49 = vpack.c.bf16 %v5872_v36, %v5867_v59  ;;  %v4197_v21 = vpack.c.bf16 %v5921_v47, %v5898_v8  ;;  %v7246_v35 = vld [vmem:[#allocation2_spill] sm:$0xff]  ;;  %v4201_v46 = vpack.c.bf16 %v5982_v31, %v7248_v0  ;;  %v7255_v16 = vld [vmem:[#allocation69_spill] sm:$0xff] }
 0x118   : > { %4182 = vmatprep.subr.bf16.mxu0 %v4181_v30  ;;  %v4199_v9 = vpack.c.bf16 %v7246_v35, %v7245_v40  ;;  %v4203_v36 = vpack.c.bf16 %v5994_v17, %v5989_v58  ;;  %v4205_v8 = vpack.c.bf16 %v6009_v3, %v6000_v52  ;;  %v4207_v31 = vpack.c.bf16 %v6019_v62, %v6014_v10  ;;  %v7249_v62 = vld [vmem:[#allocation64_spill] sm:$0xff]  ;;  %v7263_v32 = vld [vmem:[#allocation77_spill] sm:$0xff] }
 0x119   : > { %4180 = vmatpush3.bf16.msra.mxu1 %v4179_v2  ;;  %v3135_v59 = vpop.f32.mrb[0].mxu0  ;;  %v4209_v58 = vpack.c.bf16 %v6035_v57, %v6030_v11  ;;  %v4211_v52 = vpack.c.bf16 %v6057_v19, %v6040_v41  ;;  %v7250_v11 = vld [vmem:[#allocation65_spill] sm:$0xff]  ;;  %v7251_v41 = vld [vmem:[#allocation66_spill] sm:$0xff]  ;;  %v7252_v57 = vld [vmem:[#allocation28_spill] sm:$0xff] }
 0x11a   : > { %2178 = vmatmul.mubr.f32.vlgmr.msra.gmra.mrb[12].mxu0 %v2177_v50  ;;  %4214 = vmatprep.subr.bf16.mxu1 %v7242_v33  ;;  %v3136_v47 = vpop.f32.mrb[1].mxu0  ;;  %v7253_v19 = vld [vmem:[#allocation67_spill] sm:$0xff]  ;;  %v7262_v50 = vld [vmem:[#allocation76_spill] sm:$0xff] }
 0x11b   : > { %4184 = vmatpush3.bf16.msra.mxu0 %v4183_v4  ;;  %2545 = vmatprep.mubr.f32.mxu0 %v7243_v61  ;;  %v3137_v60 = vadd.f32 %v3136_v47, %v3135_v59 }
 0x11c   : > { %4186 = vmatprep.subr.bf16.mxu0 %v4185_v14  ;;  %2410 = vmatmul.mubr.f32.vlgmr.msra.gmra.mrb[12].mxu1 %v6375_v37  ;;  %v7265_v14 = vld [vmem:[#allocation79_spill] sm:$0xff] }
 0x11d   : > { %4216 = vmatpush3.bf16.msra.mxu1 %v6254_v29  ;;  %2652 = vmatprep.mubr.f32.mxu1 %v7244_v44  ;;  %v3170_v17 = vpop.f32.mrb[0].mxu1 }
 0x11e   : > { %4218 = vmatprep.subr.bf16.mxu1 %v6276_v5  ;;  %v3171_v38 = vpop.f32.mrb[1].mxu1 }
 0x11f   : > { %4188 = vmatpush3.bf16.msra.mxu0 %v4187_v39  ;;  %v3172_v3 = vadd.f32 %v3171_v38, %v3170_v17 }
 0x120   : > { %4190 = vmatprep.subr.bf16.mxu0 %v4189_v22 }
 0x121   : > { %4220 = vmatpush3.bf16.msra.mxu1 %v6282_v45  ;;  %v646_v10 = vadd.f32 %v3172_v3, %v3137_v60 }
 0x122   : > { %4222 = vmatprep.subr.bf16.mxu1 %v6289_v6 }
 0x123   : > { %4192 = vmatpush3.bf16.msra.mxu0 %v4191_v42 }
 0x124   : > { %4194 = vmatprep.subr.bf16.mxu0 %v4193_v34 }
 0x125   : > { %4224 = vmatpush3.bf16.msra.mxu1 %v7247_v48 }
 0x126   : > { %4226 = vmatprep.subr.bf16.mxu1 %v6318_v28 }
 0x127   : > { %4196 = vmatpush3.bf16.msra.mxu0 %v4195_v49 }
 0x128   : > { %4198 = vmatprep.subr.bf16.mxu0 %v4197_v21 }
 0x129   : > { %4228 = vmatpush3.bf16.msra.mxu1 %v6343_v24 }
 0x12a   : > { %4230 = vmatprep.subr.bf16.mxu1 %v6361_v27 }
 0x12b   : > { %4200 = vmatpush3.bf16.msra.mxu0 %v4199_v9 }
 0x12c   : > { %4202 = vmatprep.subr.bf16.mxu0 %v4201_v46 }
 0x12d   : > { %4232 = vmatpush3.bf16.msra.mxu1 %v6367_v43 }
 0x12e   : > { %4234 = vmatprep.subr.bf16.mxu1 %v6382_v7 }
 0x12f   : > { %4204 = vmatpush3.bf16.msra.mxu0 %v4203_v36 }
 0x130   : > { %4206 = vmatprep.subr.bf16.mxu0 %v4205_v8 }
 0x131   : > { %4236 = vmatpush3.bf16.msra.mxu1 %v6395_v63 }
 0x132   : > { %4238 = vmatprep.subr.bf16.mxu1 %v6401_v25 }
 0x133   : > { %4208 = vmatpush3.bf16.msra.mxu0 %v4207_v31 }
 0x134   : > { %4210 = vmatprep.subr.bf16.mxu0 %v4209_v58 }
 0x135   : > { %4240 = vmatpush3.bf16.msra.mxu1 %v6424_v56 }
 0x136   : > { %4242 = vmatprep.subr.bf16.mxu1 %v6439_v23 }
 0x137   : > { %4212 = vmatpush3.bf16.msra.mxu0 %v4211_v52 }
 0x138   : > { %4246 = vmatprep.subr.bf16.mxu0 %v7249_v62 }
 0x139   : > { %4244 = vmatpush3.bf16.msra.mxu1 %v6449_v20 }
 0x13a   : > { %2548 = vmatmul.mubr.f32.vlgmr.msra.gmra.mrb[14].mxu0 %v6404_v55  ;;  %4278 = vmatprep.subr.bf16.mxu1 %v7242_v33  ;;  %v7257_v55 = vld [vmem:[#allocation71_spill] sm:$0xff] }
 0x13b   : > { %4248 = vmatpush3.bf16.msra.mxu0 %v7250_v11  ;;  %2822 = vmatprep.mubr.f32.mxu0 %v7252_v57 }
 0x13c   : > { %4250 = vmatprep.subr.bf16.mxu0 %v7251_v41  ;;  %2656 = vmatmul.mubr.f32.vlgmr.msra.gmra.mrb[14].mxu1 %v2175_v15  ;;  %v7258_v15 = vld [vmem:[#allocation72_spill] sm:$0xff] }
 0x13d   : > { %4280 = vmatpush3.bf16.msra.mxu1 %v6254_v29  ;;  %2926 = vmatprep.mubr.f32.mxu1 %v7252_v57  ;;  %v7259_v29 = vld [vmem:[#allocation73_spill] sm:$0xff]  ;;  %v3240_v4 = vpop.f32.mrb[2].mxu1 }
 0x13e   : > { %4282 = vmatprep.subr.bf16.mxu1 %v6276_v5  ;;  %v7260_v5 = vld [vmem:[#allocation74_spill] sm:$0xff]  ;;  %v3241_v2 = vpop.f32.mrb[3].mxu1 }
 0x13f   : > { %4252 = vmatpush3.bf16.msra.mxu0 %v7253_v19 }
 0x140   : > { %4254 = vmatprep.subr.bf16.mxu0 %v7254_v1 }
 0x141   : > { %4284 = vmatpush3.bf16.msra.mxu1 %v6282_v45  ;;  %v3205_v45 = vpop.f32.mrb[2].mxu0 }
 0x142   : > { %4286 = vmatprep.subr.bf16.mxu1 %v6289_v6  ;;  %v3206_v30 = vpop.f32.mrb[3].mxu0  ;;  %v7261_v6 = vld [vmem:[#allocation75_spill] sm:$0xff] }
 0x143   : > { %4256 = vmatpush3.bf16.msra.mxu0 %v7255_v16  ;;  %v3207_v13 = vadd.f32 %v3206_v30, %v3205_v45 }
 0x144   : > { %4258 = vmatprep.subr.bf16.mxu0 %v7256_v51 }
 0x145   : > { %4288 = vmatpush3.bf16.msra.mxu1 %v7247_v48 }
 0x146   : > { %4290 = vmatprep.subr.bf16.mxu1 %v6318_v28  ;;  %v784_v28 = vadd.f32 %v3207_v13, %v646_v10 }
 0x147   : > { %4260 = vmatpush3.bf16.msra.mxu0 %v7257_v55 }
 0x148   : > { %4262 = vmatprep.subr.bf16.mxu0 %v7258_v15 }
 0x149   : > { %4292 = vmatpush3.bf16.msra.mxu1 %v6343_v24  ;;  %v3242_v24 = vadd.f32 %v3241_v2, %v3240_v4 }
 0x14a   : > { %4294 = vmatprep.subr.bf16.mxu1 %v6361_v27  ;;  %v7264_v27 = vld [vmem:[#allocation78_spill] sm:$0xff] }
 0x14b   : > { %4264 = vmatpush3.bf16.msra.mxu0 %v7259_v29  ;;  %v892_v12 = vadd.f32 %v3242_v24, %v784_v28 }
 0x14c   : > { %4266 = vmatprep.subr.bf16.mxu0 %v7260_v5 }
 0x14d   : > { %4296 = vmatpush3.bf16.msra.mxu1 %v6367_v43 }
 0x14e   : > { %4298 = vmatprep.subr.bf16.mxu1 %v6382_v7 }
 0x14f   : > { %4268 = vmatpush3.bf16.msra.mxu0 %v7261_v6 }
 0x150   : > { %4270 = vmatprep.subr.bf16.mxu0 %v7262_v50  ;;  %v3097_v50 = vld [vmem:[%s6562_s2] ss:$0 sm:$0xff] }
 0x151   : > { %4300 = vmatpush3.bf16.msra.mxu1 %v6395_v63 }
 0x152   : > { %4302 = vmatprep.subr.bf16.mxu1 %v6401_v25 }
 0x153   : > { %4272 = vmatpush3.bf16.msra.mxu0 %v7263_v32 }
 0x154   : > { %4274 = vmatprep.subr.bf16.mxu0 %v7264_v27 }
 0x155   : > { %4304 = vmatpush3.bf16.msra.mxu1 %v6424_v56 }
 0x156   : > { %4306 = vmatprep.subr.bf16.mxu1 %v6439_v23 }
 0x157   : > { %4276 = vmatpush3.bf16.msra.mxu0 %v7265_v14 }
 0x159   : > { %4308 = vmatpush3.bf16.msra.mxu1 %v6449_v20 }
 0x15a   : > { %2824 = vmatmul.mubr.f32.vlgmr.msra.gmra.mrb[16].mxu0 %v6375_v37  ;;  %v3275_v43 = vpop.f32.mrb[4].mxu0 }
 0x15b   : > { %v3276_v7 = vpop.f32.mrb[5].mxu0 }
 0x15c   : > { %2928 = vmatmul.mubr.f32.vlgmr.msra.gmra.mrb[16].mxu1 %v6375_v37  ;;  %v3277_v63 = vadd.f32 %v3276_v7, %v3275_v43 }
 0x15e   : > { %v1060_v54 = vadd.f32 %v3277_v63, %v892_v12 }
 0x163   : > { %v3310_v18 = vpop.f32.mrb[4].mxu1 }
 0x164   : > { %v3311_v39 = vpop.f32.mrb[5].mxu1 }
 0x165   : > { %v3312_v25 = vadd.f32 %v3311_v39, %v3310_v18  ;;  %v3099_v39 = vld [vmem:[%s6564_s4] ss:$0 sm:$0xff] }
 0x167   : > { %v1164_v26 = vadd.f32 %v3312_v25, %v1060_v54  ;;  %v3098_v54 = vld [vmem:[%s6563_s3] ss:$0 sm:$0xff] }
 0x185   : > { %v3345_v53 = vpop.f32.mrb[6].mxu0 }
 0x186   : > { %v3346_v22 = vpop.f32.mrb[7].mxu0 }
 0x187   : > { %v3347_v33 = vadd.f32 %v3346_v22, %v3345_v53 }
 0x188   : > { %v3380_v61 = vpop.f32.mrb[6].mxu1 }
 0x189   : > { %v1276_v56 = vadd.f32 %v3347_v33, %v1164_v26  ;;  %v3381_v23 = vpop.f32.mrb[7].mxu1 }
 0x18a   : > { %v3382_v42 = vadd.f32 %v3381_v23, %v3380_v61 }
 0x18c   : > { %v1508_v34 = vadd.f32 %v3382_v42, %v1276_v56 }
 0x1aa   : > { %v3415_v44 = vpop.f32.mrb[8].mxu0 }
 0x1ab   : > { %v3416_v20 = vpop.f32.mrb[9].mxu0 }
 0x1ac   : > { %v3417_v49 = vadd.f32 %v3416_v20, %v3415_v44 }
 0x1ad   : > { %v3450_v21 = vpop.f32.mrb[8].mxu1 }
 0x1ae   : > { %v1646_v37 = vadd.f32 %v3417_v49, %v1508_v34  ;;  %v3451_v40 = vpop.f32.mrb[9].mxu1 }
 0x1af   : > { %v3452_v35 = vadd.f32 %v3451_v40, %v3450_v21 }
 0x1b1   : > { %v1754_v9 = vadd.f32 %v3452_v35, %v1646_v37 }
 0x1ca   : > { %v3485_v48 = vpop.f32.mrb[10].mxu0 }
 0x1cb   : > { %v3486_v0 = vpop.f32.mrb[11].mxu0 }
 0x1cc   : > { %v3487_v46 = vadd.f32 %v3486_v0, %v3485_v48 }
 0x1cd   : > { %v3520_v8 = vpop.f32.mrb[10].mxu1 }
 0x1ce   : > { %v1922_v36 = vadd.f32 %v3487_v46, %v1754_v9  ;;  %v3521_v59 = vpop.f32.mrb[11].mxu1 }
 0x1cf   : > { %v3522_v47 = vadd.f32 %v3521_v59, %v3520_v8 }
 0x1d1   : > { %v2026_v31 = vadd.f32 %v3522_v47, %v1922_v36 }
 0x1ed   : > { %v3555_v60 = vpop.f32.mrb[12].mxu0 }
 0x1ee   : > { %v3556_v58 = vpop.f32.mrb[13].mxu0 }
 0x1ef   : > { %v3557_v17 = vadd.f32 %v3556_v58, %v3555_v60  ;;  %v3590_v38 = vpop.f32.mrb[12].mxu1 }
 0x1f0   : > { %v3591_v3 = vpop.f32.mrb[13].mxu1 }
 0x1f1   : > { %v3592_v52 = vadd.f32 %v3591_v3, %v3590_v38 }
 0x1f3   : > { %v2412_v10 = vadd.f32 %v3592_v52, %v3557_v17 }
 0x20d   : > { %v3625_v62 = vpop.f32.mrb[14].mxu0 }
 0x20e   : > { %v3626_v11 = vpop.f32.mrb[15].mxu0 }
 0x20f   : > { %v3627_v41 = vadd.f32 %v3626_v11, %v3625_v62  ;;  %v3660_v19 = vpop.f32.mrb[14].mxu1 }
 0x210   : > { %v3661_v1 = vpop.f32.mrb[15].mxu1 }
 0x211   : > { %v2550_v57 = vadd.f32 %v3627_v41, %v2412_v10  ;;  %v3662_v16 = vadd.f32 %v3661_v1, %v3660_v19 }
 0x213   : > { %v2658_v51 = vadd.f32 %v3662_v16, %v2550_v57 }
 0x22d   : > { %v3695_v55 = vpop.f32.mrb[16].mxu0 }
 0x22e   : > { %v3696_v15 = vpop.f32.mrb[17].mxu0 }
 0x22f   : > { %v3697_v29 = vadd.f32 %v3696_v15, %v3695_v55  ;;  %v3730_v45 = vpop.f32.mrb[16].mxu1 }
 0x230   : > { %v3731_v30 = vpop.f32.mrb[17].mxu1 }
 0x231   : > { %v2826_v5 = vadd.f32 %v3697_v29, %v2658_v51  ;;  %v3732_v13 = vadd.f32 %v3731_v30, %v3730_v45 }
 0x233   : > { %v2930_v6 = vadd.f32 %v3732_v13, %v2826_v5 }
 0x235   : > { %v2933_v28 = vadd.f32 %v2930_v6, %v2026_v31 }
 0x237   : > { %v2941_v4 = vadd.f32 %v3097_v50, %v2933_v28 }
 0x239   : > { %v2942_v2 = vmax.f32 %v2941_v4, 0.0 }
 0x23b   : > { %2943 = vadd.xlane.f32.xlu0 %v2942_v2 }
 0x2c8   : > { %v2944_v32 = vpop.xlane.xlu0 %2943 }
 0x2c9   : > { %v2946_v24 = vmul.f32 0.0078125, %v2944_v32 }
 0x2cb   : > { %v2947_v27 = vsub.f32 %v2942_v2, %v2946_v24 }
 0x2cd   : > { %v2948_v12 = vmul.f32 %v2947_v27, %v2947_v27 }
 0x2cf   : > { %2949 = vadd.xlane.f32.xlu0 %v2948_v12 }
 0x35c   : > { %v2950_v14 = vpop.xlane.xlu0 %2949 }
 0x35d   : > { %v2951_v43 = vmul.f32 0.0078125, %v2950_v14 }
 0x35f   : > { %v2952_v7 = vadd.f32 1e-05, %v2951_v43 }
 0x361   : > { %4317 = vrsqrt.f32 %v2952_v7 }
 0x36b   : > { %v4318_v63 = vpop.eup %4317 }
 0x36c   : > { %v2954_v18 = vmul.f32 %v4318_v63, %v2947_v27 }
 0x36e   : > { %v2962_v25 = vmul.f32 %v3098_v54, %v2954_v18 }
 0x370   : > { %v2970_v26 = vadd.f32 %v3099_v39, %v2962_v25 }
 0x372   : > { %2971 = vst [vmem:[%s222_s24] sm:$0xff] %v2970_v26 }
 0x373 PF: > { %s15_s18 = sadd.s32 1, %s4329_s18  }
 0x374   : > { %p12_p4 = scmp.ge.s32.totalorder %s15_s18, 4  }
 0x376   :  { %14 = sbr.rel (!%p12_p4) target bundleno = 1 (0x1), region = 72 }

// kernel: forward.3
= control target key start
LH: loop header
LB: loop body
LE: loop exit
PB: predicated region body
PF: predicated region fallthrough
CT: control target
= control target key end

     0   :  { %12 = vsyncpa [#allocation3], 0  ;;  %s7783_s0 = inlined_call_operand.vmem [shape: f32[2,12,64], index: 0, kind: input, shape index: {}]   ;;  %s7784_s1 = inlined_call_operand.vmem [shape: f32[3,64,256], index: 1, kind: input, shape index: {}]   ;;  %s7785_s2 = inlined_call_operand.vmem [shape: f32[1,256], index: 2, kind: input, shape index: {}]   ;;  %s7786_s3 = inlined_call_operand.hbm [shape: f32[128,256], index: 3, kind: input, shape index: {}]   ;;  %s7787_s4 = inlined_call_operand.hbm [shape: f32[128,256], index: 4, kind: input, shape index: {}]   ;;  %s7788_s5 = inlined_call_operand.vmem [shape: f32[2,10,256], index: 5, kind: output, shape index: {0}]   ;;  %s7789_s6 = inlined_call_operand.vmem [shape: f32[2,10,256], index: 6, kind: output, shape index: {1}]  }
   0x1   :  { %13 = vsyncpa [#allocation5], 0  ;;  %s5484_s21 = smov 0  }
   0x2 LB: > { %s5490_s22 = sadd.s32 4294967295, %s5442_s21   ;;  %p4484_p0 = scmp.ge.s32.totalorder %s5442_s21, 1  ;;  %s5442_s21 = sphi %s5484_s21, %s19_s21  }
   0x3   : > { %p186_p1 = scmp.lt.s32.totalorder %s5442_s21, 3  ;;  %s5444_s23 = smov [#allocation2]  }
   0x4   : > { %s204_s24 = sshll.u32 %s5444_s23, 4  ;;  %p7790_p3 = scmp.eq.s32.totalorder %s5490_s22, 0  ;;  %s205_s24 = int_to_ptr.vmem [resolvable:$true] %s204_s24 }
   0x5   : > { %p5494_p2 = pnand %p4484_p0, %p186_p1  ;;  %s5445_s26 = smov [#allocation4]  }
   0x6   : > { %s217_s27 = sshll.u32 %s5445_s26, 4  ;;  %s5372_s7 = scalar_lea.hbm %s7786_s3, 4096  ;;  %s5507_s27 = int_to_ptr.vmem [resolvable:$true] %s217_s27 }
   0x7   : > { %s8026_s25 = scalar_select %p5494_p2, 1, 0 }
   0x8   : > { %p5340_p4 = pneg %p5494_p2  ;;  %p5373_p6 = scmp.ne.s32.totalorder %s7786_s3, %s5372_s7 }
   0x9   : > { %p5379_p10 = scmp.lt.u32.totalorder %s5372_s7, %s7786_s3 }
   0xa   : > { %p5503_p5 = pnand %p7790_p3, %p5340_p4 }
   0xc   : > { %p5374_p7 = pneg %p5503_p5 }
   0xe   : > { %p5375_p8 = pnand %p5374_p7, %p5373_p6 }
  0x10   : > { %p5376_p9 = pneg %p5375_p8 }
  0x12   : > { %p5381_p11 = pnand %p5379_p10, %p5376_p9 }
  0x14   : > { %5384 = shalt.err (!%p5381_p11)
}
  0x15   : > { %s5385_s12 = scalar_lea.vmem %s205_s24, 4096  ;;  %p5393_p1 = scmp.lt.s32.totalorder %s205_s24, %s205_s24 }
  0x16   : > { %p5386_p12 = scmp.ne.s32.totalorder %s205_s24, %s5385_s12  ;;  %p5394_p4 = scmp.lt.s32.totalorder %s5385_s12, %s5385_s12 }
  0x18   : > { %p5388_p13 = pnand %p5386_p12, %p5374_p7  ;;  %p5395_p3 = por %p5394_p4, %p5393_p1 }
  0x1a   : > { %p5389_p0 = pneg %p5388_p13 }
  0x1c   : > { %p5396_p2 = pnand %p5395_p3, %p5389_p0 }
  0x1e   : > { %5399 = shalt.err (!%p5396_p2)
}
  0x1f   : > { %s5446_s13 = smov 256   ;;  %s5447_s14 = smov 16  }
  0x20   : > { %5343 = dma.hbm_to_vmem [thread:$0]  (!%p5503_p5), %s7786_s3, 4096, %s205_s24, [#allocation3], %s5446_s13, %s5446_s13, %s5447_s14  }
  0x21   : > { %s5400_s19 = scalar_lea.hbm %s7787_s4, 4096 }
  0x22   : > { %p5401_p6 = scmp.ne.s32.totalorder %s7787_s4, %s5400_s19  ;;  %p5407_p8 = scmp.lt.u32.totalorder %s5400_s19, %s7787_s4 }
  0x24   : > { %p5403_p2 = pnand %p5401_p6, %p5374_p7 }
  0x26   : > { %p5404_p3 = pneg %p5403_p2 }
  0x28   : > { %p5409_p9 = pnand %p5407_p8, %p5404_p3 }
  0x2a   : > { %5412 = shalt.err (!%p5409_p9)
}
  0x2b   : > { %s5413_s24 = scalar_lea.vmem %s5507_s27, 4096  ;;  %p5421_p13 = scmp.lt.s32.totalorder %s5507_s27, %s5507_s27 }
  0x2c   : > { %p5414_p10 = scmp.ne.s32.totalorder %s5507_s27, %s5413_s24  ;;  %p5422_p0 = scmp.lt.s32.totalorder %s5413_s24, %s5413_s24 }
  0x2e   : > { %p5416_p11 = pnand %p5414_p10, %p5374_p7  ;;  %p5423_p1 = por %p5422_p0, %p5421_p13 }
  0x30   : > { %p5417_p12 = pneg %p5416_p11 }
  0x32   : > { %p5424_p4 = pnand %p5423_p1, %p5417_p12 }
  0x34   : > { %5427 = shalt.err (!%p5424_p4)
}
  0x35   : > { %5346 = dma.hbm_to_vmem [thread:$0]  (!%p5503_p5), %s7787_s4, 4096, %s5507_s27, [#allocation5], %s5446_s13, %s5446_s13, %s5447_s14  }
  0x36   : > { %p8028_p6 = scmp.ne.s32.totalorder %s8026_s25, 0 }
  0x38   : > { %241 = sbr.rel (%p8028_p6) target bundleno = 1145 (0x479), region = 40 }
  0x3f   : > { %p8029_p2 = scmp.eq.s32.totalorder %s5490_s22, 0 }
  0x41   : > { %5433 = dma.done.wait (%p8029_p2), [#allocation3], 4096   ;;  %p8030_p7 = pmov %p8029_p2 }
  0x42   : > { %p8031_p3 = pmov %p8029_p2 }
  0x43   : > { %5435 = vsyncadd (%p8030_p7), [#allocation3], 4294963200 }
  0x44   : > { %5437 = dma.done.wait (%p8031_p3), [#allocation5], 4096   ;;  %p8032_p8 = pmov %p8029_p2 }
  0x45   : > { %p280_p9 = scmp.lt.s32.totalorder %s5490_s22, 1  ;;  %v7833_v0 = vmov 0.0   ;;  %v4498_v1 = vld [vmem:[%s7784_s1 + $0x88] sm:$0xff]  ;;  %v4500_v2 = vld [vmem:[%s7784_s1 + $0x98] sm:$0xff]  ;;  %v4497_v3 = vld [vmem:[%s7784_s1 + $0x80] sm:$0xff]  ;;  %vm332_vm0 = vcmask 1046528  }
  0x46   : > { %5439 = vsyncadd (%p8032_p8), [#allocation5], 4294963200  ;;  %421 = vmatprep.mubr.f32.mxu0 %v7833_v0  ;;  %2867 = vmatprep.mubr.f32.mxu1 %v7833_v0  ;;  %v341_v4 = vand.u32 4294901760, %v4498_v1  ;;  %v345_v5 = vand.u32 4294901760, %v4500_v2  ;;  %v4499_v6 = vld [vmem:[%s7784_s1 + $0x90] sm:$0xff]  ;;  %v343_v7 = vand.u32 4294901760, %v4497_v3 }
  0x47   : > { %s8374_s22 = smov (!%p280_p9, %s5490_s22), 1  ;;  %v4502_v8 = vld [vmem:[%s7784_s1 + $0xa8] sm:$0xff]  ;;  %v4504_v9 = vld [vmem:[%s7784_s1 + $0xb8] sm:$0xff]  ;;  %v347_v10 = vand.u32 4294901760, %v4499_v6  ;;  %v4501_v13 = vld [vmem:[%s7784_s1 + $0xa0] sm:$0xff]  ;;  %vm336_vm1 = vcmask 523264  }
  0x48   : > { %s4533_s11 = sshll.u32 %s8374_s22, 4  ;;  %v349_v11 = vand.u32 4294901760, %v4502_v8  ;;  %v353_v12 = vand.u32 4294901760, %v4504_v9  ;;  %v4503_v14 = vld [vmem:[%s7784_s1 + $0xb0] sm:$0xff]  ;;  %v4506_v15 = vld [vmem:[%s7784_s1 + $0xc8] sm:$0xff]  ;;  %v5600_v16 = vpack.c.bf16 %v345_v5, %v341_v4  ;;  %v4508_v17 = vld [vmem:[%s7784_s1 + $0xd8] sm:$0xff]  ;;  %v5611_v20 = vsub.f32 %v4498_v1, %v341_v4 }
  0x49   : > { %v4505_v18 = vld [vmem:[%s7784_s1 + $0xc0] sm:$0xff]  ;;  %v4507_v19 = vld [vmem:[%s7784_s1 + $0xd0] sm:$0xff]  ;;  %v5613_v21 = vsub.f32 %v4500_v2, %v345_v5  ;;  %v5615_v22 = vpack.c.bf16 %v347_v10, %v343_v7  ;;  %v4510_v24 = vld [vmem:[%s7784_s1 + $0xe8] sm:$0xff]  ;;  %s284_s13 = scalar_lea.vmem %s7783_s0, %s4533_s11  ;;  %v5626_v25 = vsub.f32 %v4497_v3, %v343_v7  ;;  %v351_v26 = vand.u32 4294901760, %v4501_v13  ;;  %s4534_s19 = sshll.u32 %s8374_s22, 5 }
  0x4a   : > { %v5617_v23 = vpack.c.bf16 %v353_v12, %v349_v11  ;;  %4537 = vmatprep.subr.bf16.mxu0 %v5600_v16  ;;  %v355_v27 = vand.u32 4294901760, %v4503_v14  ;;  %v357_v28 = vand.u32 4294901760, %v4506_v15  ;;  %v5629_v29 = vsub.f32 %v4499_v6, %v347_v10  ;;  %v4512_v33 = vld [vmem:[%s7784_s1 + $0xf8] sm:$0xff]  ;;  %v4509_v34 = vld [vmem:[%s7784_s1 + $0xe0] sm:$0xff]  ;;  %v4511_v39 = vld [vmem:[%s7784_s1 + $0xf0] sm:$0xff]  ;;  %s289_s26 = scalar_lea.vmem %s7788_s5, %s4534_s19  ;;  %s294_s24 = scalar_lea.vmem %s7789_s6, %s4534_s19 }
  0x4b   : > { %4539 = vmatpush1.bf16.msra.mxu0 %v5615_v22  ;;  %v361_v30 = vand.u32 4294901760, %v4508_v17  ;;  %v359_v31 = vand.u32 4294901760, %v4505_v18  ;;  %v363_v32 = vand.u32 4294901760, %v4507_v19  ;;  %v5638_v35 = vsub.f32 %v4502_v8, %v349_v11  ;;  %v5647_v40 = vld [vmem:[%s284_s13] sm:$0xff]  ;;  %v5657_v45 = vld [vmem:[%s284_s13 + $0x8] sm:$0xf] }
  0x4c   : > { %4541 = vmatprep.subr.bf16.mxu0 %v5617_v23  ;;  %v5640_v36 = vsub.f32 %v4504_v9, %v353_v12  ;;  %v5642_v37 = vpack.c.bf16 %v355_v27, %v351_v26  ;;  %v365_v38 = vand.u32 4294901760, %v4510_v24  ;;  %v5649_v41 = vsub.f32 %v4501_v13, %v351_v26 }
  0x4d   : > { %v5651_v42 = vsub.f32 %v4503_v14, %v355_v27  ;;  %v5653_v43 = vpack.c.bf16 %v361_v30, %v357_v28  ;;  %v5655_v44 = vsub.f32 %v4506_v15, %v357_v28  ;;  %v5659_v46 = vsub.f32 %v4508_v17, %v361_v30 }
  0x4e   : > { %v5661_v47 = vpack.c.bf16 %v363_v32, %v359_v31  ;;  %v369_v48 = vand.u32 4294901760, %v4512_v33  ;;  %v367_v49 = vand.u32 4294901760, %v4509_v34  ;;  %v371_v50 = vand.u32 4294901760, %v4511_v39 }
  0x4f   : > { %4543 = vmatpush1.bf16.msra.mxu0 %v5642_v37  ;;  %v446_v51 = vand.u32 4294901760, %v5611_v20  ;;  %v458_v52 = vand.u32 4294901760, %v5613_v21  ;;  %v333_v53 = vrot.slane %v5647_v40, 1  ;;  %v5668_v54 = vsub.f32 %v4505_v18, %v359_v31 }
  0x50   : > { %4545 = vmatprep.subr.bf16.mxu0 %v5653_v43  ;;  %v5670_v55 = vsub.f32 %v4507_v19, %v363_v32  ;;  %v5672_v56 = vpack.c.bf16 %v369_v48, %v365_v38  ;;  %v334_v57 = vrot.slane %v5657_v45, 1  ;;  %v5675_v58 = vsub.f32 %v4510_v24, %v365_v38 }
  0x51   : > { %v5677_v59 = vsub.f32 %v4512_v33, %v369_v48  ;;  %v447_v60 = vsub.f32 %v5611_v20, %v446_v51  ;;  %v459_v61 = vsub.f32 %v5613_v21, %v458_v52  ;;  %v5685_v62 = vpack.c.bf16 %v371_v50, %v367_v49 }
  0x52   : > { %v5687_v63 = vsub.f32 %v4509_v34, %v367_v49  ;;  %v335_v1 = vsel %vm332_vm0, %v333_v53, %v334_v57  ;;  %v452_v2 = vand.u32 4294901760, %v5626_v25  ;;  %v464_v6 = vand.u32 4294901760, %v5629_v29 }
  0x53   : > { %4547 = vmatpush1.bf16.msra.mxu0 %v5661_v47  ;;  %v448_v3 = vand.u32 4294901760, %v447_v60  ;;  %v460_v4 = vand.u32 4294901760, %v459_v61  ;;  %v337_v5 = vsel %vm336_vm1, %v335_v1, 0  ;;  %v470_v9 = vand.u32 4294901760, %v5638_v35 }
  0x54   : > { %4549 = vmatprep.subr.bf16.mxu0 %v5672_v56  ;;  %v5695_v7 = vand.u32 4294901760, %v337_v5  ;;  %v453_v8 = vsub.f32 %v5626_v25, %v452_v2  ;;  %v482_v10 = vand.u32 4294901760, %v5640_v36  ;;  %v465_v12 = vsub.f32 %v5629_v29, %v464_v6 }
  0x55   : > { %v4552_v11 = vpack.c.bf16 %v460_v4, %v448_v3  ;;  %v476_v13 = vand.u32 4294901760, %v5649_v41  ;;  %v488_v14 = vand.u32 4294901760, %v5651_v42  ;;  %v471_v18 = vsub.f32 %v5638_v35, %v470_v9 }
  0x56   : > { %v5708_v15 = vsub.f32 %v337_v5, %v5695_v7  ;;  %v454_v17 = vand.u32 4294901760, %v453_v8  ;;  %v483_v19 = vsub.f32 %v5640_v36, %v482_v10  ;;  %v466_v24 = vand.u32 4294901760, %v465_v12 }
  0x57   : > { %4551 = vmatpush1.bf16.msra.mxu0 %v5685_v62  ;;  %v477_v26 = vsub.f32 %v5649_v41, %v476_v13  ;;  %v489_v27 = vsub.f32 %v5651_v42, %v488_v14  ;;  %v494_v28 = vand.u32 4294901760, %v5655_v44  ;;  %v472_v31 = vand.u32 4294901760, %v471_v18 }
  0x58   : > { %4553 = vmatprep.subr.bf16.mxu0 %v4552_v11  ;;  %v424_v30 = vand.u32 4294901760, %v5708_v15  ;;  %v484_v32 = vand.u32 4294901760, %v483_v19  ;;  %v506_v33 = vand.u32 4294901760, %v5659_v46  ;;  %v5726_v34 = vsub.f32 %v4511_v39, %v371_v50 }
  0x59   : > { %v4554_v38 = vpack.c.bf16 %v466_v24, %v454_v17  ;;  %v478_v48 = vand.u32 4294901760, %v477_v26  ;;  %v495_v49 = vsub.f32 %v5655_v44, %v494_v28  ;;  %v490_v60 = vand.u32 4294901760, %v489_v27 }
  0x5a   : > { %v425_v53 = vsub.f32 %v5708_v15, %v424_v30  ;;  %v507_v61 = vsub.f32 %v5659_v46, %v506_v33  ;;  %v7796_v1 = vand.u32 4294901760, %v5668_v54  ;;  %v4556_v3 = vpack.c.bf16 %v484_v32, %v472_v31 }
  0x5b   : > { %v496_v39 = vand.u32 4294901760, %v495_v49  ;;  %v7794_v50 = vand.u32 4294901760, %v5670_v55  ;;  %v7793_v4 = vand.u32 4294901760, %v5675_v58  ;;  %v7792_v12 = vand.u32 4294901760, %v5677_v59 }
  0x5c   : > { %v426_v5 = vand.u32 4294901760, %v425_v53  ;;  %v508_v8 = vand.u32 4294901760, %v507_v61  ;;  %v501_v11 = vsub.f32 %v5668_v54, %v7796_v1  ;;  %v339_v19 = vsel %vm336_vm1, %v334_v57, 0 }
  0x5d   : > { %v513_v17 = vsub.f32 %v5670_v55, %v7794_v50  ;;  %v519_v18 = vsub.f32 %v5675_v58, %v7793_v4  ;;  %v7795_v24 = vand.u32 4294901760, %v5687_v63  ;;  %v4558_v26 = vpack.c.bf16 %v490_v60, %v478_v48 }
  0x5e   : > { %427 = vmatmul.mubr.f32.vlgmr.msra.gmra.mrb[0].mxu0 %v426_v5  ;;  %v531_v27 = vsub.f32 %v5677_v59, %v7792_v12  ;;  %v5755_v31 = vand.u32 4294901760, %v339_v19  ;;  %v502_v32 = vand.u32 4294901760, %v501_v11  ;;  %v536_v57 = vand.u32 4294901760, %v5726_v34 }
  0x5f   : > { %4555 = vmatpush1.bf16.msra.mxu0 %v4554_v38  ;;  %v514_v49 = vand.u32 4294901760, %v513_v17  ;;  %432 = vmatprep.mubr.f32.mxu0 %v7833_v0  ;;  %v525_v53 = vsub.f32 %v5687_v63, %v7795_v24  ;;  %v4560_v61 = vpack.c.bf16 %v508_v8, %v496_v39  ;;  %v520_v48 = vand.u32 4294901760, %v519_v18 }
  0x60   : > { %4557 = vmatprep.subr.bf16.mxu0 %v4556_v3  ;;  %v532_v60 = vand.u32 4294901760, %v531_v27  ;;  %v434_v5 = vsub.f32 %v339_v19, %v5755_v31  ;;  %v537_v38 = vsub.f32 %v5726_v34, %v536_v57  ;;  %v4568_v39 = vpack.c.bf16 %v5613_v21, %v5611_v20 }
  0x61   : > { %v4562_v17 = vpack.c.bf16 %v514_v49, %v502_v32  ;;  %v526_v12 = vand.u32 4294901760, %v525_v53  ;;  %v4570_v8 = vpack.c.bf16 %v5629_v29, %v5626_v25  ;;  %v4572_v18 = vpack.c.bf16 %v5640_v36, %v5638_v35 }
  0x62   : > { %v435_v11 = vand.u32 4294901760, %v434_v5  ;;  %v538_v4 = vand.u32 4294901760, %v537_v38  ;;  %v4564_v50 = vpack.c.bf16 %v532_v60, %v520_v48  ;;  %v4582_v19 = vpack.c.bf16 %v5726_v34, %v5687_v63  ;;  %v305_v48 = vld [vmem:[%s7784_s1 + $0x40] sm:$0xff] }
  0x63   : > { %4559 = vmatpush1.bf16.msra.mxu0 %v4558_v26  ;;  %v4602_v26 = vpack.c.bf16 %v464_v6, %v452_v2  ;;  %v4604_v27 = vpack.c.bf16 %v482_v10, %v470_v9  ;;  %v4606_v20 = vpack.c.bf16 %v488_v14, %v476_v13  ;;  %v1755_v21 = vrot.slane %v5647_v40, 2  ;;  %v303_v2 = vld [vmem:[%s7784_s1 + $0x30] sm:$0xff] }
  0x64   : > { %4561 = vmatprep.subr.bf16.mxu0 %v4560_v61  ;;  %v436_v24 = vsub.f32 %v434_v5, %v435_v11  ;;  %v4566_v3 = vpack.c.bf16 %v538_v4, %v526_v12  ;;  %v4578_v4 = vpack.c.bf16 %v5670_v55, %v5668_v54  ;;  %v4580_v12 = vpack.c.bf16 %v5677_v59, %v5675_v58 }
  0x65   : > { %v7797_v25 = vrot.slane %v5657_v45, 2  ;;  %v4608_v29 = vpack.c.bf16 %v506_v33, %v494_v28  ;;  %vm1754_vm2 = vcmask 1045504   ;;  %v8033_v35 = vand.u32 4294901760, %v5668_v54 }
  0x66   : > { %v437_v1 = vand.u32 4294901760, %v436_v24  ;;  %v4600_v24 = vpack.c.bf16 %v458_v52, %v446_v51  ;;  %v8034_v36 = vand.u32 4294901760, %v5670_v55  ;;  %v8036_v51 = vand.u32 4294901760, %v5677_v59  ;;  %v298_v55 = vld [vmem:[%s7784_s1 + $0x8] sm:$0xff]  ;;  %v304_v59 = vld [vmem:[%s7784_s1 + $0x38] sm:$0xff] }
  0x67   : > { %4563 = vmatpush1.bf16.msra.mxu0 %v4562_v17  ;;  %v1041_v6 = vand.u32 4294901760, %v298_v55  ;;  %v1037_v49 = vsel %vm336_vm1, %v5647_v40, 0  ;;  %v312_v17 = vld [vmem:[%s7784_s1 + $0x78] sm:$0xff] }
  0x68   : > { %4565 = vmatprep.subr.bf16.mxu0 %v4564_v50  ;;  %438 = vmatmul.mubr.f32.gmra.mrb[2].mxu0 %v437_v1  ;;  %v4574_v50 = vpack.c.bf16 %v5651_v42, %v5649_v41  ;;  %v4576_v1 = vpack.c.bf16 %v5659_v46, %v5655_v44  ;;  %v4610_v41 = vpack.c.bf16 %v8034_v36, %v8033_v35  ;;  %v8035_v42 = vand.u32 4294901760, %v5675_v58  ;;  %v300_v58 = vld [vmem:[%s7784_s1 + $0x18] sm:$0xff] }
  0x69   : > { %588 = vmatprep.mubr.f32.mxu0 %v7833_v0  ;;  %v5834_v44 = vsel %vm1754_vm2, %v1755_v21, %v7797_v25  ;;  %v8037_v46 = vand.u32 4294901760, %v5687_v63  ;;  %v301_v63 = vld [vmem:[%s7784_s1 + $0x20] sm:$0xff]  ;;  %v1045_v9 = vand.u32 4294901760, %v300_v58  ;;  %v5876_v34 = vsub.f32 %v298_v55, %v1041_v6  ;;  %v311_v21 = vld [vmem:[%s7784_s1 + $0x70] sm:$0xff] }
  0x6a   : > { %v4612_v52 = vpack.c.bf16 %v8036_v51, %v8035_v42  ;;  %v1051_v28 = vand.u32 4294901760, %v301_v63 }
  0x6b   : > { %4567 = vmatpush1.bf16.msra.mxu0 %v4566_v3  ;;  %v4614_v54 = vpack.c.bf16 %v536_v57, %v8037_v46  ;;  %v5874_v33 = vpack.c.bf16 %v1045_v9, %v1041_v6  ;;  %v5878_v32 = vsub.f32 %v300_v58, %v1045_v9 }
  0x6c   : > { %4569 = vmatprep.subr.bf16.mxu0 %v4568_v39  ;;  %v5906_v40 = vsub.f32 %v301_v63, %v1051_v28 }
  0x6e   : > { %590 = vmatmul.mubr.f32.vlgmr.msra.gmra.mrb[0].mxu0 %v5695_v7  ;;  %v1176_v6 = vand.u32 4294901760, %v5906_v40 }
  0x6f   : > { %4571 = vmatpush1.bf16.msra.mxu0 %v4570_v8  ;;  %595 = vmatprep.mubr.f32.mxu0 %v7833_v0 }
  0x70   : > { %4573 = vmatprep.subr.bf16.mxu0 %v4572_v18  ;;  %v309_v18 = vld [vmem:[%s7784_s1 + $0x60] sm:$0xff] }
  0x72   : > { %597 = vmatmul.mubr.f32.gmra.mrb[2].mxu0 %v5755_v31 }
  0x73   : > { %4575 = vmatpush1.bf16.msra.mxu0 %v4574_v50  ;;  %699 = vmatprep.mubr.f32.mxu0 %v7833_v0  ;;  %v5922_v50 = vand.u32 4294901760, %v1037_v49 }
  0x74   : > { %4577 = vmatprep.subr.bf16.mxu0 %v4576_v1  ;;  %v1059_v1 = vand.u32 4294901760, %v305_v48 }
  0x75   : > { %v5942_v42 = vsub.f32 %v1037_v49, %v5922_v50 }
  0x77   : > { %4579 = vmatpush1.bf16.msra.mxu0 %v4578_v4  ;;  %v1146_v4 = vand.u32 4294901760, %v5876_v34  ;;  %v1124_v9 = vand.u32 4294901760, %v5942_v42 }
  0x78   : > { %4581 = vmatprep.subr.bf16.mxu0 %v4580_v12  ;;  %v1158_v12 = vand.u32 4294901760, %v5878_v32 }
  0x7a   : > { %v1159_v55 = vsub.f32 %v5878_v32, %v1158_v12 }
  0x7b   : > { %4583 = vmatpush1.bf16.msra.mxu0 %v4582_v19  ;;  %v1039_v19 = vsel %vm336_vm1, %v5657_v45, 0 }
  0x7c   : > { %4585 = vmatprep.subr.bf16.mxu0 %v5600_v16 }
  0x7e   : > { %702 = vmatmul.mubr.f32.vlgmr.msra.gmra.mrb[0].mxu0 %v5708_v15  ;;  %v1053_v15 = vand.u32 4294901760, %v304_v59 }
  0x7f   : > { %4587 = vmatpush1.bf16.msra.mxu0 %v5615_v22  ;;  %707 = vmatprep.mubr.f32.mxu0 %v7833_v0 }
  0x80   : > { %4589 = vmatprep.subr.bf16.mxu0 %v5617_v23 }
  0x82   : > { %710 = vmatmul.mubr.f32.gmra.mrb[2].mxu0 %v434_v5  ;;  %v5902_v5 = vsub.f32 %v304_v59, %v1053_v15 }
  0x83   : > { %4591 = vmatpush1.bf16.msra.mxu0 %v5642_v37  ;;  %796 = vmatprep.mubr.f32.mxu0 %v7833_v0 }
  0x84   : > { %4593 = vmatprep.subr.bf16.mxu0 %v5653_v43  ;;  %v1182_v51 = vand.u32 4294901760, %v5902_v5 }
  0x87   : > { %4595 = vmatpush1.bf16.msra.mxu0 %v5661_v47 }
  0x88   : > { %4597 = vmatprep.subr.bf16.mxu0 %v5672_v56 }
  0x8b   : > { %4599 = vmatpush1.bf16.msra.mxu0 %v5685_v62 }
  0x8c   : > { %4601 = vmatprep.subr.bf16.mxu0 %v4600_v24 }
  0x8e   : > { %800 = vmatmul.mubr.f32.vlgmr.msra.gmra.mrb[0].mxu0 %v424_v30  ;;  %v1055_v30 = vand.u32 4294901760, %v303_v2 }
  0x8f   : > { %4603 = vmatpush1.bf16.msra.mxu0 %v4602_v26  ;;  %805 = vmatprep.mubr.f32.mxu0 %v7833_v0 }
  0x90   : > { %4605 = vmatprep.subr.bf16.mxu0 %v4604_v27  ;;  %v5904_v38 = vpack.c.bf16 %v1055_v30, %v1051_v28  ;;  %v5917_v3 = vsub.f32 %v303_v2, %v1055_v30  ;;  %v1160_v30 = vand.u32 4294901760, %v1159_v55 }
  0x92   : > { %809 = vmatmul.mubr.f32.gmra.mrb[2].mxu0 %v435_v11  ;;  %v310_v11 = vld [vmem:[%s7784_s1 + $0x68] sm:$0xff] }
  0x93   : > { %4607 = vmatpush1.bf16.msra.mxu0 %v4606_v20  ;;  %927 = vmatprep.mubr.f32.mxu0 %v7833_v0  ;;  %v1065_v27 = vand.u32 4294901760, %v310_v11  ;;  %v1069_v20 = vand.u32 4294901760, %v312_v17 }
  0x94   : > { %4609 = vmatprep.subr.bf16.mxu0 %v4608_v29 }
  0x95   : > { %v5988_v28 = vsub.f32 %v312_v17, %v1069_v20  ;;  %v1177_v17 = vsub.f32 %v5906_v40, %v1176_v6 }
  0x97   : > { %4611 = vmatpush1.bf16.msra.mxu0 %v4610_v41 }
  0x98   : > { %4613 = vmatprep.subr.bf16.mxu0 %v4612_v52  ;;  %v5945_v52 = vand.u32 4294901760, %v1039_v19 }
  0x9b   : > { %4615 = vmatpush1.bf16.msra.mxu0 %v4614_v54  ;;  %v1071_v54 = vand.u32 4294901760, %v311_v21 }
  0x9c   : > { %4617 = vmatprep.subr.bf16.mxu0 %v5600_v16  ;;  %v297_v16 = vld [vmem:[%s7784_s1] sm:$0xff] }
  0x9d   : > { %v1043_v10 = vand.u32 4294901760, %v297_v16 }
  0x9e   : > { %929 = vmatmul.mubr.f32.vlgmr.msra.gmra.mrb[0].mxu0 %v5695_v7 }
  0x9f   : > { %4619 = vmatpush1.bf16.msra.mxu0 %v5615_v22  ;;  %934 = vmatprep.mubr.f32.mxu0 %v7833_v0  ;;  %v299_v22 = vld [vmem:[%s7784_s1 + $0x10] sm:$0xff]  ;;  %v5891_v53 = vsub.f32 %v297_v16, %v1043_v10  ;;  %v5960_v16 = vsub.f32 %v305_v48, %v1059_v1 }
  0xa0   : > { %4621 = vmatprep.subr.bf16.mxu0 %v5617_v23  ;;  %v302_v23 = vld [vmem:[%s7784_s1 + $0x28] sm:$0xff]  ;;  %v1047_v13 = vand.u32 4294901760, %v299_v22 }
  0xa1   : > { %v1049_v14 = vand.u32 4294901760, %v302_v23  ;;  %v1152_v29 = vand.u32 4294901760, %v5891_v53 }
  0xa2   : > { %936 = vmatmul.mubr.f32.gmra.mrb[2].mxu0 %v5755_v31  ;;  %v5893_v57 = vsub.f32 %v299_v22, %v1047_v13 }
  0xa3   : > { %4623 = vmatpush1.bf16.msra.mxu0 %v5642_v37  ;;  %1022 = vmatprep.mubr.f32.mxu0 %v7833_v0  ;;  %v306_v37 = vld [vmem:[%s7784_s1 + $0x48] sm:$0xff]  ;;  %v5895_v61 = vpack.c.bf16 %v1053_v15, %v1049_v14  ;;  %v5900_v60 = vsub.f32 %v302_v23, %v1049_v14  ;;  %v5964_v23 = vpack.c.bf16 %v1069_v20, %v1065_v27  ;;  %v7799_v20 = vand.u32 4294901760, %v5960_v16 }
  0xa4   : > { %4625 = vmatprep.subr.bf16.mxu0 %v5653_v43  ;;  %v308_v43 = vld [vmem:[%s7784_s1 + $0x58] sm:$0xff]  ;;  %v1057_v39 = vand.u32 4294901760, %v306_v37  ;;  %v1164_v35 = vand.u32 4294901760, %v5893_v57  ;;  %v1153_v59 = vsub.f32 %v5891_v53, %v1152_v29  ;;  %v5983_v14 = vsub.f32 %v1039_v19, %v5945_v52 }
  0xa5   : > { %v1061_v8 = vand.u32 4294901760, %v308_v43  ;;  %v1170_v36 = vand.u32 4294901760, %v5900_v60  ;;  %v5986_v15 = vsub.f32 %v310_v11, %v1065_v27  ;;  %v1201_v25 = vsub.f32 %v5960_v16, %v7799_v20 }
  0xa6   : > { %v5930_v24 = vsub.f32 %v306_v37, %v1057_v39  ;;  %v1165_v63 = vsub.f32 %v5893_v57, %v1164_v35  ;;  %v7801_v19 = vand.u32 4294901760, %v5983_v14 }
  0xa7   : > { %4627 = vmatpush1.bf16.msra.mxu0 %v5661_v47  ;;  %v5889_v47 = vpack.c.bf16 %v1047_v13, %v1043_v10  ;;  %v5939_v41 = vpack.c.bf16 %v1061_v8, %v1057_v39  ;;  %v5948_v46 = vsub.f32 %v308_v43, %v1061_v8  ;;  %v1171_v2 = vsub.f32 %v5900_v60, %v1170_v36 }
  0xa8   : > { %4629 = vmatprep.subr.bf16.mxu0 %v5672_v56  ;;  %v307_v56 = vld [vmem:[%s7784_s1 + $0x50] sm:$0xff]  ;;  %v1183_v10 = vsub.f32 %v5902_v5, %v1182_v51  ;;  %v1188_v13 = vand.u32 4294901760, %v5917_v3  ;;  %v1194_v49 = vand.u32 4294901760, %v5930_v24  ;;  %v1166_v39 = vand.u32 4294901760, %v1165_v63 }
  0xa9   : > { %v1063_v26 = vand.u32 4294901760, %v307_v56  ;;  %v7798_v48 = vand.u32 4294901760, %v5948_v46  ;;  %v1172_v11 = vand.u32 4294901760, %v1171_v2  ;;  %v1125_v8 = vsub.f32 %v5942_v42, %v1124_v9 }
  0xaa   : > { %v1178_v63 = vand.u32 4294901760, %v1177_v17 }
  0xab   : > { %4631 = vmatpush1.bf16.msra.mxu0 %v5685_v62  ;;  %v1067_v62 = vand.u32 4294901760, %v309_v18  ;;  %v5958_v58 = vpack.c.bf16 %v1063_v26, %v1059_v1  ;;  %v5962_v22 = vsub.f32 %v307_v56, %v1063_v26  ;;  %v1154_v56 = vand.u32 4294901760, %v1153_v59 }
  0xac   : > { %4633 = vmatprep.subr.bf16.mxu0 %v5874_v33  ;;  %v1184_v1 = vand.u32 4294901760, %v1183_v10  ;;  %v6009_v26 = vsub.f32 %v311_v21, %v1071_v54  ;;  %v1207_v55 = vsub.f32 %v5948_v46, %v7798_v48  ;;  %v7802_v59 = vand.u32 4294901760, %v5986_v15 }
  0xad   : > { %v5992_v37 = vpack.c.bf16 %v1071_v54, %v1067_v62  ;;  %v5994_v43 = vsub.f32 %v309_v18, %v1067_v62  ;;  %v1189_v18 = vsub.f32 %v5917_v3, %v1188_v13  ;;  %v7800_v62 = vand.u32 4294901760, %v5962_v22 }
  0xae   : > { %1024 = vmatmul.mubr.f32.vlgmr.msra.gmra.mrb[0].mxu0 %v5695_v7  ;;  %v1147_v7 = vsub.f32 %v5876_v34, %v1146_v4  ;;  %v7803_v21 = vand.u32 4294901760, %v5988_v28  ;;  %v4650_v54 = vpack.c.bf16 %v1166_v39, %v1154_v56  ;;  %v1126_v2 = vand.u32 4294901760, %v1125_v8 }
  0xaf   : > { %4635 = vmatpush1.bf16.msra.mxu0 %v5889_v47  ;;  %1029 = vmatprep.mubr.f32.mxu0 %v7833_v0  ;;  %v4652_v10 = vpack.c.bf16 %v1184_v1, %v1172_v11  ;;  %v1213_v48 = vsub.f32 %v5962_v22, %v7800_v62  ;;  %v1224_v56 = vand.u32 4294901760, %v5994_v43  ;;  %v1236_v39 = vand.u32 4294901760, %v6009_v26 }
  0xb0   : > { %4637 = vmatprep.subr.bf16.mxu0 %v5895_v61  ;;  %v1208_v17 = vand.u32 4294901760, %v1207_v55  ;;  %v1219_v8 = vsub.f32 %v5986_v15, %v7802_v59  ;;  %v1231_v1 = vsub.f32 %v5988_v28, %v7803_v21  ;;  %v1202_v62 = vand.u32 4294901760, %v1201_v25 }
  0xb2   : > { %1031 = vmatmul.mubr.f32.gmra.mrb[2].mxu0 %v5755_v31  ;;  %v1148_v31 = vand.u32 4294901760, %v1147_v7  ;;  %v1195_v7 = vsub.f32 %v5930_v24, %v1194_v49  ;;  %v1220_v59 = vand.u32 4294901760, %v1219_v8  ;;  %v1232_v21 = vand.u32 4294901760, %v1231_v1 }
  0xb3   : > { %4639 = vmatpush1.bf16.msra.mxu0 %v5904_v38  ;;  %1121 = vmatprep.mubr.f32.mxu0 %v7833_v0  ;;  %v4700_v8 = vpack.c.bf16 %v1182_v51, %v1170_v36  ;;  %v4518_v36 = vld [vmem:[%s7784_s1 + $0x128] sm:$0xff]  ;;  %v1758_v1 = vsel %vm336_vm1, %v5834_v44, 0 }
  0xb4   : > { %4641 = vmatprep.subr.bf16.mxu0 %v5939_v41  ;;  %v4648_v27 = vpack.c.bf16 %v1160_v30, %v1148_v31  ;;  %v1190_v31 = vand.u32 4294901760, %v1189_v18  ;;  %v1136_v30 = vsub.f32 %v5983_v14, %v7801_v19  ;;  %v1196_v11 = vand.u32 4294901760, %v1195_v7  ;;  %v4526_v44 = vld [vmem:[%s7784_s1 + $0x168] sm:$0xff] }
  0xb5   : > { %v1214_v19 = vand.u32 4294901760, %v1213_v48  ;;  %v1237_v7 = vsub.f32 %v6009_v26, %v1236_v39  ;;  %v4660_v48 = vpack.c.bf16 %v1232_v21, %v1220_v59  ;;  %v4674_v59 = vpack.c.bf16 %v5962_v22, %v5960_v16 }
  0xb6   : > { %v4654_v18 = vpack.c.bf16 %v1190_v31, %v1178_v63  ;;  %v1137_v20 = vand.u32 4294901760, %v1136_v30  ;;  %v4656_v55 = vpack.c.bf16 %v1208_v17, %v1196_v11  ;;  %v4664_v31 = vpack.c.bf16 %v5878_v32, %v5876_v34 }
  0xb7   : > { %4643 = vmatpush1.bf16.msra.mxu0 %v5958_v58  ;;  %v4658_v63 = vpack.c.bf16 %v1214_v19, %v1202_v62  ;;  %v1238_v25 = vand.u32 4294901760, %v1237_v7  ;;  %v4668_v19 = vpack.c.bf16 %v5902_v5, %v5900_v60  ;;  %v4672_v62 = vpack.c.bf16 %v5948_v46, %v5930_v24 }
  0xb8   : > { %4645 = vmatprep.subr.bf16.mxu0 %v5964_v23  ;;  %v4676_v21 = vpack.c.bf16 %v5988_v28, %v5986_v15  ;;  %v4678_v30 = vpack.c.bf16 %v6009_v26, %v5994_v43  ;;  %v4696_v11 = vpack.c.bf16 %v1158_v12, %v1146_v4  ;;  %v4698_v17 = vpack.c.bf16 %v1164_v35, %v1152_v29  ;;  %v4514_v29 = vld [vmem:[%s7784_s1 + $0x108] sm:$0xff]  ;;  %v4516_v35 = vld [vmem:[%s7784_s1 + $0x118] sm:$0xff] }
  0xb9   : > { %v4702_v34 = vpack.c.bf16 %v1188_v13, %v1176_v6  ;;  %v8038_v32 = vand.u32 4294901760, %v5948_v46  ;;  %v8040_v60 = vand.u32 4294901760, %v5960_v16  ;;  %v8041_v5 = vand.u32 4294901760, %v5962_v22  ;;  %v4517_v46 = vld [vmem:[%s7784_s1 + $0x120] sm:$0xff]  ;;  %v4519_v16 = vld [vmem:[%s7784_s1 + $0x130] sm:$0xff] }
  0xba   : > { %v8043_v4 = vand.u32 4294901760, %v5988_v28  ;;  %v4710_v24 = vpack.c.bf16 %v1236_v39, %v1224_v56  ;;  %v1766_v51 = vand.u32 4294901760, %v4516_v35  ;;  %v4522_v28 = vld [vmem:[%s7784_s1 + $0x148] sm:$0xff]  ;;  %v4523_v39 = vld [vmem:[%s7784_s1 + $0x150] sm:$0xff] }
  0xbb   : > { %4647 = vmatpush1.bf16.msra.mxu0 %v5992_v37 }
  0xbc   : > { %4649 = vmatprep.subr.bf16.mxu0 %v4648_v27  ;;  %v1225_v27 = vsub.f32 %v5994_v43, %v1224_v56  ;;  %v4524_v43 = vld [vmem:[%s7784_s1 + $0x158] sm:$0xff]  ;;  %v6162_v26 = vsub.f32 %v4516_v35, %v1766_v51  ;;  %v4521_v56 = vld [vmem:[%s7784_s1 + $0x140] sm:$0xff] }
  0xbd   : > { %v1782_v7 = vand.u32 4294901760, %v4524_v43 }
  0xbe   : > { %1127 = vmatmul.mubr.f32.vlgmr.msra.gmra.mrb[0].mxu0 %v1126_v2 }
  0xbf   : > { %4651 = vmatpush1.bf16.msra.mxu0 %v4650_v54  ;;  %1132 = vmatprep.mubr.f32.mxu0 %v7833_v0  ;;  %v1226_v54 = vand.u32 4294901760, %v1225_v27  ;;  %v1778_v27 = vand.u32 4294901760, %v4522_v28 }
  0xc0   : > { %4653 = vmatprep.subr.bf16.mxu0 %v4652_v10  ;;  %v4666_v10 = vpack.c.bf16 %v5893_v57, %v5891_v53  ;;  %v4704_v53 = vpack.c.bf16 %v8038_v32, %v1194_v49  ;;  %v8039_v57 = vand.u32 4294901760, %v5983_v14 }
  0xc1   : > { %v4662_v2 = vpack.c.bf16 %v1238_v25, %v1226_v54 }
  0xc2   : > { %1138 = vmatmul.mubr.f32.gmra.mrb[2].mxu0 %v1137_v20  ;;  %v4670_v20 = vpack.c.bf16 %v5917_v3, %v5906_v40  ;;  %v4706_v40 = vpack.c.bf16 %v8041_v5, %v8040_v60  ;;  %v8042_v3 = vand.u32 4294901760, %v5986_v15  ;;  %v1776_v15 = vand.u32 4294901760, %v4519_v16 }
  0xc3   : > { %4655 = vmatpush1.bf16.msra.mxu0 %v4654_v18  ;;  %1288 = vmatprep.mubr.f32.mxu0 %v7833_v0  ;;  %v6221_v60 = vsub.f32 %v4524_v43, %v1782_v7 }
  0xc4   : > { %4657 = vmatprep.subr.bf16.mxu0 %v4656_v55  ;;  %v4708_v12 = vpack.c.bf16 %v8043_v4, %v8042_v3 }
  0xc5   : > { %v1927_v43 = vand.u32 4294901760, %v6221_v60 }
  0xc7   : > { %4659 = vmatpush1.bf16.msra.mxu0 %v4658_v63 }
  0xc8   : > { %4661 = vmatprep.subr.bf16.mxu0 %v4660_v48 }
  0xcb   : > { %4663 = vmatpush1.bf16.msra.mxu0 %v4662_v2  ;;  %v1780_v2 = vand.u32 4294901760, %v4521_v56 }
  0xcc   : > { %4665 = vmatprep.subr.bf16.mxu0 %v4664_v31  ;;  %v1784_v31 = vand.u32 4294901760, %v4523_v39 }
  0xcd   : > { %v6231_v4 = vsub.f32 %v4521_v56, %v1780_v2 }
  0xce   : > { %1290 = vmatmul.mubr.f32.vlgmr.msra.gmra.mrb[0].mxu0 %v5922_v50  ;;  %v6223_v5 = vpack.c.bf16 %v1784_v31, %v1780_v2 }
  0xcf   : > { %4667 = vmatpush1.bf16.msra.mxu0 %v4666_v10  ;;  %1295 = vmatprep.mubr.f32.mxu0 %v7833_v0  ;;  %v6195_v10 = vand.u32 4294901760, %v1758_v1 }
  0xd0   : > { %4669 = vmatprep.subr.bf16.mxu0 %v4668_v19  ;;  %v6198_v19 = vsub.f32 %v4519_v16, %v1776_v15 }
  0xd2   : > { %1297 = vmatmul.mubr.f32.gmra.mrb[2].mxu0 %v5945_v52  ;;  %v1909_v16 = vand.u32 4294901760, %v6198_v19 }
  0xd3   : > { %4671 = vmatpush1.bf16.msra.mxu0 %v4670_v20  ;;  %1399 = vmatprep.mubr.f32.mxu0 %v7833_v0 }
  0xd4   : > { %4673 = vmatprep.subr.bf16.mxu0 %v4672_v62  ;;  %v1879_v62 = vand.u32 4294901760, %v6162_v26 }
  0xd7   : > { %4675 = vmatpush1.bf16.msra.mxu0 %v4674_v59  ;;  %v8044_v59 = vrot.slane %v5657_v45, 2 }
  0xd8   : > { %4677 = vmatprep.subr.bf16.mxu0 %v4676_v21 }
  0xd9   : > { %v1760_v21 = vsel %vm336_vm1, %v8044_v59, 0 }
  0xda   : > { %v6228_v3 = vand.u32 4294901760, %v1760_v21 }
  0xdb   : > { %4679 = vmatpush1.bf16.msra.mxu0 %v4678_v30  ;;  %v6206_v30 = vpack.c.bf16 %v1782_v7, %v1778_v27 }
  0xdc   : > { %4681 = vmatprep.subr.bf16.mxu0 %v5874_v33 }
  0xde   : > { %1402 = vmatmul.mubr.f32.vlgmr.msra.gmra.mrb[0].mxu0 %v5942_v42  ;;  %v1762_v42 = vand.u32 4294901760, %v4514_v29 }
  0xdf   : > { %4683 = vmatpush1.bf16.msra.mxu0 %v5889_v47  ;;  %1407 = vmatprep.mubr.f32.mxu0 %v7833_v0 }
  0xe0   : > { %4685 = vmatprep.subr.bf16.mxu0 %v5895_v61  ;;  %v6157_v49 = vpack.c.bf16 %v1766_v51, %v1762_v42 }
  0xe2   : > { %1410 = vmatmul.mubr.f32.gmra.mrb[2].mxu0 %v5983_v14  ;;  %v1772_v14 = vand.u32 4294901760, %v4517_v46 }
  0xe3   : > { %4687 = vmatpush1.bf16.msra.mxu0 %v5904_v38  ;;  %1496 = vmatprep.mubr.f32.mxu0 %v7833_v0 }
  0xe4   : > { %4689 = vmatprep.subr.bf16.mxu0 %v5939_v41  ;;  %v6185_v25 = vpack.c.bf16 %v1776_v15, %v1772_v14  ;;  %v6193_v48 = vsub.f32 %v4517_v46, %v1772_v14 }
  0xe6   : > { %v1897_v46 = vand.u32 4294901760, %v6193_v48 }
  0xe7   : > { %4691 = vmatpush1.bf16.msra.mxu0 %v5958_v58 }
  0xe8   : > { %4693 = vmatprep.subr.bf16.mxu0 %v5964_v23 }
  0xeb   : > { %4695 = vmatpush1.bf16.msra.mxu0 %v5992_v37 }
  0xec   : > { %4697 = vmatprep.subr.bf16.mxu0 %v4696_v11  ;;  %v6208_v11 = vsub.f32 %v4522_v28, %v1778_v27 }
  0xee   : > { %1500 = vmatmul.mubr.f32.vlgmr.msra.gmra.mrb[0].mxu0 %v1124_v9  ;;  %v1770_v9 = vand.u32 4294901760, %v4518_v36  ;;  %v1915_v28 = vand.u32 4294901760, %v6208_v11 }
  0xef   : > { %4699 = vmatpush1.bf16.msra.mxu0 %v4698_v17  ;;  %1505 = vmatprep.mubr.f32.mxu0 %v7833_v0  ;;  %v1786_v17 = vand.u32 4294901760, %v4526_v44 }
  0xf0   : > { %4701 = vmatprep.subr.bf16.mxu0 %v4700_v8  ;;  %v6181_v63 = vsub.f32 %v4518_v36, %v1770_v9 }
  0xf2   : > { %1509 = vmatmul.mubr.f32.gmra.mrb[2].mxu0 %v8039_v57 }
  0xf3   : > { %4703 = vmatpush1.bf16.msra.mxu0 %v4702_v34  ;;  %1627 = vmatprep.mubr.f32.mxu0 %v7833_v0  ;;  %v4527_v34 = vld [vmem:[%s7784_s1 + $0x170] sm:$0xff] }
  0xf4   : > { %4705 = vmatprep.subr.bf16.mxu0 %v4704_v53  ;;  %v1891_v53 = vand.u32 4294901760, %v6181_v63 }
  0xf7   : > { %4707 = vmatpush1.bf16.msra.mxu0 %v4706_v40  ;;  %v6226_v40 = vsub.f32 %v1758_v1, %v6195_v10 }
  0xf8   : > { %4709 = vmatprep.subr.bf16.mxu0 %v4708_v12 }
  0xfb   : > { %4711 = vmatpush1.bf16.msra.mxu0 %v4710_v24  ;;  %v6241_v24 = vsub.f32 %v4523_v39, %v1784_v31 }
  0xfc   : > { %4713 = vmatprep.subr.bf16.mxu0 %v5874_v33  ;;  %v4513_v33 = vld [vmem:[%s7784_s1 + $0x100] sm:$0xff] }
  0xfd   : > { %v1764_v22 = vand.u32 4294901760, %v4513_v33 }
  0xfe   : > { %1629 = vmatmul.mubr.f32.vlgmr.msra.gmra.mrb[0].mxu0 %v5922_v50 }
  0xff   : > { %4715 = vmatpush1.bf16.msra.mxu0 %v5889_v47  ;;  %1634 = vmatprep.mubr.f32.mxu0 %v7833_v0  ;;  %v4515_v47 = vld [vmem:[%s7784_s1 + $0x110] sm:$0xff] }
 0x100   : > { %4717 = vmatprep.subr.bf16.mxu0 %v5895_v61  ;;  %v4520_v61 = vld [vmem:[%s7784_s1 + $0x138] sm:$0xff]  ;;  %v1768_v6 = vand.u32 4294901760, %v4515_v47 }
 0x101   : > { %v1774_v13 = vand.u32 4294901760, %v4520_v61 }
 0x102   : > { %1636 = vmatmul.mubr.f32.gmra.mrb[2].mxu0 %v5945_v52  ;;  %v6177_v18 = vsub.f32 %v4515_v47, %v1768_v6 }
 0x103   : > { %4719 = vmatpush1.bf16.msra.mxu0 %v5904_v38  ;;  %1722 = vmatprep.mubr.f32.mxu0 %v7833_v0  ;;  %v6160_v38 = vsub.f32 %v4514_v29, %v1762_v42  ;;  %v6179_v55 = vpack.c.bf16 %v1774_v13, %v1770_v9  ;;  %v6183_v54 = vsub.f32 %v4520_v61, %v1774_v13  ;;  %v1845_v61 = vand.u32 4294901760, %v6226_v40 }
 0x104   : > { %4721 = vmatprep.subr.bf16.mxu0 %v5939_v41  ;;  %v6164_v41 = vpack.c.bf16 %v1768_v6, %v1764_v22  ;;  %v1885_v32 = vand.u32 4294901760, %v6177_v18  ;;  %v1892_v42 = vsub.f32 %v6181_v63, %v1891_v53  ;;  %v6265_v6 = vsub.f32 %v4526_v44, %v1786_v17 }
 0x105   : > { %v1867_v20 = vand.u32 4294901760, %v6160_v38  ;;  %v1903_v57 = vand.u32 4294901760, %v6183_v54  ;;  %v1846_v7 = vsub.f32 %v6226_v40, %v1845_v61  ;;  %v1898_v44 = vsub.f32 %v6193_v48, %v1897_v46 }
 0x106   : > { %v1886_v36 = vsub.f32 %v6177_v18, %v1885_v32  ;;  %v1893_v1 = vand.u32 4294901760, %v1892_v42 }
 0x107   : > { %4723 = vmatpush1.bf16.msra.mxu0 %v5958_v58  ;;  %v6175_v58 = vsub.f32 %v4513_v33, %v1764_v22  ;;  %v1868_v12 = vsub.f32 %v6160_v38, %v1867_v20  ;;  %v1792_v33 = vand.u32 4294901760, %v4527_v34  ;;  %v1904_v51 = vsub.f32 %v6183_v54, %v1903_v57 }
 0x108   : > { %4725 = vmatprep.subr.bf16.mxu0 %v5964_v23  ;;  %v4528_v23 = vld [vmem:[%s7784_s1 + $0x178] sm:$0xff]  ;;  %v6262_v22 = vsub.f32 %v1760_v21, %v6228_v3  ;;  %v1887_v39 = vand.u32 4294901760, %v1886_v36  ;;  %v7805_v21 = vand.u32 4294901760, %v6231_v4 }
 0x109   : > { %v1790_v8 = vand.u32 4294901760, %v4528_v23  ;;  %v1873_v45 = vand.u32 4294901760, %v6175_v58  ;;  %v1869_v13 = vand.u32 4294901760, %v1868_v12  ;;  %v1905_v27 = vand.u32 4294901760, %v1904_v51 }
 0x10a   : > { %v1856_v2 = vand.u32 4294901760, %v6262_v22  ;;  %v6288_v31 = vsub.f32 %v4527_v34, %v1792_v33  ;;  %v7806_v12 = vand.u32 4294901760, %v6265_v6  ;;  %v1922_v51 = vsub.f32 %v6231_v4, %v7805_v21 }
 0x10b   : > { %4727 = vmatpush1.bf16.msra.mxu0 %v5992_v37  ;;  %v4525_v37 = vld [vmem:[%s7784_s1 + $0x160] sm:$0xff]  ;;  %v6243_v29 = vpack.c.bf16 %v1790_v8, %v1786_v17  ;;  %v1874_v47 = vsub.f32 %v6175_v58, %v1873_v45  ;;  %v6267_v9 = vsub.f32 %v4528_v23, %v1790_v8  ;;  %v1910_v23 = vsub.f32 %v6198_v19, %v1909_v16 }
 0x10c   : > { %4729 = vmatprep.subr.bf16.mxu0 %v6157_v49  ;;  %v1788_v35 = vand.u32 4294901760, %v4525_v37  ;;  %v7804_v17 = vand.u32 4294901760, %v6241_v24  ;;  %v1916_v8 = vsub.f32 %v6208_v11, %v1915_v28  ;;  %v1857_v42 = vsub.f32 %v6262_v22, %v1856_v2 }
 0x10d   : > { %v1875_v56 = vand.u32 4294901760, %v1874_v47  ;;  %v7807_v34 = vand.u32 4294901760, %v6267_v9  ;;  %v1899_v47 = vand.u32 4294901760, %v1898_v44  ;;  %v1911_v36 = vand.u32 4294901760, %v1910_v23 }
 0x10e   : > { %1724 = vmatmul.mubr.f32.vlgmr.msra.gmra.mrb[0].mxu0 %v5922_v50  ;;  %v1880_v50 = vsub.f32 %v6162_v26, %v1879_v62  ;;  %v6273_v15 = vsub.f32 %v4525_v37, %v1788_v35  ;;  %v1928_v37 = vsub.f32 %v6221_v60, %v1927_v43  ;;  %v1858_v23 = vand.u32 4294901760, %v1857_v42 }
 0x10f   : > { %4731 = vmatpush1.bf16.msra.mxu0 %v6164_v41  ;;  %1729 = vmatprep.mubr.f32.mxu0 %v7833_v0  ;;  %v4750_v44 = vpack.c.bf16 %v1911_v36, %v1899_v47 }
 0x110   : > { %4733 = vmatprep.subr.bf16.mxu0 %v6179_v55  ;;  %v1881_v14 = vand.u32 4294901760, %v1880_v50  ;;  %v4746_v50 = vpack.c.bf16 %v1887_v39, %v1875_v56  ;;  %v1957_v56 = vand.u32 4294901760, %v6288_v31  ;;  %v1917_v39 = vand.u32 4294901760, %v1916_v8 }
 0x112   : > { %1731 = vmatmul.mubr.f32.gmra.mrb[2].mxu0 %v5945_v52  ;;  %v6271_v52 = vpack.c.bf16 %v1792_v33, %v1788_v35  ;;  %v4744_v59 = vpack.c.bf16 %v1881_v14, %v1869_v13  ;;  %v4748_v35 = vpack.c.bf16 %v1905_v27, %v1893_v1  ;;  %v1847_v33 = vand.u32 4294901760, %v1846_v7 }
 0x113   : > { %4735 = vmatpush1.bf16.msra.mxu0 %v6185_v25  ;;  %1842 = vmatprep.mubr.f32.mxu0 %v7833_v0  ;;  %v1934_v13 = vsub.f32 %v6241_v24, %v7804_v17  ;;  %v1945_v14 = vand.u32 4294901760, %v6273_v15  ;;  %v1929_v1 = vand.u32 4294901760, %v1928_v37  ;;  %v1940_v27 = vsub.f32 %v6265_v6, %v7806_v12 }
 0x114   : > { %4737 = vmatprep.subr.bf16.mxu0 %v6206_v30  ;;  %v1952_v7 = vsub.f32 %v6267_v9, %v7807_v34  ;;  %v1923_v17 = vand.u32 4294901760, %v1922_v51  ;;  %v1958_v8 = vsub.f32 %v6288_v31, %v1957_v56  ;;  %v4760_v51 = vpack.c.bf16 %v6162_v26, %v6160_v38 }
 0x115   : > { %v1935_v21 = vand.u32 4294901760, %v1934_v13  ;;  %v4752_v37 = vpack.c.bf16 %v1929_v1, %v1917_v39  ;;  %v1941_v12 = vand.u32 4294901760, %v1940_v27  ;;  %v4772_v13 = vpack.c.bf16 %v6267_v9, %v6265_v6 }
 0x116   : > { %v1953_v34 = vand.u32 4294901760, %v1952_v7  ;;  %v1959_v47 = vand.u32 4294901760, %v1958_v8  ;;  %v4774_v39 = vpack.c.bf16 %v6288_v31, %v6273_v15  ;;  %v4792_v1 = vpack.c.bf16 %v1879_v62, %v1867_v20  ;;  %v6419_v62 = vld [vmem:[#allocation2] sm:$0xff]  ;;  %v6485_v8 = vld [vmem:[#allocation2 + $0x48] sm:$0xff] }
 0x117   : > { %4739 = vmatpush1.bf16.msra.mxu0 %v6223_v5  ;;  %v4794_v27 = vpack.c.bf16 %v1885_v32, %v1873_v45  ;;  %v4796_v7 = vpack.c.bf16 %v1903_v57, %v1891_v53  ;;  %v4798_v38 = vpack.c.bf16 %v1909_v16, %v1897_v46  ;;  %v4800_v26 = vpack.c.bf16 %v1927_v43, %v1915_v28 }
 0x118   : > { %4741 = vmatprep.subr.bf16.mxu0 %v6243_v29  ;;  %v4756_v36 = vpack.c.bf16 %v1953_v34, %v1941_v12  ;;  %v4768_v12 = vpack.c.bf16 %v6221_v60, %v6208_v11  ;;  %v4770_v34 = vpack.c.bf16 %v6241_v24, %v6231_v4  ;;  %v4806_v20 = vpack.c.bf16 %v1957_v56, %v1945_v14  ;;  %v6445_v60 = vld [vmem:[#allocation2 + $0x28] sm:$0xff] }
 0x11b   : > { %4743 = vmatpush1.bf16.msra.mxu0 %v6271_v52 }
 0x11c   : > { %4745 = vmatprep.subr.bf16.mxu0 %v4744_v59  ;;  %v1946_v59 = vsub.f32 %v6273_v15, %v1945_v14 }
 0x11e   : > { %1848 = vmatmul.mubr.f32.vlgmr.msra.gmra.mrb[0].mxu0 %v1847_v33  ;;  %v4754_v33 = vpack.c.bf16 %v1935_v21, %v1923_v17  ;;  %v4764_v21 = vpack.c.bf16 %v6183_v54, %v6181_v63  ;;  %v4766_v17 = vpack.c.bf16 %v6198_v19, %v6193_v48  ;;  %v8047_v54 = vand.u32 4294901760, %v6265_v6 }
 0x11f   : > { %4747 = vmatpush1.bf16.msra.mxu0 %v4746_v50  ;;  %1853 = vmatprep.mubr.f32.mxu0 %v7833_v0  ;;  %v1947_v50 = vand.u32 4294901760, %v1946_v59  ;;  %v8048_v48 = vand.u32 4294901760, %v6267_v9 }
 0x120   : > { %4749 = vmatprep.subr.bf16.mxu0 %v4748_v35  ;;  %v4762_v35 = vpack.c.bf16 %v6177_v18, %v6175_v58  ;;  %v8045_v58 = vand.u32 4294901760, %v6231_v4  ;;  %v8046_v18 = vand.u32 4294901760, %v6241_v24  ;;  %v2532_v4 = vand.u32 4294901760, %v6445_v60  ;;  %v6452_v24 = vld [vmem:[#allocation2 + $0x20] sm:$0xff] }
 0x121   : > { %v4758_v42 = vpack.c.bf16 %v1959_v47, %v1947_v50  ;;  %v4804_v19 = vpack.c.bf16 %v8048_v48, %v8047_v54 }
 0x122   : > { %1859 = vmatmul.mubr.f32.gmra.mrb[2].mxu0 %v1858_v23  ;;  %v4802_v63 = vpack.c.bf16 %v8046_v18, %v8045_v58  ;;  %v6468_v9 = vsub.f32 %v6445_v60, %v2532_v4 }
 0x123   : > { %4751 = vmatpush1.bf16.msra.mxu0 %v4750_v44  ;;  %2009 = vmatprep.mubr.f32.mxu0 %v7833_v0 }
 0x124   : > { %4753 = vmatprep.subr.bf16.mxu0 %v4752_v37  ;;  %v7825_v56 = vand.u32 4294901760, %v6468_v9  ;;  %v6487_v37 = vld [vmem:[#allocation2 + $0x58] sm:$0xff] }
 0x126   : > { %v2670_v50 = vsub.f32 %v6468_v9, %v7825_v56 }
 0x127   : > { %4755 = vmatpush1.bf16.msra.mxu0 %v4754_v33 }
 0x128   : > { %4757 = vmatprep.subr.bf16.mxu0 %v4756_v36  ;;  %v6497_v36 = vld [vmem:[#allocation2 + $0x40] sm:$0xff] }
 0x12b   : > { %4759 = vmatpush1.bf16.msra.mxu0 %v4758_v42  ;;  %v6499_v42 = vld [vmem:[#allocation2 + $0x50] sm:$0xff] }
 0x12c   : > { %4761 = vmatprep.subr.bf16.mxu0 %v4760_v51 }
 0x12e   : > { %2011 = vmatmul.mubr.f32.vlgmr.msra.gmra.mrb[0].mxu0 %v6195_v10 }
 0x12f   : > { %4763 = vmatpush1.bf16.msra.mxu0 %v4762_v35  ;;  %2016 = vmatprep.mubr.f32.mxu0 %v7833_v0 }
 0x130   : > { %4765 = vmatprep.subr.bf16.mxu0 %v4764_v21 }
 0x132   : > { %2018 = vmatmul.mubr.f32.gmra.mrb[2].mxu0 %v6228_v3 }
 0x133   : > { %4767 = vmatpush1.bf16.msra.mxu0 %v4766_v17  ;;  %2120 = vmatprep.mubr.f32.mxu0 %v7833_v0  ;;  %v6509_v17 = vld [vmem:[#allocation2 + $0x68] sm:$0xff] }
 0x134   : > { %4769 = vmatprep.subr.bf16.mxu0 %v4768_v12  ;;  %v2671_v12 = vand.u32 4294901760, %v2670_v50  ;;  %v2548_v54 = vand.u32 4294901760, %v6509_v17 }
 0x137   : > { %4771 = vmatpush1.bf16.msra.mxu0 %v4770_v34 }
 0x138   : > { %4773 = vmatprep.subr.bf16.mxu0 %v4772_v13  ;;  %v2540_v13 = vand.u32 4294901760, %v6485_v8 }
 0x13a   : > { %v6525_v18 = vsub.f32 %v6485_v8, %v2540_v13 }
 0x13b   : > { %4775 = vmatpush1.bf16.msra.mxu0 %v4774_v39  ;;  %v2544_v39 = vand.u32 4294901760, %v6487_v37 }
 0x13c   : > { %4777 = vmatprep.subr.bf16.mxu0 %v6157_v49 }
 0x13e   : > { %2123 = vmatmul.mubr.f32.vlgmr.msra.gmra.mrb[0].mxu0 %v6226_v40 }
 0x13f   : > { %4779 = vmatpush1.bf16.msra.mxu0 %v6164_v41  ;;  %2128 = vmatprep.mubr.f32.mxu0 %v7833_v0 }
 0x140   : > { %4781 = vmatprep.subr.bf16.mxu0 %v6179_v55 }
 0x142   : > { %2131 = vmatmul.mubr.f32.gmra.mrb[2].mxu0 %v6262_v22 }
 0x143   : > { %4783 = vmatpush1.bf16.msra.mxu0 %v6185_v25  ;;  %2217 = vmatprep.mubr.f32.mxu0 %v7833_v0 }
 0x144   : > { %4785 = vmatprep.subr.bf16.mxu0 %v6206_v30 }
 0x147   : > { %4787 = vmatpush1.bf16.msra.mxu0 %v6223_v5 }
 0x148   : > { %4789 = vmatprep.subr.bf16.mxu0 %v6243_v29 }
 0x14b   : > { %4791 = vmatpush1.bf16.msra.mxu0 %v6271_v52 }
 0x14c   : > { %4793 = vmatprep.subr.bf16.mxu0 %v4792_v1 }
 0x14e   : > { %2221 = vmatmul.mubr.f32.vlgmr.msra.gmra.mrb[0].mxu0 %v1845_v61 }
 0x14f   : > { %4795 = vmatpush1.bf16.msra.mxu0 %v4794_v27  ;;  %2226 = vmatprep.mubr.f32.mxu0 %v7833_v0 }
 0x150   : > { %4797 = vmatprep.subr.bf16.mxu0 %v4796_v7  ;;  %v2542_v7 = vand.u32 4294901760, %v6497_v36 }
 0x152   : > { %2230 = vmatmul.mubr.f32.gmra.mrb[2].mxu0 %v1856_v2 }
 0x153   : > { %4799 = vmatpush1.bf16.msra.mxu0 %v4798_v38  ;;  %2348 = vmatprep.mubr.f32.mxu0 %v7833_v0  ;;  %v2546_v38 = vand.u32 4294901760, %v6499_v42 }
 0x154   : > { %4801 = vmatprep.subr.bf16.mxu0 %v4800_v26  ;;  %v6517_v26 = vld [vmem:[#allocation2 + $0x78] sm:$0xff] }
 0x157   : > { %4803 = vmatpush1.bf16.msra.mxu0 %v4802_v63  ;;  %v6530_v63 = vsub.f32 %v6487_v37, %v2544_v39  ;;  %v6661_v37 = vpack.c.bf16 %v2546_v38, %v2542_v7 }
 0x158   : > { %4805 = vmatprep.subr.bf16.mxu0 %v4804_v19 }
 0x159   : > { %8056 = vst [vmem:[#allocation15_spill] sm:$0xff] %v6661_v37 }
 0x15b   : > { %4807 = vmatpush1.bf16.msra.mxu0 %v4806_v20  ;;  %v6539_v20 = vsub.f32 %v6497_v36, %v2542_v7 }
 0x15c   : > { %4809 = vmatprep.subr.bf16.mxu0 %v6157_v49  ;;  %v6413_v49 = vld [vmem:[#allocation2 + $0x8] sm:$0xff] }
 0x15e   : > { %2350 = vmatmul.mubr.f32.vlgmr.msra.gmra.mrb[0].mxu0 %v6195_v10 }
 0x15f   : > { %4811 = vmatpush1.bf16.msra.mxu0 %v6164_v41  ;;  %2355 = vmatprep.mubr.f32.mxu0 %v7833_v0  ;;  %v6415_v41 = vld [vmem:[#allocation2 + $0x18] sm:$0xff] }
 0x160   : > { %4813 = vmatprep.subr.bf16.mxu0 %v6179_v55  ;;  %v2524_v55 = vand.u32 4294901760, %v6413_v49 }
 0x162   : > { %2357 = vmatmul.mubr.f32.gmra.mrb[2].mxu0 %v6228_v3  ;;  %v6428_v45 = vsub.f32 %v6413_v49, %v2524_v55  ;;  %v6575_v49 = vld [vmem:[#allocation2 + $0x70] sm:$0xff] }
 0x163   : > { %4815 = vmatpush1.bf16.msra.mxu0 %v6185_v25  ;;  %2443 = vmatprep.mubr.f32.mxu0 %v7833_v0  ;;  %v2528_v25 = vand.u32 4294901760, %v6415_v41 }
 0x164   : > { %4817 = vmatprep.subr.bf16.mxu0 %v6206_v30  ;;  %v6421_v30 = vld [vmem:[#allocation2 + $0x10] sm:$0xff]  ;;  %8049 = vst [vmem:[#allocation8_spill] sm:$0xff] %v6428_v45  ;;  %v7831_v40 = vand.u32 4294901760, %v6428_v45 }
 0x165   : > { %v2530_v11 = vand.u32 4294901760, %v6421_v30  ;;  %v6433_v32 = vsub.f32 %v6415_v41, %v2528_v25  ;;  %v6560_v50 = vpack.c.bf16 %v2528_v25, %v2524_v55 }
 0x166   : > { %v2646_v22 = vsub.f32 %v6428_v45, %v7831_v40 }
 0x167   : > { %4819 = vmatpush1.bf16.msra.mxu0 %v6223_v5  ;;  %8050 = vst [vmem:[#allocation9_spill] sm:$0xff] %v6433_v32  ;;  %v6443_v57 = vsub.f32 %v6421_v30, %v2530_v11  ;;  %v6447_v5 = vld [vmem:[#allocation2 + $0x38] sm:$0xff]  ;;  %8051 = vst [vmem:[#allocation10_spill] sm:$0xff] %v6560_v50 }
 0x168   : > { %4821 = vmatprep.subr.bf16.mxu0 %v6243_v29  ;;  %v6454_v29 = vld [vmem:[#allocation2 + $0x30] sm:$0xff]  ;;  %v2536_v16 = vand.u32 4294901760, %v6447_v5  ;;  %v2647_v31 = vand.u32 4294901760, %v2646_v22  ;;  %v6544_v22 = vsub.f32 %v6499_v42, %v2546_v38 }
 0x169   : > { %v7826_v46 = vand.u32 4294901760, %v6443_v57  ;;  %v2538_v2 = vand.u32 4294901760, %v6454_v29 }
 0x16a   : > { %v6480_v43 = vsub.f32 %v6447_v5, %v2536_v16 }
 0x16b   : > { %4823 = vmatpush1.bf16.msra.mxu0 %v6271_v52  ;;  %v2534_v52 = vand.u32 4294901760, %v6452_v24  ;;  %v2664_v28 = vsub.f32 %v6443_v57, %v7826_v46  ;;  %v6507_v21 = vsub.f32 %v6454_v29, %v2538_v2 }
 0x16c   : > { %v7824_v59 = vand.u32 4294901760, %v6480_v43  ;;  %4825 = vmatprep.subr.bf16.mxu0 %v6560_v50 }
 0x16d   : > { %v2665_v23 = vand.u32 4294901760, %v2664_v28  ;;  %v6495_v47 = vsub.f32 %v6452_v24, %v2534_v52  ;;  %v7822_v27 = vand.u32 4294901760, %v6507_v21  ;;  %v7810_v28 = vand.u32 4294901760, %v6530_v63 }
 0x16e   : > { %2445 = vmatmul.mubr.f32.vlgmr.msra.gmra.mrb[0].mxu0 %v6195_v10  ;;  %v2526_v10 = vand.u32 4294901760, %v6419_v62  ;;  %v2682_v35 = vsub.f32 %v6480_v43, %v7824_v59  ;;  %v6619_v60 = vpack.c.bf16 %v2538_v2, %v2534_v52 }
 0x16f   : > { %2450 = vmatprep.mubr.f32.mxu0 %v7833_v0  ;;  %v7823_v34 = vand.u32 4294901760, %v6495_v47  ;;  %v2688_v19 = vsub.f32 %v6507_v21, %v7822_v27 }
 0x170   : > { %v6438_v53 = vsub.f32 %v6419_v62, %v2526_v10  ;;  %v2683_v1 = vand.u32 4294901760, %v2682_v35  ;;  %v2706_v35 = vsub.f32 %v6530_v63, %v7810_v28  ;;  %v6581_v55 = vpack.c.bf16 %v2530_v11, %v2526_v10  ;;  %8054 = vst [vmem:[#allocation13_spill] sm:$0xff] %v6619_v60 }
 0x171   : > { %v2676_v58 = vsub.f32 %v6495_v47, %v7823_v34 }
 0x172   : > { %2452 = vmatmul.mubr.f32.gmra.mrb[2].mxu0 %v6228_v3  ;;  %v7830_v3 = vand.u32 4294901760, %v6433_v32  ;;  %v7829_v61 = vand.u32 4294901760, %v6438_v53  ;;  %v4860_v48 = vpack.c.bf16 %v2683_v1, %v2671_v12  ;;  %v6573_v1 = vld [vmem:[#allocation2 + $0x60] sm:$0xff]  ;;  %8052 = vst [vmem:[#allocation11_spill] sm:$0xff] %v6581_v55 }
 0x173   : > { %2620 = vmatprep.mubr.f32.mxu0 %v7833_v0  ;;  %4827 = vmatpush1.bf16.msra.mxu0 %v6581_v55  ;;  %v2550_v11 = vand.u32 4294901760, %v6573_v1 }
 0x174   : > { %v2658_v6 = vsub.f32 %v6433_v32, %v7830_v3  ;;  %v2652_v15 = vsub.f32 %v6438_v53, %v7829_v61  ;;  %v2520_v61 = vld [vmem:[#allocation2 + $0xe0] sm:$0xff] }
 0x175   : > { %v6622_v5 = vsub.f32 %v6573_v1, %v2550_v11 }
 0x176   : > { %v2659_v14 = vand.u32 4294901760, %v2658_v6  ;;  %v2653_v44 = vand.u32 4294901760, %v2652_v15  ;;  %v2677_v6 = vand.u32 4294901760, %v2676_v58  ;;  %v7811_v15 = vand.u32 4294901760, %v6525_v18 }
 0x177   : > { %v7815_v24 = vand.u32 4294901760, %v6622_v5 }
 0x178   : > { %v4856_v33 = vpack.c.bf16 %v2659_v14, %v2647_v31  ;;  %v4858_v51 = vpack.c.bf16 %v2665_v23, %v2653_v44  ;;  %v2552_v31 = vand.u32 4294901760, %v6517_v26  ;;  %v2689_v14 = vand.u32 4294901760, %v2688_v19 }
 0x179   : > { %v7808_v44 = vand.u32 4294901760, %v6539_v20  ;;  %v7809_v23 = vand.u32 4294901760, %v6544_v22  ;;  %v2707_v19 = vand.u32 4294901760, %v2706_v35 }
 0x17a   : > { %4857 = vmatprep.subr.bf16.mxu1 %v4856_v33  ;;  %v6554_v33 = vsub.f32 %v6509_v17, %v2548_v54  ;;  %v6571_v12 = vsub.f32 %v6517_v26, %v2552_v31  ;;  %v4862_v41 = vpack.c.bf16 %v2689_v14, %v2677_v6  ;;  %v2554_v14 = vand.u32 4294901760, %v6575_v49 }
 0x17b   : > { %4859 = vmatpush1.bf16.msra.mxu1 %v4858_v51  ;;  %v2694_v51 = vsub.f32 %v6525_v18, %v7811_v15  ;;  %v2700_v25 = vsub.f32 %v6539_v20, %v7808_v44  ;;  %v2712_v58 = vsub.f32 %v6544_v22, %v7809_v23  ;;  %v6595_v44 = vld [vmem:[#allocation2 + $0x88] sm:$0xff]  ;;  %v6597_v23 = vld [vmem:[#allocation2 + $0x98] sm:$0xff] }
 0x17c   : > { %4861 = vmatprep.subr.bf16.mxu1 %v4860_v48  ;;  %v7820_v6 = vand.u32 4294901760, %v6554_v33  ;;  %v7816_v62 = vand.u32 4294901760, %v6571_v12 }
 0x17d   : > { %v2695_v48 = vand.u32 4294901760, %v2694_v51  ;;  %v2701_v30 = vand.u32 4294901760, %v2700_v25  ;;  %v2713_v10 = vand.u32 4294901760, %v2712_v58  ;;  %v6603_v51 = vpack.c.bf16 %v2536_v16, %v2532_v4  ;;  %v6611_v25 = vld [vmem:[#allocation2 + $0x80] sm:$0xff]  ;;  %v6613_v58 = vld [vmem:[#allocation2 + $0x90] sm:$0xff] }
 0x17e   : > { %v2718_v35 = vsub.f32 %v6554_v33, %v7820_v6  ;;  %v6625_v4 = vsub.f32 %v6575_v49, %v2554_v14  ;;  %v2558_v52 = vand.u32 4294901760, %v6611_v25  ;;  %v2562_v2 = vand.u32 4294901760, %v6613_v58 }
 0x17f   : > { %4863 = vmatpush1.bf16.msra.mxu1 %v4862_v41  ;;  %v4864_v28 = vpack.c.bf16 %v2707_v19, %v2695_v48  ;;  %8053 = vst [vmem:[#allocation12_spill] sm:$0xff] %v6603_v51  ;;  %v2730_v41 = vsub.f32 %v6571_v12, %v7816_v62  ;;  %v4866_v15 = vpack.c.bf16 %v2713_v10, %v2701_v30  ;;  %v2556_v19 = vand.u32 4294901760, %v6595_v44 }
 0x180   : > { %4829 = vmatprep.subr.bf16.mxu0 %v6603_v51  ;;  %v2719_v16 = vand.u32 4294901760, %v2718_v35  ;;  %v2560_v30 = vand.u32 4294901760, %v6597_v23  ;;  %v7812_v29 = vand.u32 4294901760, %v6625_v4  ;;  %v6641_v49 = vpack.c.bf16 %v2544_v39, %v2540_v13  ;;  %v6649_v35 = vld [vmem:[#allocation2 + $0xb8] sm:$0xff] }
 0x181   : > { %4865 = vmatprep.subr.bf16.mxu1 %v4864_v28  ;;  %v2731_v48 = vand.u32 4294901760, %v2730_v41  ;;  %4831 = vmatpush1.bf16.msra.mxu0 %v6619_v60  ;;  %v6635_v28 = vld [vmem:[#allocation2 + $0xa8] sm:$0xff]  ;;  %v2724_v41 = vsub.f32 %v6622_v5, %v7815_v24  ;;  %v6664_v13 = vsub.f32 %v6611_v25, %v2558_v52  ;;  %v2568_v7 = vand.u32 4294901760, %v6649_v35  ;;  %v6700_v24 = vld [vmem:[#allocation2 + $0xb0] sm:$0xff] }
 0x182   : > { %8055 = vst [vmem:[#allocation14_spill] sm:$0xff] %v6641_v49  ;;  %v6647_v10 = vsub.f32 %v6597_v23, %v2560_v30  ;;  %v2736_v8 = vsub.f32 %v6625_v4, %v7812_v29  ;;  %4833 = vmatprep.subr.bf16.mxu0 %v6641_v49  ;;  %v6670_v23 = vsub.f32 %v6613_v58, %v2562_v2 }
 0x183   : > { %4867 = vmatpush1.bf16.msra.mxu1 %v4866_v15  ;;  %v4868_v1 = vpack.c.bf16 %v2731_v48, %v2719_v16  ;;  %v6644_v15 = vsub.f32 %v6595_v44, %v2556_v19  ;;  %v2564_v16 = vand.u32 4294901760, %v6635_v28  ;;  %v2725_v36 = vand.u32 4294901760, %v2724_v41  ;;  %v6689_v41 = vld [vmem:[#allocation2 + $0xa0] sm:$0xff] }
 0x184   : > { %v7814_v44 = vand.u32 4294901760, %v6647_v10  ;;  %v2737_v48 = vand.u32 4294901760, %v2736_v8  ;;  %v7817_v42 = vand.u32 4294901760, %v6664_v13  ;;  %v7818_v58 = vand.u32 4294901760, %v6670_v23 }
 0x185   : > { %4869 = vmatprep.subr.bf16.mxu1 %v4868_v1  ;;  %v7813_v39 = vand.u32 4294901760, %v6644_v15  ;;  %4835 = vmatpush1.bf16.msra.mxu0 %v6661_v37  ;;  %v6687_v1 = vpack.c.bf16 %v2552_v31, %v2548_v54  ;;  %v6706_v54 = vpack.c.bf16 %v2554_v14, %v2550_v11  ;;  %v6708_v31 = vld [vmem:[#allocation2 + $0xc8] sm:$0xff]  ;;  %v6717_v11 = vpack.c.bf16 %v2560_v30, %v2556_v19  ;;  %v6952_v37 = vld [vmem:[#allocation4 + $0xc0] sm:$0xff] }
 0x186   : > { %v2754_v25 = vsub.f32 %v6647_v10, %v7814_v44  ;;  %v4870_v8 = vpack.c.bf16 %v2737_v48, %v2725_v36  ;;  %v2748_v29 = vsub.f32 %v6664_v13, %v7817_v42  ;;  %v6698_v44 = vsub.f32 %v6649_v35, %v2568_v7  ;;  %8080 = vst [vmem:[#allocation39_spill] sm:$0xff] %v6952_v37 }
 0x187   : > { %v2742_v38 = vsub.f32 %v6644_v15, %v7813_v39  ;;  %8057 = vst [vmem:[#allocation16_spill] sm:$0xff] %v6687_v1  ;;  %v6695_v39 = vsub.f32 %v6635_v28, %v2564_v16  ;;  %v2760_v26 = vsub.f32 %v6670_v23, %v7818_v58  ;;  %4837 = vmatprep.subr.bf16.mxu0 %v6687_v1  ;;  %8058 = vst [vmem:[#allocation17_spill] sm:$0xff] %v6706_v54 }
 0x188   : > { %v2755_v62 = vand.u32 4294901760, %v2754_v25  ;;  %4871 = vmatpush1.bf16.msra.mxu1 %v4870_v8  ;;  %v2749_v28 = vand.u32 4294901760, %v2748_v29  ;;  %v7821_v35 = vand.u32 4294901760, %v6698_v44  ;;  %v2566_v48 = vand.u32 4294901760, %v6689_v41  ;;  %8059 = vst [vmem:[#allocation18_spill] sm:$0xff] %v6717_v11 }
 0x189   : > { %v2743_v17 = vand.u32 4294901760, %v2742_v38  ;;  %v7819_v36 = vand.u32 4294901760, %v6695_v39  ;;  %v6713_v38 = vld [vmem:[#allocation2 + $0xd8] sm:$0xff]  ;;  %v2761_v42 = vand.u32 4294901760, %v2760_v26  ;;  %4839 = vmatpush1.bf16.msra.mxu0 %v6706_v54  ;;  %v2570_v58 = vand.u32 4294901760, %v6700_v24  ;;  %v6731_v26 = vld [vmem:[#allocation2 + $0xd0] sm:$0xff] }
 0x18a   : > { %v2778_v29 = vsub.f32 %v6698_v44, %v7821_v35  ;;  %v6726_v8 = vsub.f32 %v6689_v41, %v2566_v48  ;;  %4841 = vmatprep.subr.bf16.mxu0 %v6717_v11  ;;  %v6738_v6 = vpack.c.bf16 %v2562_v2, %v2558_v52  ;;  %v2578_v52 = vand.u32 4294901760, %v6731_v26  ;;  %v2521_v2 = vld [vmem:[#allocation2 + $0xe8] sm:$0xff] }
 0x18b   : > { %v4872_v25 = vpack.c.bf16 %v2755_v62, %v2743_v17  ;;  %v2766_v14 = vsub.f32 %v6695_v39, %v7819_v36  ;;  %v2572_v62 = vand.u32 4294901760, %v6708_v31  ;;  %v6729_v17 = vld [vmem:[#allocation2 + $0xc0] sm:$0xff]  ;;  %v4874_v19 = vpack.c.bf16 %v2761_v42, %v2749_v28  ;;  %v2523_v28 = vld [vmem:[#allocation2 + $0xf8] sm:$0xff] }
 0x18c   : > { %v6734_v30 = vsub.f32 %v6700_v24, %v2570_v58  ;;  %v2576_v36 = vand.u32 4294901760, %v6713_v38  ;;  %8060 = vst [vmem:[#allocation19_spill] sm:$0xff] %v6738_v6  ;;  %v2779_v41 = vand.u32 4294901760, %v2778_v29  ;;  %v7827_v27 = vand.u32 4294901760, %v6726_v8 }
 0x18d   : > { %4873 = vmatprep.subr.bf16.mxu1 %v4872_v25  ;;  %v2767_v35 = vand.u32 4294901760, %v2766_v14  ;;  %v6742_v34 = vsub.f32 %v6708_v31, %v2572_v62  ;;  %4843 = vmatpush1.bf16.msra.mxu0 %v6738_v6  ;;  %v2574_v24 = vand.u32 4294901760, %v6729_v17  ;;  %v6765_v46 = vsub.f32 %v6731_v26, %v2578_v52 }
 0x18e   : > { %4875 = vmatpush1.bf16.msra.mxu1 %v4874_v19  ;;  %v7828_v25 = vand.u32 4294901760, %v6734_v30  ;;  %v6746_v42 = vsub.f32 %v6713_v38, %v2576_v36  ;;  %v2772_v31 = vsub.f32 %v6726_v8, %v7827_v27  ;;  %v6755_v19 = vpack.c.bf16 %v2568_v7, %v2564_v16 }
 0x18f   : > { %v4876_v14 = vpack.c.bf16 %v2779_v41, %v2767_v35  ;;  %v7832_v29 = vand.u32 4294901760, %v6742_v34  ;;  %v6762_v56 = vsub.f32 %v6729_v17, %v2574_v24  ;;  %v2580_v16 = vand.u32 4294901760, %v2521_v2 }
 0x190   : > { %8061 = vst [vmem:[#allocation20_spill] sm:$0xff] %v6755_v19  ;;  %v2784_v38 = vsub.f32 %v6734_v30, %v7828_v25  ;;  %v7837_v59 = vand.u32 4294901760, %v6746_v42  ;;  %v2773_v35 = vand.u32 4294901760, %v2772_v31  ;;  %4845 = vmatprep.subr.bf16.mxu0 %v6755_v19  ;;  %v2584_v7 = vand.u32 4294901760, %v2523_v28 }
 0x191   : > { %4877 = vmatprep.subr.bf16.mxu1 %v4876_v14  ;;  %v2790_v41 = vsub.f32 %v6742_v34, %v7832_v29  ;;  %v7841_v17 = vand.u32 4294901760, %v6762_v56  ;;  %v7840_v26 = vand.u32 4294901760, %v6765_v46  ;;  %v2522_v14 = vld [vmem:[#allocation2 + $0xf0] sm:$0xff]  ;;  %v6776_v3 = vsub.f32 %v2521_v2, %v2580_v16 }
 0x192   : > { %v2785_v27 = vand.u32 4294901760, %v2784_v38  ;;  %v2802_v25 = vsub.f32 %v6746_v42, %v7837_v59  ;;  %v6778_v40 = vsub.f32 %v2523_v28, %v2584_v7  ;;  %v6780_v29 = vpack.c.bf16 %v2570_v58, %v2566_v48 }
 0x193   : > { %v2791_v31 = vand.u32 4294901760, %v2790_v41  ;;  %v2796_v38 = vsub.f32 %v6762_v56, %v7841_v17  ;;  %v2808_v59 = vsub.f32 %v6765_v46, %v7840_v26  ;;  %v7849_v6 = vand.u32 4294901760, %v6776_v3 }
 0x194   : > { %8062 = vst [vmem:[#allocation21_spill] sm:$0xff] %v6780_v29  ;;  %v4878_v0 = vpack.c.bf16 %v2785_v27, %v2773_v35  ;;  %v2803_v19 = vand.u32 4294901760, %v2802_v25  ;;  %v7847_v41 = vand.u32 4294901760, %v6778_v40  ;;  %4847 = vmatpush1.bf16.msra.mxu0 %v6780_v29  ;;  %v2582_v2 = vand.u32 4294901760, %v2520_v61 }
 0x195   : > { %v2586_v28 = vand.u32 4294901760, %v2522_v14  ;;  %v2797_v27 = vand.u32 4294901760, %v2796_v38  ;;  %v2809_v48 = vand.u32 4294901760, %v2808_v59  ;;  %v6791_v25 = vpack.c.bf16 %v2576_v36, %v2572_v62  ;;  %v6806_v59 = vld [vmem:[#allocation4 + $0x8] sm:$0xff]  ;;  %v6810_v38 = vld [vmem:[#allocation4 + $0x18] sm:$0xff] }
 0x196   : > { %4879 = vmatpush1.bf16.msra.mxu1 %v4878_v0  ;;  %v4880_v58 = vpack.c.bf16 %v2803_v19, %v2791_v31  ;;  %v2814_v35 = vsub.f32 %v6776_v3, %v7849_v6  ;;  %v2826_v26 = vsub.f32 %v6778_v40, %v7847_v41  ;;  %v6799_v17 = vsub.f32 %v2520_v61, %v2582_v2  ;;  %v6844_v6 = vld [vmem:[#allocation4 + $0x30] sm:$0xff]  ;;  %v6892_v61 = vld [vmem:[#allocation4 + $0x60] sm:$0xff] }
 0x197   : > { %8063 = vst [vmem:[#allocation22_spill] sm:$0xff] %v6791_v25  ;;  %v6801_v11 = vsub.f32 %v2522_v14, %v2586_v28  ;;  %v4882_v29 = vpack.c.bf16 %v2809_v48, %v2797_v27  ;;  %4849 = vmatprep.subr.bf16.mxu0 %v6791_v25  ;;  %v6804_v0 = vpack.c.bf16 %v2578_v52, %v2574_v24  ;;  %8067 = vst [vmem:[#allocation26_spill] sm:$0xff] %v6806_v59  ;;  %v6934_v25 = vld [vmem:[#allocation4 + $0xb0] sm:$0xff] }
 0x198   : > { %8064 = vst [vmem:[#allocation23_spill] sm:$0xff] %v6799_v17  ;;  %4881 = vmatprep.subr.bf16.mxu1 %v4880_v58  ;;  %v2815_v36 = vand.u32 4294901760, %v2814_v35  ;;  %v2827_v62 = vand.u32 4294901760, %v2826_v26  ;;  %v7846_v19 = vand.u32 4294901760, %v6799_v17  ;;  %8068 = vst [vmem:[#allocation27_spill] sm:$0xff] %v6810_v38  ;;  %v6815_v14 = vpack.c.bf16 %v2584_v7, %v2580_v16  ;;  %v6820_v26 = vld [vmem:[#allocation4] sm:$0xff] }
 0x199   : > { %8065 = vst [vmem:[#allocation24_spill] sm:$0xff] %v6801_v11  ;;  %8066 = vst [vmem:[#allocation25_spill] sm:$0xff] %v6804_v0  ;;  %v7848_v31 = vand.u32 4294901760, %v6801_v11  ;;  %4851 = vmatpush1.bf16.msra.mxu0 %v6804_v0  ;;  %v7851_v52 = vand.u32 4294901760, %v6806_v59  ;;  %v6822_v58 = vld [vmem:[#allocation4 + $0x10] sm:$0xff]  ;;  %v6830_v16 = vpack.c.bf16 %v2586_v28, %v2582_v2  ;;  %v6842_v28 = vld [vmem:[#allocation4 + $0x20] sm:$0xff]  ;;  %v4888_v7 = vpack.c.bf16 %v6433_v32, %v6428_v45 }
 0x19a   : > { %4883 = vmatpush1.bf16.msra.mxu1 %v4882_v29  ;;  %8069 = vst [vmem:[#allocation28_spill] sm:$0xff] %v6815_v14  ;;  %v4884_v27 = vpack.c.bf16 %v2827_v62, %v2815_v36  ;;  %v2820_v29 = vsub.f32 %v6799_v17, %v7846_v19  ;;  %4853 = vmatprep.subr.bf16.mxu0 %v6815_v14  ;;  %v7850_v36 = vand.u32 4294901760, %v6810_v38  ;;  %v7853_v2 = vand.u32 4294901760, %v6822_v58  ;;  %v6894_v38 = vld [vmem:[#allocation4 + $0x70] sm:$0xff]  ;;  %v6932_v0 = vld [vmem:[#allocation4 + $0xa0] sm:$0xff] }
 0x19b   : > { %v2832_v48 = vsub.f32 %v6801_v11, %v7848_v31  ;;  %8070 = vst [vmem:[#allocation29_spill] sm:$0xff] %v6830_v16  ;;  %v7852_v31 = vand.u32 4294901760, %v6820_v26  ;;  %v7874_v59 = vand.u32 4294901760, %v6892_v61  ;;  %v6914_v32 = vld [vmem:[#allocation4 + $0x90] sm:$0xff]  ;;  %v7889_v54 = vand.u32 4294901760, %v6932_v0 }
 0x19c   : > { %4885 = vmatprep.subr.bf16.mxu1 %v4884_v27  ;;  %v2821_v19 = vand.u32 4294901760, %v2820_v29  ;;  %v6853_v27 = vpack.c.bf16 %v7850_v36, %v7851_v52  ;;  %v6863_v62 = vsub.f32 %v6822_v58, %v7853_v2  ;;  %v6872_v52 = vld [vmem:[#allocation4 + $0x40] sm:$0xff]  ;;  %v7884_v14 = vand.u32 4294901760, %v6914_v32 }
 0x19d   : > { %v2833_v41 = vand.u32 4294901760, %v2832_v48  ;;  %4855 = vmatpush1.bf16.msra.mxu0 %v6830_v16  ;;  %v6858_v48 = vsub.f32 %v6820_v26, %v7852_v31  ;;  %v6874_v31 = vld [vmem:[#allocation4 + $0x50] sm:$0xff]  ;;  %v7865_v24 = vand.u32 4294901760, %v6872_v52  ;;  %v6912_v16 = vld [vmem:[#allocation4 + $0x80] sm:$0xff]  ;;  %v7890_v1 = vand.u32 4294901760, %v6934_v25 }
 0x19e   : > { %8071 = vst [vmem:[#allocation30_spill] sm:$0xff] %v6853_v27  ;;  %5177 = vmatprep.subr.bf16.mxu0 %v6853_v27  ;;  %v7875_v27 = vand.u32 4294901760, %v6894_v38  ;;  %v7883_v45 = vand.u32 4294901760, %v6912_v16 }
 0x19f   : > { %v4886_v29 = vpack.c.bf16 %v2833_v41, %v2821_v19  ;;  %v7856_v41 = vand.u32 4294901760, %v6842_v28  ;;  %v7857_v19 = vand.u32 4294901760, %v6844_v6 }
 0x1a1   : > { %4887 = vmatpush1.bf16.msra.mxu1 %v4886_v29  ;;  %v6879_v2 = vsub.f32 %v6842_v28, %v7856_v41  ;;  %v6884_v35 = vsub.f32 %v6844_v6, %v7857_v19  ;;  %v6899_v41 = vsub.f32 %v6872_v52, %v7865_v24  ;;  %v6919_v24 = vsub.f32 %v6892_v61, %v7874_v59 }
 0x1a2   : > { %4889 = vmatprep.subr.bf16.mxu1 %v4888_v7  ;;  %v7866_v7 = vand.u32 4294901760, %v6874_v31  ;;  %v6924_v29 = vsub.f32 %v6894_v38, %v7875_v27  ;;  %v6939_v59 = vsub.f32 %v6912_v16, %v7883_v45  ;;  %v6944_v19 = vsub.f32 %v6914_v32, %v7884_v14 }
 0x1a3   : > { %8072 = vst [vmem:[#allocation31_spill] sm:$0xff] %v6879_v2  ;;  %8073 = vst [vmem:[#allocation32_spill] sm:$0xff] %v6884_v35  ;;  %v6959_v45 = vsub.f32 %v6932_v0, %v7889_v54  ;;  %v7894_v27 = vand.u32 4294901760, %v6952_v37 }
 0x1a4   : > { %8074 = vst [vmem:[#allocation33_spill] sm:$0xff] %v6899_v41  ;;  %v6904_v36 = vsub.f32 %v6874_v31, %v7866_v7  ;;  %8076 = vst [vmem:[#allocation35_spill] sm:$0xff] %v6919_v24  ;;  %v6964_v7 = vsub.f32 %v6934_v25, %v7890_v1 }
 0x1a5   : > { %8077 = vst [vmem:[#allocation36_spill] sm:$0xff] %v6924_v29  ;;  %8078 = vst [vmem:[#allocation37_spill] sm:$0xff] %v6939_v59  ;;  %v6954_v29 = vld [vmem:[#allocation4 + $0xd0] sm:$0xff]  ;;  %v6975_v49 = vsub.f32 %v6952_v37, %v7894_v27  ;;  %v2464_v27 = vlaneseq }
 0x1a6   : > { %8075 = vst [vmem:[#allocation34_spill] sm:$0xff] %v6904_v36  ;;  %8079 = vst [vmem:[#allocation38_spill] sm:$0xff] %v6944_v19  ;;  %v7898_v14 = vand.u32 4294901760, %v6954_v29  ;;  %v6968_v19 = vld [vmem:[#allocation4 + $0xe0] sm:$0xff]  ;;  %v6970_v59 = vld [vmem:[#allocation4 + $0xf0] sm:$0xff] }
 0x1a7   : > { %8081 = vst [vmem:[#allocation40_spill] sm:$0xff] %v6954_v29  ;;  %8082 = vst [vmem:[#allocation41_spill] sm:$0xff] %v6959_v45  ;;  %v7907_v1 = vand.u32 4294901760, %v6968_v19 }
 0x1a8   : > { %8083 = vst [vmem:[#allocation42_spill] sm:$0xff] %v6964_v7  ;;  %8084 = vst [vmem:[#allocation43_spill] sm:$0xff] %v6968_v19  ;;  %v6980_v54 = vsub.f32 %v6954_v29, %v7898_v14  ;;  %v7910_v7 = vand.u32 4294901760, %v6970_v59  ;;  %v2462_v14 = vld [vmem:[%s7785_s2] sm:$0x3] }
 0x1a9   : > { %8085 = vst [vmem:[#allocation44_spill] sm:$0xff] %v6970_v59  ;;  %8086 = vst [vmem:[#allocation45_spill] sm:$0xff] %v6975_v49  ;;  %v6987_v45 = vsub.f32 %v6968_v19, %v7907_v1  ;;  %v2465_v49 = vshrl.u32 %v2464_v27, 7 }
 0x1aa   : > { %8087 = vst [vmem:[#allocation46_spill] sm:$0xff] %v6980_v54  ;;  %v6992_v24 = vsub.f32 %v6970_v59, %v7910_v7 }
 0x1ab   : > { %8088 = vst [vmem:[#allocation47_spill] sm:$0xff] %v6987_v45  ;;  %v2470_v60 = vsub.s32 1, %v2465_v49  ;;  %v2466_v59 = vsub.s32 0, %v2465_v49  ;;  %v8095_v49 = vmov 0.0  }
 0x1ac   : > { %8089 = vst [vmem:[#allocation48_spill] sm:$0xff] %v6992_v24 }
 0x1ad   : > { %v2471_v54 = vrot.slane %v2462_v14, %v2470_v60  ;;  %v2467_v2 = vrot.slane %v2462_v14, %v2466_v59  ;;  %v8097_v14 = vpack.c.bf16 %v6480_v43, %v6468_v9 }
 0x241   : > { %v2446_v36 = vpop.f32.mrb[0].mxu0 }
 0x242   : > { %v2448_v51 = vpop.f32.mrb[1].mxu0  ;;  %v2474_v29 = vadd.f32 %v2467_v2, %v2446_v36  ;;  %v7021_v36 = vld [vmem:[#allocation4 + $0x48] sm:$0xff] }
 0x243   : > { %v2475_v41 = vadd.f32 %v2471_v54, %v2448_v51  ;;  %8099 = vst [vmem:[#allocation55_spill] sm:$0xff] %v7021_v36 }
 0x245   : > { %v4529_v55 = vmul.f32 -1.442695, %v2475_v41  ;;  %v2453_v35 = vpop.f32.mrb[2].mxu0 }
 0x246   : > { %v2455_v1 = vpop.f32.mrb[3].mxu0  ;;  %v2476_v51 = vadd.f32 %v2467_v2, %v2453_v35  ;;  %v7023_v2 = vld [vmem:[#allocation4 + $0x58] sm:$0xff] }
 0x247   : > { %5364 = vpow2.f32 %v4529_v55  ;;  %v2477_v45 = vadd.f32 %v2471_v54, %v2455_v1  ;;  %v7003_v1 = vld [vmem:[#allocation4 + $0x28] sm:$0xff]  ;;  %v7005_v54 = vld [vmem:[#allocation4 + $0x38] sm:$0xff]  ;;  %8100 = vst [vmem:[#allocation56_spill] sm:$0xff] %v7023_v2 }
 0x248   : > { %8092 = vst [vmem:[#allocation51_spill] sm:$0xff] %v7003_v1  ;;  %8093 = vst [vmem:[#allocation52_spill] sm:$0xff] %v7005_v54  ;;  %v7920_v35 = vand.u32 4294901760, %v7005_v54 }
 0x249   : > { %v4530_v19 = vmul.f32 -1.442695, %v2477_v45 }
 0x24b   : > { %5366 = vpow2.f32 %v4530_v19 }
 0x251   : > { %v5365_v7 = vpop.eup %5364 }
 0x252   : > { %v2484_v24 = vadd.f32 1.0, %v5365_v7  ;;  %v8102_v7 = vpack.c.bf16 %v6507_v21, %v6495_v47 }
 0x254   : > { %5368 = vrcp.f32 %v2484_v24  ;;  %v7921_v24 = vand.u32 4294901760, %v7003_v1  ;;  %v8163_v1 = vld [vmem:[#allocation31_spill] sm:$0xff] }
 0x255   : > { %v5367_v27 = vpop.eup %5366 }
 0x256   : > { %v2485_v50 = vadd.f32 1.0, %v5367_v27  ;;  %v8103_v27 = vand.u32 4294901760, %v6820_v26  ;;  %v7055_v26 = vpack.c.bf16 %v7920_v35, %v7921_v24  ;;  %v8114_v35 = vand.u32 4294901760, %v6844_v6 }
 0x257   : > { %v8127_v6 = vpack.c.bf16 %v6647_v10, %v6644_v15 }
 0x258   : > { %5370 = vrcp.f32 %v2485_v50  ;;  %v8094_v50 = vpack.c.bf16 %v6443_v57, %v6438_v53  ;;  %8109 = vst [vmem:[#allocation61_spill] sm:$0xff] %v7055_v26 }
 0x25e   : > { %v5369_v60 = vpop.eup %5368 }
 0x25f   : > { %v2490_v37 = vmul.f32 %v5369_v60, %v2474_v29  ;;  %v8104_v60 = vand.u32 4294901760, %v6822_v58  ;;  %v7057_v58 = vld [vmem:[#allocation4 + $0x68] sm:$0xff] }
 0x260   : > { %8110 = vst [vmem:[#allocation62_spill] sm:$0xff] %v7057_v58 }
 0x261   : > { %v6997_v17 = vand.u32 4294901760, %v2490_v37 }
 0x262   : > { %v5371_v41 = vpop.eup %5370 }
 0x263   : > { %8090 = vst [vmem:[#allocation49_spill] sm:$0xff] %v6997_v17  ;;  %v7000_v55 = vsub.f32 %v2490_v37, %v6997_v17  ;;  %v2491_v45 = vmul.f32 %v5371_v41, %v2476_v51  ;;  %2869 = vmatmul.mubr.f32.vlgmr.msra.gmra.mrb[0].mxu1 %v6997_v17  ;;  %v7038_v51 = vpack.c.bf16 %v8104_v60, %v8103_v27  ;;  %v7059_v27 = vld [vmem:[#allocation4 + $0x78] sm:$0xff] }
 0x264   : > { %4891 = vmatpush1.bf16.msra.mxu1 %v8094_v50  ;;  %2874 = vmatprep.mubr.f32.mxu1 %v8095_v49  ;;  %v8106_v41 = vpack.c.bf16 %v6530_v63, %v6525_v18  ;;  %8111 = vst [vmem:[#allocation63_spill] sm:$0xff] %v7059_v27  ;;  %v8112_v60 = vpack.c.bf16 %v6544_v22, %v6539_v20 }
 0x265   : > { %8091 = vst [vmem:[#allocation50_spill] sm:$0xff] %v7000_v55  ;;  %v7011_v59 = vand.u32 4294901760, %v2491_v45  ;;  %4893 = vmatprep.subr.bf16.mxu1 %v8097_v14  ;;  %v7017_v37 = vand.u32 4294901760, %v7000_v55  ;;  %8105 = vst [vmem:[#allocation58_spill] sm:$0xff] %v7038_v51 }
 0x267   : > { %8096 = vst [vmem:[#allocation53_spill] sm:$0xff] %v7011_v59  ;;  %8098 = vst [vmem:[#allocation54_spill] sm:$0xff] %v7017_v37  ;;  %2876 = vmatmul.mubr.f32.gmra.mrb[2].mxu1 %v7011_v59  ;;  %v2624_v19 = vsub.f32 %v7000_v55, %v7017_v37  ;;  %v7029_v29 = vsub.f32 %v2491_v45, %v7011_v59 }
 0x268   : > { %4895 = vmatpush1.bf16.msra.mxu1 %v8102_v7  ;;  %3010 = vmatprep.mubr.f32.mxu1 %v8095_v49  ;;  %v8116_v7 = vpack.c.bf16 %v6571_v12, %v6554_v33 }
 0x269   : > { %8101 = vst [vmem:[#allocation57_spill] sm:$0xff] %v7029_v29  ;;  %4897 = vmatprep.subr.bf16.mxu1 %v8106_v41  ;;  %v7044_v50 = vand.u32 4294901760, %v2624_v19  ;;  %v7047_v45 = vand.u32 4294901760, %v7029_v29  ;;  %v8113_v41 = vand.u32 4294901760, %v6842_v28  ;;  %v7930_v28 = vand.u32 4294901760, %v7057_v58  ;;  %v7143_v58 = vld [vmem:[#allocation4 + $0xc8] sm:$0xff] }
 0x26a   : > { %8138 = vst [vmem:[#allocation75_spill] sm:$0xff] %v7143_v58 }
 0x26b   : > { %8107 = vst [vmem:[#allocation59_spill] sm:$0xff] %v7044_v50  ;;  %8108 = vst [vmem:[#allocation60_spill] sm:$0xff] %v7047_v45  ;;  %2626 = vmatmul.mubr.f32.vlgmr.msra.gmra.mrb[4].mxu0 %v7044_v50  ;;  %v2635_v19 = vsub.f32 %v7029_v29, %v7047_v45  ;;  %v7072_v24 = vpack.c.bf16 %v8114_v35, %v8113_v41  ;;  %v8118_v50 = vand.u32 4294901760, %v7021_v36  ;;  %v7089_v35 = vld [vmem:[#allocation4 + $0x88] sm:$0xff]  ;;  %v7091_v41 = vld [vmem:[#allocation4 + $0x98] sm:$0xff] }
 0x26c   : > { %4899 = vmatpush1.bf16.msra.mxu1 %v8112_v60  ;;  %5179 = vmatpush1.bf16.msra.mxu0 %v7038_v51  ;;  %v8119_v60 = vand.u32 4294901760, %v7023_v2  ;;  %8121 = vst [vmem:[#allocation67_spill] sm:$0xff] %v7089_v35  ;;  %8122 = vst [vmem:[#allocation68_spill] sm:$0xff] %v7091_v41  ;;  %v7116_v36 = vld [vmem:[#allocation4 + $0xa8] sm:$0xff] }
 0x26d   : > { %8115 = vst [vmem:[#allocation64_spill] sm:$0xff] %v7072_v24  ;;  %2631 = vmatprep.mubr.f32.mxu0 %v8095_v49  ;;  %4901 = vmatprep.subr.bf16.mxu1 %v8116_v7  ;;  %v7078_v14 = vand.u32 4294901760, %v2635_v19  ;;  %v8123_v7 = vpack.c.bf16 %v6625_v4, %v6622_v5  ;;  %v8125_v19 = vand.u32 4294901760, %v6874_v31  ;;  %8130 = vst [vmem:[#allocation71_spill] sm:$0xff] %v7116_v36  ;;  %v7118_v31 = vld [vmem:[#allocation4 + $0xb8] sm:$0xff] }
 0x26e   : > { %v7084_v54 = vpack.c.bf16 %v8119_v60, %v8118_v50  ;;  %5181 = vmatprep.subr.bf16.mxu0 %v7055_v26  ;;  %v8124_v50 = vand.u32 4294901760, %v6872_v52  ;;  %v7935_v52 = vand.u32 4294901760, %v7091_v41  ;;  %8131 = vst [vmem:[#allocation72_spill] sm:$0xff] %v7118_v31 }
 0x26f   : > { %8117 = vst [vmem:[#allocation65_spill] sm:$0xff] %v7078_v14  ;;  %2637 = vmatmul.mubr.f32.gmra.mrb[6].mxu0 %v7078_v14  ;;  %v8128_v14 = vand.u32 4294901760, %v7059_v27 }
 0x270   : > { %8120 = vst [vmem:[#allocation66_spill] sm:$0xff] %v7084_v54  ;;  %4903 = vmatpush1.bf16.msra.mxu1 %v8123_v7  ;;  %5183 = vmatpush1.bf16.msra.mxu0 %v7072_v24  ;;  %v7102_v60 = vpack.c.bf16 %v8125_v19, %v8124_v50  ;;  %v7936_v7 = vand.u32 4294901760, %v7089_v35  ;;  %v8133_v50 = vand.u32 4294901760, %v6892_v61  ;;  %v7941_v61 = vand.u32 4294901760, %v7118_v31  ;;  %v7169_v35 = vld [vmem:[#allocation4 + $0xe8] sm:$0xff]  ;;  %v8188_v24 = vld [vmem:[#allocation38_spill] sm:$0xff] }
 0x271   : > { %4905 = vmatprep.subr.bf16.mxu1 %v8127_v6  ;;  %5185 = vmatprep.subr.bf16.mxu0 %v7084_v54  ;;  %v7112_v2 = vpack.c.bf16 %v8128_v14, %v7930_v28  ;;  %v8132_v6 = vpack.c.bf16 %v6670_v23, %v6664_v13  ;;  %v8134_v14 = vand.u32 4294901760, %v6894_v38  ;;  %v8136_v28 = vpack.c.bf16 %v6698_v44, %v6695_v39  ;;  %v7145_v38 = vld [vmem:[#allocation4 + $0xd8] sm:$0xff] }
 0x272   : > { %8126 = vst [vmem:[#allocation69_spill] sm:$0xff] %v7102_v60  ;;  %4353 = vmatprep.mubr.f32.mxu0 %v8095_v49  ;;  %v7139_v27 = vpack.c.bf16 %v7935_v52, %v7936_v7  ;;  %8139 = vst [vmem:[#allocation76_spill] sm:$0xff] %v7145_v38  ;;  %v8144_v7 = vpack.c.bf16 %v6746_v42, %v6742_v34  ;;  %v8154_v31 = vand.u32 4294901760, %v7145_v38  ;;  %v8160_v38 = vld [vmem:[#allocation40_spill] sm:$0xff]  ;;  %v7998_v26 = vand.u32 4294901760, %v8188_v24 }
 0x273   : > { %8129 = vst [vmem:[#allocation70_spill] sm:$0xff] %v7112_v2  ;;  %v7129_v19 = vpack.c.bf16 %v8134_v14, %v8133_v50  ;;  %v8140_v50 = vpack.c.bf16 %v6734_v30, %v6726_v8  ;;  %v8142_v14 = vand.u32 4294901760, %v6914_v32  ;;  %8146 = vst [vmem:[#allocation79_spill] sm:$0xff] %v7169_v35  ;;  %v7171_v32 = vld [vmem:[#allocation4 + $0xf8] sm:$0xff] }
 0x274   : > { %4907 = vmatpush1.bf16.msra.mxu1 %v8132_v6  ;;  %5187 = vmatpush1.bf16.msra.mxu0 %v7102_v60  ;;  %8137 = vst [vmem:[#allocation74_spill] sm:$0xff] %v7139_v27  ;;  %v7942_v6 = vand.u32 4294901760, %v7116_v36  ;;  %8147 = vst [vmem:[#allocation80_spill] sm:$0xff] %v7171_v32 }
 0x275   : > { %8135 = vst [vmem:[#allocation73_spill] sm:$0xff] %v7129_v19  ;;  %4909 = vmatprep.subr.bf16.mxu1 %v8136_v28  ;;  %5189 = vmatprep.subr.bf16.mxu0 %v7112_v2  ;;  %v8141_v28 = vand.u32 4294901760, %v6912_v16  ;;  %v7960_v16 = vand.u32 4294901760, %v6863_v62 }
 0x276   : > { %v7165_v41 = vpack.c.bf16 %v7941_v61, %v7942_v6  ;;  %v7957_v6 = vand.u32 4294901760, %v6858_v48 }
 0x277   : > { %v7155_v52 = vpack.c.bf16 %v8142_v14, %v8141_v28  ;;  %v8148_v28 = vpack.c.bf16 %v6765_v46, %v6762_v56  ;;  %v8150_v14 = vand.u32 4294901760, %v6934_v25  ;;  %v8161_v25 = vand.u32 4294901760, %v8160_v38 }
 0x278   : > { %4911 = vmatpush1.bf16.msra.mxu1 %v8140_v50  ;;  %5191 = vmatpush1.bf16.msra.mxu0 %v7129_v19  ;;  %8145 = vst [vmem:[#allocation78_spill] sm:$0xff] %v7165_v41  ;;  %v8152_v50 = vpack.c.bf16 %v6778_v40, %v6776_v3 }
 0x279   : > { %8143 = vst [vmem:[#allocation77_spill] sm:$0xff] %v7155_v52  ;;  %4913 = vmatprep.subr.bf16.mxu1 %v8144_v7  ;;  %5193 = vmatprep.subr.bf16.mxu0 %v7139_v27  ;;  %v8149_v7 = vand.u32 4294901760, %v6932_v0  ;;  %v8164_v27 = vld [vmem:[#allocation10_spill] sm:$0xff] }
 0x27b   : > { %v7181_v61 = vpack.c.bf16 %v8150_v14, %v8149_v7  ;;  %v3592_v7 = vsub.f32 %v6858_v48, %v7957_v6  ;;  %v8156_v14 = vld [vmem:[#allocation23_spill] sm:$0xff]  ;;  %v7971_v6 = vand.u32 4294901760, %v8163_v1 }
 0x27c   : > { %4915 = vmatpush1.bf16.msra.mxu1 %v8148_v28  ;;  %5195 = vmatpush1.bf16.msra.mxu0 %v7155_v52  ;;  %v8153_v28 = vand.u32 4294901760, %v7143_v58 }
 0x27d   : > { %8151 = vst [vmem:[#allocation81_spill] sm:$0xff] %v7181_v61  ;;  %4917 = vmatprep.subr.bf16.mxu1 %v8152_v50  ;;  %5197 = vmatprep.subr.bf16.mxu0 %v7165_v41  ;;  %v3604_v50 = vsub.f32 %v6863_v62, %v7960_v16  ;;  %v8157_v41 = vpack.c.bf16 %v6801_v11, %v8156_v14  ;;  %v3593_v0 = vand.u32 4294901760, %v3592_v7  ;;  %v8165_v16 = vld [vmem:[#allocation32_spill] sm:$0xff]  ;;  %v8170_v7 = vld [vmem:[#allocation11_spill] sm:$0xff] }
 0x27e   : > { %v7193_v36 = vpack.c.bf16 %v8154_v31, %v8153_v28  ;;  %v8158_v31 = vld [vmem:[#allocation39_spill] sm:$0xff]  ;;  %v7973_v19 = vand.u32 4294901760, %v8165_v16  ;;  %v3616_v38 = vsub.f32 %v8163_v1, %v7971_v6  ;;  %v8177_v6 = vld [vmem:[#allocation12_spill] sm:$0xff] }
 0x27f   : > { %v8159_v28 = vand.u32 4294901760, %v8158_v31  ;;  %v3605_v52 = vand.u32 4294901760, %v3604_v50  ;;  %v8171_v50 = vld [vmem:[#allocation43_spill] sm:$0xff] }
 0x280   : > { %8155 = vst [vmem:[#allocation82_spill] sm:$0xff] %v7193_v36  ;;  %4919 = vmatpush1.bf16.msra.mxu1 %v8157_v41  ;;  %5199 = vmatpush1.bf16.msra.mxu0 %v7181_v61  ;;  %v8166_v41 = vand.u32 4294901760, %v7169_v35  ;;  %v8167_v61 = vand.u32 4294901760, %v7171_v32  ;;  %v8176_v32 = vld [vmem:[#allocation33_spill] sm:$0xff] }
 0x281   : > { %v7211_v58 = vpack.c.bf16 %v8161_v25, %v8159_v28  ;;  %4921 = vmatprep.subr.bf16.mxu1 %v8164_v27  ;;  %5201 = vmatprep.subr.bf16.mxu0 %v7193_v36  ;;  %v7223_v31 = vpack.c.bf16 %v3605_v52, %v3593_v0  ;;  %v3628_v25 = vsub.f32 %v8165_v16, %v7973_v19  ;;  %v8172_v28 = vand.u32 4294901760, %v8171_v50  ;;  %v8183_v36 = vld [vmem:[#allocation36_spill] sm:$0xff] }
 0x282   : > { %v7221_v2 = vpack.c.bf16 %v8167_v61, %v8166_v41  ;;  %v8173_v61 = vld [vmem:[#allocation44_spill] sm:$0xff]  ;;  %v3617_v0 = vand.u32 4294901760, %v3616_v38  ;;  %v7978_v35 = vand.u32 4294901760, %v8176_v32 }
 0x283   : > { %8162 = vst [vmem:[#allocation39_spill] sm:$0xff] %v7211_v58  ;;  %8169 = vst [vmem:[#allocation31_spill] sm:$0xff] %v7223_v31  ;;  %3013 = vmatmul.mubr.f32.vlgmr.msra.gmra.mrb[0].mxu1 %v7000_v55  ;;  %v8174_v41 = vand.u32 4294901760, %v8173_v61  ;;  %v3629_v55 = vand.u32 4294901760, %v3628_v25  ;;  %v8178_v31 = vld [vmem:[#allocation34_spill] sm:$0xff]  ;;  %v8180_v61 = vld [vmem:[#allocation13_spill] sm:$0xff] }
 0x284   : > { %8168 = vst [vmem:[#allocation40_spill] sm:$0xff] %v7221_v2  ;;  %4923 = vmatpush1.bf16.msra.mxu1 %v8170_v7  ;;  %5203 = vmatpush1.bf16.msra.mxu0 %v7211_v58  ;;  %v7982_v19 = vand.u32 4294901760, %v8178_v31  ;;  %v3640_v50 = vsub.f32 %v8176_v32, %v7978_v35 }
 0x285   : > { %v7238_v52 = vpack.c.bf16 %v8174_v41, %v8172_v28  ;;  %3018 = vmatprep.mubr.f32.mxu1 %v8095_v49  ;;  %4925 = vmatprep.subr.bf16.mxu1 %v8177_v6  ;;  %v7249_v28 = vpack.c.bf16 %v3629_v55, %v3617_v0  ;;  %v8181_v41 = vld [vmem:[#allocation35_spill] sm:$0xff]  ;;  %v8202_v6 = vld [vmem:[#allocation22_spill] sm:$0xff] }
 0x286   : > { %5205 = vmatprep.subr.bf16.mxu0 %v7221_v2  ;;  %v3652_v38 = vsub.f32 %v8178_v31, %v7982_v19  ;;  %v3641_v25 = vand.u32 4294901760, %v3640_v50  ;;  %v7993_v58 = vand.u32 4294901760, %v8181_v41  ;;  %v8182_v2 = vld [vmem:[#allocation14_spill] sm:$0xff]  ;;  %v8185_v19 = vld [vmem:[#allocation15_spill] sm:$0xff] }
 0x287   : > { %8175 = vst [vmem:[#allocation32_spill] sm:$0xff] %v7238_v52  ;;  %3021 = vmatmul.mubr.f32.gmra.mrb[2].mxu1 %v7029_v29  ;;  %8179 = vst [vmem:[#allocation43_spill] sm:$0xff] %v7249_v28  ;;  %v7994_v29 = vand.u32 4294901760, %v8183_v36 }
 0x288   : > { %4927 = vmatpush1.bf16.msra.mxu1 %v8180_v61  ;;  %5207 = vmatpush1.bf16.msra.mxu0 %v7238_v52  ;;  %v3653_v35 = vand.u32 4294901760, %v3652_v38  ;;  %v3664_v55 = vsub.f32 %v8181_v41, %v7993_v58  ;;  %v8186_v52 = vld [vmem:[#allocation37_spill] sm:$0xff]  ;;  %v8187_v38 = vld [vmem:[#allocation16_spill] sm:$0xff] }
 0x289   : > { %4929 = vmatprep.subr.bf16.mxu1 %v8182_v2  ;;  %3123 = vmatprep.mubr.f32.mxu1 %v8095_v49  ;;  %v3676_v50 = vsub.f32 %v8183_v36, %v7994_v29  ;;  %v7997_v60 = vand.u32 4294901760, %v8186_v52  ;;  %v8190_v29 = vld [vmem:[#allocation17_spill] sm:$0xff]  ;;  %v8197_v61 = vld [vmem:[#allocation20_spill] sm:$0xff] }
 0x28a   : > { %v7264_v0 = vpack.c.bf16 %v3653_v35, %v3641_v25  ;;  %v3665_v28 = vand.u32 4294901760, %v3664_v55  ;;  %v3700_v25 = vsub.f32 %v8188_v24, %v7998_v26  ;;  %v8195_v26 = vld [vmem:[#allocation19_spill] sm:$0xff] }
 0x28b   : > { %4355 = vmatmul.mubr.f32.vlgmr.msra.gmra.mrb[8].mxu0 %v6997_v17  ;;  %v3677_v54 = vand.u32 4294901760, %v3676_v50  ;;  %v3688_v58 = vsub.f32 %v8186_v52, %v7997_v60 }
 0x28c   : > { %8184 = vst [vmem:[#allocation44_spill] sm:$0xff] %v7264_v0  ;;  %4931 = vmatpush1.bf16.msra.mxu1 %v8185_v19  ;;  %v8191_v0 = vld [vmem:[#allocation41_spill] sm:$0xff]  ;;  %v8192_v19 = vld [vmem:[#allocation18_spill] sm:$0xff]  ;;  %v3701_v50 = vand.u32 4294901760, %v3700_v25 }
 0x28d   : > { %4933 = vmatprep.subr.bf16.mxu1 %v8187_v38  ;;  %v7276_v35 = vpack.c.bf16 %v3677_v54, %v3665_v28  ;;  %v3689_v55 = vand.u32 4294901760, %v3688_v58  ;;  %v8001_v51 = vand.u32 4294901760, %v8191_v0  ;;  %v8193_v38 = vld [vmem:[#allocation42_spill] sm:$0xff] }
 0x28e   : > { %v8002_v2 = vand.u32 4294901760, %v8193_v38 }
 0x28f   : > { %8189 = vst [vmem:[#allocation33_spill] sm:$0xff] %v7276_v35  ;;  %v3712_v60 = vsub.f32 %v8191_v0, %v8001_v51  ;;  %v7288_v54 = vpack.c.bf16 %v3701_v50, %v3689_v55  ;;  %v8196_v35 = vld [vmem:[#allocation45_spill] sm:$0xff] }
 0x290   : > { %4935 = vmatpush1.bf16.msra.mxu1 %v8190_v29  ;;  %v3724_v28 = vsub.f32 %v8193_v38, %v8002_v2  ;;  %v8003_v29 = vand.u32 4294901760, %v8196_v35  ;;  %v8200_v2 = vld [vmem:[#allocation21_spill] sm:$0xff] }
 0x291   : > { %4937 = vmatprep.subr.bf16.mxu1 %v8192_v19  ;;  %8194 = vst [vmem:[#allocation34_spill] sm:$0xff] %v7288_v54  ;;  %v3713_v58 = vand.u32 4294901760, %v3712_v60  ;;  %v8198_v19 = vld [vmem:[#allocation46_spill] sm:$0xff]  ;;  %v8201_v54 = vld [vmem:[#allocation47_spill] sm:$0xff] }
 0x292   : > { %v3725_v25 = vand.u32 4294901760, %v3724_v28  ;;  %v8004_v59 = vand.u32 4294901760, %v8198_v19  ;;  %v3736_v51 = vsub.f32 %v8196_v35, %v8003_v29 }
 0x294   : > { %4939 = vmatpush1.bf16.msra.mxu1 %v8195_v26  ;;  %v7300_v55 = vpack.c.bf16 %v3725_v25, %v3713_v58  ;;  %v3748_v50 = vsub.f32 %v8198_v19, %v8004_v59  ;;  %v3737_v60 = vand.u32 4294901760, %v3736_v51  ;;  %v8008_v26 = vand.u32 4294901760, %v8201_v54  ;;  %v8205_v59 = vld [vmem:[#allocation25_spill] sm:$0xff] }
 0x295   : > { %4941 = vmatprep.subr.bf16.mxu1 %v8197_v61  ;;  %v8203_v61 = vld [vmem:[#allocation48_spill] sm:$0xff] }
 0x296   : > { %8199 = vst [vmem:[#allocation35_spill] sm:$0xff] %v7300_v55  ;;  %v3749_v28 = vand.u32 4294901760, %v3748_v50  ;;  %v8009_v7 = vand.u32 4294901760, %v8203_v61  ;;  %v3760_v29 = vsub.f32 %v8201_v54, %v8008_v26  ;;  %v8206_v55 = vld [vmem:[#allocation28_spill] sm:$0xff]  ;;  %v8209_v50 = vld [vmem:[#allocation9_spill] sm:$0xff] }
 0x297   : > { %v8210_v17 = vand.u32 4294901760, %v8209_v50  ;;  %v8211_v26 = vld [vmem:[#allocation29_spill] sm:$0xff] }
 0x298   : > { %4943 = vmatpush1.bf16.msra.mxu1 %v8200_v2  ;;  %v7312_v58 = vpack.c.bf16 %v3749_v28, %v3737_v60  ;;  %v3772_v25 = vsub.f32 %v8203_v61, %v8009_v7  ;;  %v3761_v51 = vand.u32 4294901760, %v3760_v29  ;;  %v8207_v2 = vld [vmem:[#allocation8_spill] sm:$0xff]  ;;  %v8212_v60 = vand.u32 4294901760, %v6438_v53 }
 0x299   : > { %4945 = vmatprep.subr.bf16.mxu1 %v8202_v6  ;;  %v8208_v6 = vand.u32 4294901760, %v8207_v2  ;;  %v8213_v28 = vand.u32 4294901760, %v6443_v57  ;;  %v8214_v29 = vand.u32 4294901760, %v6468_v9  ;;  %v8217_v53 = vand.u32 4294901760, %v6507_v21 }
 0x29a   : > { %8204 = vst [vmem:[#allocation36_spill] sm:$0xff] %v7312_v58  ;;  %v3773_v11 = vand.u32 4294901760, %v3772_v25  ;;  %v8215_v58 = vand.u32 4294901760, %v6480_v43  ;;  %v8219_v9 = vand.u32 4294901760, %v6530_v63  ;;  %v8222_v21 = vand.u32 4294901760, %v6554_v33 }
 0x29b   : > { %v4952_v27 = vpack.c.bf16 %v8210_v17, %v8208_v6  ;;  %v4954_v7 = vpack.c.bf16 %v8213_v28, %v8212_v60  ;;  %v8218_v17 = vand.u32 4294901760, %v6525_v18  ;;  %v8220_v6 = vand.u32 4294901760, %v6539_v20 }
 0x29c   : > { %4947 = vmatpush1.bf16.msra.mxu1 %v8205_v59  ;;  %v7323_v14 = vpack.c.bf16 %v3773_v11, %v3761_v51  ;;  %v8216_v11 = vand.u32 4294901760, %v6495_v47  ;;  %v8223_v18 = vand.u32 4294901760, %v6571_v12  ;;  %v8225_v25 = vand.u32 4294901760, %v6625_v4 }
 0x29d   : > { %4949 = vmatprep.subr.bf16.mxu1 %v8206_v55  ;;  %v4956_v55 = vpack.c.bf16 %v8215_v58, %v8214_v29  ;;  %v4960_v43 = vpack.c.bf16 %v8219_v9, %v8218_v17  ;;  %v8224_v58 = vand.u32 4294901760, %v6622_v5  ;;  %v8227_v51 = vand.u32 4294901760, %v6647_v10 }
 0x29e   : > { %v4958_v57 = vpack.c.bf16 %v8217_v53, %v8216_v11  ;;  %v4964_v63 = vpack.c.bf16 %v8223_v18, %v8222_v21  ;;  %v8228_v12 = vand.u32 4294901760, %v6664_v13  ;;  %v8229_v60 = vand.u32 4294901760, %v6670_v23  ;;  %v8247_v18 = vld [vmem:[#allocation12_spill] sm:$0xff] }
 0x29f   : > { %v4966_v20 = vpack.c.bf16 %v8225_v25, %v8224_v58  ;;  %v8230_v5 = vand.u32 4294901760, %v6695_v39  ;;  %v8231_v4 = vand.u32 4294901760, %v6698_v44  ;;  %v8232_v10 = vand.u32 4294901760, %v6726_v8  ;;  %v8249_v58 = vld [vmem:[#allocation13_spill] sm:$0xff]  ;;  %v8250_v25 = vld [vmem:[#allocation14_spill] sm:$0xff] }
 0x2a0   : > { %4951 = vmatpush1.bf16.msra.mxu1 %v8211_v26  ;;  %v4970_v28 = vpack.c.bf16 %v8229_v60, %v8228_v12  ;;  %v8233_v11 = vand.u32 4294901760, %v6734_v30  ;;  %v8234_v13 = vand.u32 4294901760, %v6742_v34  ;;  %v8235_v23 = vand.u32 4294901760, %v6746_v42  ;;  %v8240_v42 = vld [vmem:[#allocation23_spill] sm:$0xff]  ;;  %v8256_v60 = vld [vmem:[#allocation20_spill] sm:$0xff] }
 0x2a1   : > { %4953 = vmatprep.subr.bf16.mxu1 %v4952_v27  ;;  %v4972_v29 = vpack.c.bf16 %v8231_v4, %v8230_v5  ;;  %v8236_v44 = vand.u32 4294901760, %v6762_v56  ;;  %v8237_v17 = vand.u32 4294901760, %v6765_v46  ;;  %v8238_v8 = vand.u32 4294901760, %v6776_v3  ;;  %v8244_v56 = vld [vmem:[#allocation10_spill] sm:$0xff]  ;;  %v8245_v3 = vld [vmem:[#allocation49_spill] sm:$0xff]  ;;  %v8255_v12 = vld [vmem:[#allocation19_spill] sm:$0xff] }
 0x2a2   : > { %v4974_v53 = vpack.c.bf16 %v8233_v11, %v8232_v10  ;;  %v8239_v30 = vand.u32 4294901760, %v6778_v40  ;;  %v8246_v40 = vld [vmem:[#allocation11_spill] sm:$0xff]  ;;  %v8258_v5 = vld [vmem:[#allocation22_spill] sm:$0xff]  ;;  %v8259_v4 = vld [vmem:[#allocation28_spill] sm:$0xff] }
 0x2a3   : > { %3127 = vmatmul.mubr.f32.vlgmr.msra.gmra.mrb[0].mxu1 %v7017_v37  ;;  %v4978_v9 = vpack.c.bf16 %v8237_v17, %v8236_v44  ;;  %v8261_v10 = vld [vmem:[#allocation58_spill] sm:$0xff]  ;;  %v8262_v11 = vld [vmem:[#allocation61_spill] sm:$0xff]  ;;  %v8268_v44 = vld [vmem:[#allocation27_spill] sm:$0xff] }
 0x2a4   : > { %4955 = vmatpush1.bf16.msra.mxu1 %v4954_v7  ;;  %3132 = vmatprep.mubr.f32.mxu1 %v8095_v49  ;;  %v8221_v7 = vand.u32 4294901760, %v6544_v22  ;;  %v8226_v22 = vand.u32 4294901760, %v6644_v15  ;;  %v8269_v17 = vand.u32 4294901760, %v8268_v44  ;;  %v8294_v15 = vld [vmem:[#allocation40_spill] sm:$0xff] }
 0x2a5   : > { %4957 = vmatprep.subr.bf16.mxu1 %v4956_v55 }
 0x2a6   : > { %v4962_v47 = vpack.c.bf16 %v8221_v7, %v8220_v6  ;;  %v4968_v50 = vpack.c.bf16 %v8227_v51, %v8226_v22  ;;  %v8241_v6 = vand.u32 4294901760, %v8240_v42  ;;  %v8242_v7 = vld [vmem:[#allocation24_spill] sm:$0xff]  ;;  %v8253_v51 = vld [vmem:[#allocation17_spill] sm:$0xff] }
 0x2a7   : > { %3136 = vmatmul.mubr.f32.gmra.mrb[2].mxu1 %v7047_v45  ;;  %v8252_v22 = vld [vmem:[#allocation16_spill] sm:$0xff] }
 0x2a8   : > { %4959 = vmatpush1.bf16.msra.mxu1 %v4958_v57  ;;  %3302 = vmatprep.mubr.f32.mxu1 %v8095_v49  ;;  %v4976_v57 = vpack.c.bf16 %v8235_v23, %v8234_v13  ;;  %v8265_v13 = vld [vmem:[#allocation69_spill] sm:$0xff] }
 0x2a9   : > { %4961 = vmatprep.subr.bf16.mxu1 %v4960_v43  ;;  %v4980_v43 = vpack.c.bf16 %v8239_v30, %v8238_v8  ;;  %v8270_v8 = vld [vmem:[#allocation70_spill] sm:$0xff]  ;;  %v8271_v30 = vld [vmem:[#allocation73_spill] sm:$0xff] }
 0x2ac   : > { %4963 = vmatpush1.bf16.msra.mxu1 %v4962_v47  ;;  %v8243_v47 = vand.u32 4294901760, %v8242_v7  ;;  %v8273_v7 = vld [vmem:[#allocation51_spill] sm:$0xff] }
 0x2ad   : > { %4965 = vmatprep.subr.bf16.mxu1 %v4964_v63  ;;  %v8248_v63 = vld [vmem:[#allocation53_spill] sm:$0xff] }
 0x2ae   : > { %v4982_v21 = vpack.c.bf16 %v8243_v47, %v8241_v6  ;;  %v8272_v6 = vld [vmem:[#allocation74_spill] sm:$0xff]  ;;  %v8274_v47 = vand.u32 4294901760, %v8273_v7 }
 0x2b0   : > { %4967 = vmatpush1.bf16.msra.mxu1 %v4966_v20  ;;  %v8251_v20 = vld [vmem:[#allocation15_spill] sm:$0xff] }
 0x2b1   : > { %4969 = vmatprep.subr.bf16.mxu1 %v4968_v50  ;;  %v8254_v50 = vld [vmem:[#allocation18_spill] sm:$0xff] }
 0x2b4   : > { %4971 = vmatpush1.bf16.msra.mxu1 %v4970_v28  ;;  %v8257_v28 = vld [vmem:[#allocation21_spill] sm:$0xff] }
 0x2b5   : > { %4973 = vmatprep.subr.bf16.mxu1 %v4972_v29  ;;  %v8260_v29 = vld [vmem:[#allocation30_spill] sm:$0xff] }
 0x2b8   : > { %4975 = vmatpush1.bf16.msra.mxu1 %v4974_v53  ;;  %v8263_v53 = vld [vmem:[#allocation64_spill] sm:$0xff] }
 0x2b9   : > { %4977 = vmatprep.subr.bf16.mxu1 %v4976_v57 }
 0x2bc   : > { %4979 = vmatpush1.bf16.msra.mxu1 %v4978_v9  ;;  %v7444_v9 = vsub.f32 %v8268_v44, %v8269_v17 }
 0x2bd   : > { %4981 = vmatprep.subr.bf16.mxu1 %v4980_v43 }
 0x2be   : > { %v8010_v42 = vand.u32 4294901760, %v7444_v9 }
 0x2c0   : > { %4983 = vmatpush1.bf16.msra.mxu1 %v4982_v21  ;;  %v7454_v21 = vsub.f32 %v8273_v7, %v8274_v47  ;;  %v8285_v7 = vld [vmem:[#allocation63_spill] sm:$0xff] }
 0x2c1   : > { %4985 = vmatprep.subr.bf16.mxu1 %v8244_v56  ;;  %v8275_v56 = vld [vmem:[#allocation52_spill] sm:$0xff]  ;;  %v8286_v47 = vand.u32 4294901760, %v8285_v7 }
 0x2c3   : > { %3304 = vmatmul.mubr.f32.vlgmr.msra.gmra.mrb[0].mxu1 %v8245_v3 }
 0x2c4   : > { %4987 = vmatpush1.bf16.msra.mxu1 %v8246_v40  ;;  %3309 = vmatprep.mubr.f32.mxu1 %v8095_v49  ;;  %v8276_v40 = vand.u32 4294901760, %v8275_v56 }
 0x2c5   : > { %4989 = vmatprep.subr.bf16.mxu1 %v8247_v18 }
 0x2c6   : > { %v7459_v18 = vsub.f32 %v8275_v56, %v8276_v40  ;;  %v7489_v56 = vsub.f32 %v8285_v7, %v8286_v47  ;;  %v8287_v40 = vld [vmem:[#allocation81_spill] sm:$0xff] }
 0x2c7   : > { %3311 = vmatmul.mubr.f32.gmra.mrb[2].mxu1 %v8248_v63 }
 0x2c8   : > { %4991 = vmatpush1.bf16.msra.mxu1 %v8249_v58  ;;  %3413 = vmatprep.mubr.f32.mxu1 %v8095_v49  ;;  %v8277_v58 = vld [vmem:[#allocation77_spill] sm:$0xff]  ;;  %v8019_v47 = vand.u32 4294901760, %v7489_v56 }
 0x2c9   : > { %4993 = vmatprep.subr.bf16.mxu1 %v8250_v25 }
 0x2cc   : > { %4995 = vmatpush1.bf16.msra.mxu1 %v8251_v20  ;;  %v3598_v20 = vsub.f32 %v7444_v9, %v8010_v42 }
 0x2cd   : > { %4997 = vmatprep.subr.bf16.mxu1 %v8252_v22  ;;  %v8278_v22 = vld [vmem:[#allocation78_spill] sm:$0xff] }
 0x2d0   : > { %4999 = vmatpush1.bf16.msra.mxu1 %v8253_v51  ;;  %v8012_v51 = vand.u32 4294901760, %v7454_v21 }
 0x2d1   : > { %5001 = vmatprep.subr.bf16.mxu1 %v8254_v50  ;;  %v8013_v50 = vand.u32 4294901760, %v7459_v18 }
 0x2d4   : > { %5003 = vmatpush1.bf16.msra.mxu1 %v8255_v12  ;;  %v8279_v12 = vld [vmem:[#allocation55_spill] sm:$0xff] }
 0x2d5   : > { %5005 = vmatprep.subr.bf16.mxu1 %v8256_v60  ;;  %v8280_v60 = vand.u32 4294901760, %v8279_v12 }
 0x2d8   : > { %5007 = vmatpush1.bf16.msra.mxu1 %v8257_v28  ;;  %v7474_v28 = vsub.f32 %v8279_v12, %v8280_v60  ;;  %v3599_v12 = vand.u32 4294901760, %v3598_v20  ;;  %v8288_v60 = vld [vmem:[#allocation82_spill] sm:$0xff] }
 0x2d9   : > { %5009 = vmatprep.subr.bf16.mxu1 %v8258_v5  ;;  %v8281_v5 = vld [vmem:[#allocation56_spill] sm:$0xff] }
 0x2dc   : > { %5011 = vmatpush1.bf16.msra.mxu1 %v8205_v59  ;;  %v8264_v59 = vld [vmem:[#allocation66_spill] sm:$0xff] }
 0x2dd   : > { %5013 = vmatprep.subr.bf16.mxu1 %v8259_v4  ;;  %v8282_v4 = vand.u32 4294901760, %v8281_v5 }
 0x2e0   : > { %5015 = vmatpush1.bf16.msra.mxu1 %v8211_v26  ;;  %v8266_v26 = vld [vmem:[#allocation26_spill] sm:$0xff] }
 0x2e1   : > { %5017 = vmatprep.subr.bf16.mxu1 %v8260_v29  ;;  %v8267_v23 = vand.u32 4294901760, %v8266_v26 }
 0x2e3   : > { %3415 = vmatmul.mubr.f32.vlgmr.msra.gmra.mrb[0].mxu1 %v8245_v3  ;;  %v7439_v57 = vsub.f32 %v8266_v26, %v8267_v23  ;;  %v7479_v26 = vsub.f32 %v8281_v5, %v8282_v4  ;;  %v8283_v23 = vld [vmem:[#allocation62_spill] sm:$0xff]  ;;  %v3610_v5 = vsub.f32 %v7454_v21, %v8012_v51  ;;  %v3622_v4 = vsub.f32 %v7459_v18, %v8013_v50  ;;  %v8292_v51 = vld [vmem:[#allocation68_spill] sm:$0xff] }
 0x2e4   : > { %5019 = vmatpush1.bf16.msra.mxu1 %v8261_v10  ;;  %3420 = vmatprep.mubr.f32.mxu1 %v8095_v49  ;;  %v8284_v44 = vand.u32 4294901760, %v8283_v23  ;;  %v8293_v39 = vand.u32 4294901760, %v8292_v51 }
 0x2e5   : > { %5021 = vmatprep.subr.bf16.mxu1 %v8262_v11  ;;  %v8011_v43 = vand.u32 4294901760, %v7439_v57  ;;  %v3611_v33 = vand.u32 4294901760, %v3610_v5  ;;  %v3623_v55 = vand.u32 4294901760, %v3622_v4  ;;  %v8296_v5 = vld [vmem:[#allocation71_spill] sm:$0xff] }
 0x2e6   : > { %v7484_v17 = vsub.f32 %v8283_v23, %v8284_v44  ;;  %v8014_v23 = vand.u32 4294901760, %v7474_v28  ;;  %v8015_v44 = vand.u32 4294901760, %v7479_v26  ;;  %v7512_v50 = vsub.f32 %v8292_v51, %v8293_v39 }
 0x2e7   : > { %3422 = vmatmul.mubr.f32.gmra.mrb[2].mxu1 %v8248_v63  ;;  %v3586_v25 = vsub.f32 %v7439_v57, %v8011_v43  ;;  %v8290_v43 = vld [vmem:[#allocation67_spill] sm:$0xff]  ;;  %v3670_v39 = vsub.f32 %v7489_v56, %v8019_v47  ;;  %v8297_v4 = vand.u32 4294901760, %v8296_v5 }
 0x2e8   : > { %5023 = vmatpush1.bf16.msra.mxu1 %v8263_v53  ;;  %3560 = vmatprep.mubr.f32.mxu1 %v8095_v49  ;;  %v8017_v7 = vand.u32 4294901760, %v7484_v17  ;;  %v8291_v46 = vand.u32 4294901760, %v8290_v43  ;;  %v3634_v27 = vsub.f32 %v7474_v28, %v8014_v23 }
 0x2e9   : > { %5025 = vmatprep.subr.bf16.mxu1 %v8264_v59  ;;  %v3587_v42 = vand.u32 4294901760, %v3586_v25  ;;  %v8289_v25 = vld [vmem:[#allocation39_spill] sm:$0xff]  ;;  %v7533_v23 = vsub.f32 %v8296_v5, %v8297_v4  ;;  %v3671_v51 = vand.u32 4294901760, %v3670_v39  ;;  %v8307_v39 = vld [vmem:[#allocation65_spill] sm:$0xff] }
 0x2ea   : > { %v7507_v34 = vsub.f32 %v8290_v43, %v8291_v46  ;;  %v3658_v46 = vsub.f32 %v7484_v17, %v8017_v7  ;;  %v8295_v43 = vld [vmem:[#allocation32_spill] sm:$0xff]  ;;  %v5052_v7 = vpack.c.bf16 %v3623_v55, %v3611_v33  ;;  %v3635_v37 = vand.u32 4294901760, %v3634_v27 }
 0x2eb   : > { %v5048_v20 = vpack.c.bf16 %v3599_v12, %v3587_v42  ;;  %v3646_v42 = vsub.f32 %v7479_v26, %v8015_v44  ;;  %v8020_v12 = vand.u32 4294901760, %v7512_v50  ;;  %v8298_v44 = vld [vmem:[#allocation72_spill] sm:$0xff] }
 0x2ec   : > { %5027 = vmatpush1.bf16.msra.mxu1 %v8265_v13  ;;  %v8299_v2 = vand.u32 4294901760, %v8298_v44  ;;  %v8302_v5 = vand.u32 4294901760, %v7507_v34 }
 0x2ed   : > { %5029 = vmatprep.subr.bf16.mxu1 %v8270_v8  ;;  %v3647_v47 = vand.u32 4294901760, %v3646_v42 }
 0x2ee   : > { %v7538_v45 = vsub.f32 %v8298_v44, %v8299_v2  ;;  %v3682_v4 = vsub.f32 %v7507_v34, %v8302_v5  ;;  %v3694_v2 = vsub.f32 %v7512_v50, %v8020_v12  ;;  %v8308_v12 = vld [vmem:[#allocation43_spill] sm:$0xff] }
 0x2ef   : > { %v5056_v33 = vpack.c.bf16 %v3647_v47, %v3635_v37 }
 0x2f0   : > { %5031 = vmatpush1.bf16.msra.mxu1 %v8271_v30  ;;  %v8021_v27 = vand.u32 4294901760, %v7538_v45  ;;  %v3683_v55 = vand.u32 4294901760, %v3682_v4  ;;  %v8312_v4 = vld [vmem:[#allocation80_spill] sm:$0xff] }
 0x2f1   : > { %5033 = vmatprep.subr.bf16.mxu1 %v8272_v6 }
 0x2f2   : > { %v3718_v47 = vsub.f32 %v7538_v45, %v8021_v27 }
 0x2f4   : > { %5035 = vmatpush1.bf16.msra.mxu1 %v8277_v58  ;;  %v3719_v27 = vand.u32 4294901760, %v3718_v47  ;;  %v8316_v47 = vld [vmem:[#allocation34_spill] sm:$0xff] }
 0x2f5   : > { %5037 = vmatprep.subr.bf16.mxu1 %v8278_v22  ;;  %v8317_v22 = vld [vmem:[#allocation35_spill] sm:$0xff] }
 0x2f8   : > { %5039 = vmatpush1.bf16.msra.mxu1 %v8287_v40 }
 0x2f9   : > { %5041 = vmatprep.subr.bf16.mxu1 %v8288_v60  ;;  %v3695_v60 = vand.u32 4294901760, %v3694_v2  ;;  %v8313_v2 = vand.u32 4294901760, %v8312_v4 }
 0x2fc   : > { %5043 = vmatpush1.bf16.msra.mxu1 %v8289_v25  ;;  %v8301_v25 = vld [vmem:[#allocation31_spill] sm:$0xff] }
 0x2fd   : > { %5045 = vmatprep.subr.bf16.mxu1 %v8294_v15  ;;  %v8300_v15 = vld [vmem:[#allocation59_spill] sm:$0xff] }
 0x300   : > { %5047 = vmatpush1.bf16.msra.mxu1 %v8295_v43  ;;  %v3659_v43 = vand.u32 4294901760, %v3658_v46 }
 0x301   : > { %5049 = vmatprep.subr.bf16.mxu1 %v5048_v20  ;;  %v8305_v20 = vld [vmem:[#allocation76_spill] sm:$0xff] }
 0x302   : > { %v8306_v42 = vand.u32 4294901760, %v8305_v20  ;;  %v5060_v5 = vpack.c.bf16 %v3671_v51, %v3659_v43  ;;  %v8310_v43 = vld [vmem:[#allocation79_spill] sm:$0xff] }
 0x303   : > { %3566 = vmatmul.mubr.f32.vlgmr.msra.gmra.mrb[4].mxu1 %v8300_v15  ;;  %v8303_v15 = vld [vmem:[#allocation75_spill] sm:$0xff]  ;;  %v8311_v51 = vand.u32 4294901760, %v8310_v43 }
 0x304   : > { %5051 = vmatpush1.bf16.msra.mxu1 %v8301_v25  ;;  %3571 = vmatprep.mubr.f32.mxu1 %v8095_v49  ;;  %v8304_v44 = vand.u32 4294901760, %v8303_v15  ;;  %v7559_v46 = vsub.f32 %v8305_v20, %v8306_v42  ;;  %v7580_v20 = vsub.f32 %v8312_v4, %v8313_v2  ;;  %v8314_v42 = vld [vmem:[#allocation44_spill] sm:$0xff]  ;;  %v8315_v4 = vld [vmem:[#allocation33_spill] sm:$0xff] }
 0x305   : > { %5053 = vmatprep.subr.bf16.mxu1 %v5052_v7  ;;  %v8309_v7 = vand.u32 4294901760, %v7533_v23 }
 0x306   : > { %v7554_v25 = vsub.f32 %v8303_v15, %v8304_v44  ;;  %v8022_v44 = vand.u32 4294901760, %v7559_v46  ;;  %v8024_v40 = vand.u32 4294901760, %v7580_v20 }
 0x307   : > { %3577 = vmatmul.mubr.f32.gmra.mrb[6].mxu1 %v8307_v39  ;;  %v3706_v37 = vsub.f32 %v7533_v23, %v8309_v7  ;;  %v5064_v39 = vpack.c.bf16 %v3695_v60, %v3683_v55 }
 0x308   : > { %5055 = vmatpush1.bf16.msra.mxu1 %v8308_v12  ;;  %3807 = vmatprep.mubr.f32.mxu1 %v8095_v49  ;;  %v8023_v15 = vand.u32 4294901760, %v7554_v25  ;;  %v7575_v12 = vsub.f32 %v8310_v43, %v8311_v51  ;;  %v3742_v43 = vsub.f32 %v7559_v46, %v8022_v44 }
 0x309   : > { %5057 = vmatprep.subr.bf16.mxu1 %v5056_v33  ;;  %v3707_v7 = vand.u32 4294901760, %v3706_v37  ;;  %v3766_v37 = vsub.f32 %v7580_v20, %v8024_v40 }
 0x30a   : > { %v3730_v33 = vsub.f32 %v7554_v25, %v8023_v15  ;;  %v8025_v51 = vand.u32 4294901760, %v7575_v12  ;;  %v3743_v55 = vand.u32 4294901760, %v3742_v43  ;;  %v8319_v43 = vpack.c.bf16 %v6863_v62, %v6858_v48 }
 0x30b   : > { %v5068_v2 = vpack.c.bf16 %v3719_v27, %v3707_v7  ;;  %v3767_v15 = vand.u32 4294901760, %v3766_v37  ;;  %v5080_v7 = vpack.c.bf16 %v7444_v9, %v7439_v57  ;;  %v8324_v37 = vpack.c.bf16 %v8193_v38, %v8191_v0 }
 0x30c   : > { %5059 = vmatpush1.bf16.msra.mxu1 %v8314_v42  ;;  %v3731_v60 = vand.u32 4294901760, %v3730_v33  ;;  %v5084_v33 = vpack.c.bf16 %v7459_v18, %v7454_v21 }
 0x30d   : > { %5061 = vmatprep.subr.bf16.mxu1 %v5060_v5  ;;  %v3754_v5 = vsub.f32 %v7575_v12, %v8025_v51  ;;  %v8341_v51 = vand.u32 4294901760, %v7454_v21  ;;  %v8348_v21 = vld [vmem:[#allocation60_spill] sm:$0xff] }
 0x30e   : > { %v5072_v42 = vpack.c.bf16 %v3743_v55, %v3731_v60  ;;  %v5100_v60 = vpack.c.bf16 %v7538_v45, %v7533_v23  ;;  %v8323_v55 = vpack.c.bf16 %v8188_v24, %v8186_v52 }
 0x30f   : > { %v3755_v44 = vand.u32 4294901760, %v3754_v5  ;;  %v5104_v5 = vpack.c.bf16 %v7559_v46, %v7554_v25 }
 0x310   : > { %5063 = vmatpush1.bf16.msra.mxu1 %v8315_v4  ;;  %v5096_v4 = vpack.c.bf16 %v7512_v50, %v7507_v34 }
 0x311   : > { %5065 = vmatprep.subr.bf16.mxu1 %v5064_v39  ;;  %v5076_v27 = vpack.c.bf16 %v3767_v15, %v3755_v44  ;;  %v8318_v39 = vld [vmem:[#allocation36_spill] sm:$0xff]  ;;  %v5092_v15 = vpack.c.bf16 %v7489_v56, %v7484_v17  ;;  %v8321_v44 = vpack.c.bf16 %v8178_v31, %v8176_v32 }
 0x314   : > { %5067 = vmatpush1.bf16.msra.mxu1 %v8316_v47  ;;  %v5108_v47 = vpack.c.bf16 %v7580_v20, %v7575_v12 }
 0x315   : > { %5069 = vmatprep.subr.bf16.mxu1 %v5068_v2  ;;  %v8322_v2 = vpack.c.bf16 %v8183_v36, %v8181_v41 }
 0x318   : > { %5071 = vmatpush1.bf16.msra.mxu1 %v8317_v22  ;;  %v5088_v22 = vpack.c.bf16 %v7479_v26, %v7474_v28 }
 0x319   : > { %5073 = vmatprep.subr.bf16.mxu1 %v5072_v42  ;;  %v8325_v42 = vpack.c.bf16 %v8198_v19, %v8196_v35 }
 0x31c   : > { %5075 = vmatpush1.bf16.msra.mxu1 %v8318_v39 }
 0x31d   : > { %5077 = vmatprep.subr.bf16.mxu1 %v5076_v27 }
 0x320   : > { %5079 = vmatpush1.bf16.msra.mxu1 %v7323_v14  ;;  %v8320_v14 = vpack.c.bf16 %v8165_v16, %v8163_v1 }
 0x321   : > { %5081 = vmatprep.subr.bf16.mxu1 %v5080_v7  ;;  %v8326_v7 = vpack.c.bf16 %v8203_v61, %v8201_v54 }
 0x323   : > { %3809 = vmatmul.mubr.f32.vlgmr.msra.gmra.mrb[4].mxu1 %v8245_v3 }
 0x324   : > { %5083 = vmatpush1.bf16.msra.mxu1 %v8319_v43  ;;  %3814 = vmatprep.mubr.f32.mxu1 %v8095_v49  ;;  %v8328_v43 = vld [vmem:[#allocation50_spill] sm:$0xff] }
 0x325   : > { %5085 = vmatprep.subr.bf16.mxu1 %v5084_v33 }
 0x327   : > { %3816 = vmatmul.mubr.f32.gmra.mrb[6].mxu1 %v8248_v63 }
 0x328   : > { %5087 = vmatpush1.bf16.msra.mxu1 %v8320_v14  ;;  %3950 = vmatprep.mubr.f32.mxu1 %v8095_v49  ;;  %v8330_v14 = vld [vmem:[#allocation57_spill] sm:$0xff] }
 0x329   : > { %5089 = vmatprep.subr.bf16.mxu1 %v5088_v22 }
 0x32c   : > { %5091 = vmatpush1.bf16.msra.mxu1 %v8321_v44  ;;  %v8332_v44 = vld [vmem:[#allocation81_spill] sm:$0xff] }
 0x32d   : > { %5093 = vmatprep.subr.bf16.mxu1 %v5092_v15  ;;  %v8331_v15 = vld [vmem:[#allocation78_spill] sm:$0xff] }
 0x330   : > { %5095 = vmatpush1.bf16.msra.mxu1 %v8322_v2  ;;  %v8334_v2 = vld [vmem:[#allocation39_spill] sm:$0xff] }
 0x331   : > { %5097 = vmatprep.subr.bf16.mxu1 %v5096_v4  ;;  %v8333_v4 = vld [vmem:[#allocation82_spill] sm:$0xff] }
 0x334   : > { %5099 = vmatpush1.bf16.msra.mxu1 %v8323_v55  ;;  %v8336_v55 = vand.u32 4294901760, %v7439_v57 }
 0x335   : > { %5101 = vmatprep.subr.bf16.mxu1 %v5100_v60  ;;  %v8335_v60 = vld [vmem:[#allocation40_spill] sm:$0xff] }
 0x338   : > { %5103 = vmatpush1.bf16.msra.mxu1 %v8324_v37 }
 0x339   : > { %5105 = vmatprep.subr.bf16.mxu1 %v5104_v5  ;;  %v8337_v5 = vand.u32 4294901760, %v7444_v9  ;;  %v8344_v9 = vand.u32 4294901760, %v8163_v1  ;;  %v8351_v1 = vand.u32 4294901760, %v7484_v17  ;;  %v8358_v17 = vand.u32 4294901760, %v8188_v24 }
 0x33a   : > { %v8365_v24 = vand.u32 4294901760, %v8196_v35 }
 0x33b   : > { %v5144_v37 = vpack.c.bf16 %v8337_v5, %v8336_v55  ;;  %v8345_v55 = vand.u32 4294901760, %v8165_v16  ;;  %v8352_v16 = vand.u32 4294901760, %v7489_v56  ;;  %v8359_v56 = vand.u32 4294901760, %v7533_v23 }
 0x33c   : > { %5107 = vmatpush1.bf16.msra.mxu1 %v8325_v42  ;;  %v8366_v23 = vand.u32 4294901760, %v8198_v19 }
 0x33d   : > { %5109 = vmatprep.subr.bf16.mxu1 %v5108_v47  ;;  %v5150_v5 = vpack.c.bf16 %v8345_v55, %v8344_v9 }
 0x33e   : > { %v7643_v27 = vpop.f32.mrb[4].mxu0 }
 0x33f   : > { %v7645_v39 = vpop.f32.mrb[5].mxu0 }
 0x340   : > { %5111 = vmatpush1.bf16.msra.mxu1 %v8326_v7  ;;  %v8338_v7 = vld [vmem:[#allocation32_spill] sm:$0xff] }
 0x341   : > { %5113 = vmatprep.subr.bf16.mxu1 %v8260_v29 }
 0x342   : > { %v7651_v33 = vpop.f32.mrb[6].mxu0 }
 0x343   : > { %8327 = vst [vmem:[#allocation37_spill] sm:$0xff] %v7651_v33  ;;  %3953 = vmatmul.mubr.f32.vlgmr.msra.gmra.mrb[4].mxu1 %v8328_v43  ;;  %v7654_v22 = vpop.f32.mrb[7].mxu0  ;;  %v8339_v43 = vand.u32 4294901760, %v6858_v48  ;;  %v8343_v33 = vld [vmem:[#allocation54_spill] sm:$0xff]  ;;  %v8347_v48 = vand.u32 4294901760, %v7479_v26  ;;  %v8354_v26 = vand.u32 4294901760, %v8183_v36 }
 0x344   : > { %8329 = vst [vmem:[#allocation38_spill] sm:$0xff] %v7654_v22  ;;  %5115 = vmatpush1.bf16.msra.mxu1 %v8261_v10  ;;  %3958 = vmatprep.mubr.f32.mxu1 %v8095_v49  ;;  %v8342_v22 = vand.u32 4294901760, %v7459_v18  ;;  %v8349_v18 = vand.u32 4294901760, %v8176_v32  ;;  %v8355_v32 = vand.u32 4294901760, %v7507_v34  ;;  %v8361_v36 = vand.u32 4294901760, %v8191_v0 }
 0x345   : > { %5117 = vmatprep.subr.bf16.mxu1 %v8262_v11  ;;  %v8362_v34 = vand.u32 4294901760, %v8193_v38  ;;  %v8368_v0 = vand.u32 4294901760, %v7580_v20  ;;  %v8369_v38 = vand.u32 4294901760, %v8201_v54 }
 0x346   : > { %v5148_v57 = vpack.c.bf16 %v8342_v22, %v8341_v51 }
 0x347   : > { %3961 = vmatmul.mubr.f32.gmra.mrb[6].mxu1 %v8330_v14  ;;  %v8340_v14 = vand.u32 4294901760, %v6863_v62  ;;  %v8346_v62 = vand.u32 4294901760, %v7474_v28  ;;  %v8353_v28 = vand.u32 4294901760, %v8181_v41  ;;  %v8360_v41 = vand.u32 4294901760, %v7538_v45 }
 0x348   : > { %5119 = vmatpush1.bf16.msra.mxu1 %v8263_v53  ;;  %4063 = vmatprep.mubr.f32.mxu1 %v8095_v49  ;;  %v5166_v55 = vpack.c.bf16 %v8362_v34, %v8361_v36  ;;  %v8367_v45 = vand.u32 4294901760, %v7575_v12 }
 0x349   : > { %5121 = vmatprep.subr.bf16.mxu1 %v8264_v59  ;;  %v5146_v40 = vpack.c.bf16 %v8340_v14, %v8339_v43  ;;  %v5158_v22 = vpack.c.bf16 %v8354_v26, %v8353_v28  ;;  %v8357_v14 = vand.u32 4294901760, %v8186_v52  ;;  %v5164_v9 = vpack.c.bf16 %v8360_v41, %v8359_v56 }
 0x34a   : > { %v8364_v52 = vand.u32 4294901760, %v7559_v46 }
 0x34c   : > { %5123 = vmatpush1.bf16.msra.mxu1 %v8265_v13 }
 0x34d   : > { %5125 = vmatprep.subr.bf16.mxu1 %v8270_v8 }
 0x350   : > { %5127 = vmatpush1.bf16.msra.mxu1 %v8271_v30 }
 0x351   : > { %5129 = vmatprep.subr.bf16.mxu1 %v8272_v6 }
 0x354   : > { %5131 = vmatpush1.bf16.msra.mxu1 %v8277_v58 }
 0x355   : > { %5133 = vmatprep.subr.bf16.mxu1 %v8331_v15 }
 0x358   : > { %5135 = vmatpush1.bf16.msra.mxu1 %v8332_v44 }
 0x359   : > { %5137 = vmatprep.subr.bf16.mxu1 %v8333_v4 }
 0x35c   : > { %5139 = vmatpush1.bf16.msra.mxu1 %v8334_v2 }
 0x35d   : > { %5141 = vmatprep.subr.bf16.mxu1 %v8335_v60 }
 0x35e   : > { %v7677_v47 = vpop.f32.mrb[8].mxu0 }
 0x35f   : > { %v7679_v42 = vpop.f32.mrb[9].mxu0 }
 0x360   : > { %5143 = vmatpush1.bf16.msra.mxu1 %v8338_v7 }
 0x361   : > { %5145 = vmatprep.subr.bf16.mxu1 %v5144_v37  ;;  %v5152_v37 = vpack.c.bf16 %v8347_v48, %v8346_v62  ;;  %v5170_v62 = vpack.c.bf16 %v8366_v23, %v8365_v24  ;;  %v5172_v48 = vpack.c.bf16 %v8368_v0, %v8367_v45 }
 0x363   : > { %4067 = vmatmul.mubr.f32.vlgmr.msra.gmra.mrb[4].mxu1 %v8343_v33  ;;  %v5156_v33 = vpack.c.bf16 %v8352_v16, %v8351_v1 }
 0x364   : > { %5147 = vmatpush1.bf16.msra.mxu1 %v5146_v40  ;;  %4072 = vmatprep.mubr.f32.mxu1 %v8095_v49  ;;  %v8350_v40 = vand.u32 4294901760, %v8178_v31  ;;  %v8356_v31 = vand.u32 4294901760, %v7512_v50  ;;  %v8363_v50 = vand.u32 4294901760, %v7554_v25  ;;  %v8370_v25 = vand.u32 4294901760, %v8203_v61 }
 0x365   : > { %5149 = vmatprep.subr.bf16.mxu1 %v5148_v57  ;;  %v5162_v57 = vpack.c.bf16 %v8358_v17, %v8357_v14 }
 0x366   : > { %v5154_v51 = vpack.c.bf16 %v8350_v40, %v8349_v18  ;;  %v5160_v43 = vpack.c.bf16 %v8356_v31, %v8355_v32 }
 0x367   : > { %4076 = vmatmul.mubr.f32.gmra.mrb[6].mxu1 %v8348_v21 }
 0x368   : > { %5151 = vmatpush1.bf16.msra.mxu1 %v5150_v5  ;;  %4242 = vmatprep.mubr.f32.mxu1 %v8095_v49  ;;  %v5168_v5 = vpack.c.bf16 %v8364_v52, %v8363_v50 }
 0x369   : > { %5153 = vmatprep.subr.bf16.mxu1 %v5152_v37  ;;  %v5174_v37 = vpack.c.bf16 %v8370_v25, %v8369_v38 }
 0x36c   : > { %5155 = vmatpush1.bf16.msra.mxu1 %v5154_v51 }
 0x36d   : > { %5157 = vmatprep.subr.bf16.mxu1 %v5156_v33 }
 0x370   : > { %5159 = vmatpush1.bf16.msra.mxu1 %v5158_v22 }
 0x371   : > { %5161 = vmatprep.subr.bf16.mxu1 %v5160_v43 }
 0x374   : > { %5163 = vmatpush1.bf16.msra.mxu1 %v5162_v57 }
 0x375   : > { %5165 = vmatprep.subr.bf16.mxu1 %v5164_v9 }
 0x378   : > { %5167 = vmatpush1.bf16.msra.mxu1 %v5166_v55 }
 0x379   : > { %5169 = vmatprep.subr.bf16.mxu1 %v5168_v5 }
 0x37c   : > { %5171 = vmatpush1.bf16.msra.mxu1 %v5170_v62 }
 0x37d   : > { %5173 = vmatprep.subr.bf16.mxu1 %v5172_v48 }
 0x380   : > { %5175 = vmatpush1.bf16.msra.mxu1 %v5174_v37 }
 0x381   : > { %5208 = vmatprep.subr.bf16.mxu1 %v8260_v29 }
 0x383   : > { %4244 = vmatmul.mubr.f32.vlgmr.msra.gmra.mrb[4].mxu1 %v8245_v3  ;;  %v8371_v3 = vld [vmem:[#allocation37_spill] sm:$0xff] }
 0x384   : > { %5216 = vmatpush1.bf16.msra.mxu1 %v8261_v10  ;;  %4249 = vmatprep.mubr.f32.mxu1 %v8095_v49 }
 0x385   : > { %5209 = vmatprep.subr.bf16.mxu1 %v8262_v11  ;;  %v8372_v11 = vld [vmem:[#allocation38_spill] sm:$0xff] }
 0x387   : > { %4251 = vmatmul.mubr.f32.gmra.mrb[6].mxu1 %v8248_v63 }
 0x388   : > { %5217 = vmatpush1.bf16.msra.mxu1 %v8263_v53  ;;  %4360 = vmatprep.mubr.f32.mxu1 %v8095_v49 }
 0x389   : > { %5210 = vmatprep.subr.bf16.mxu1 %v8264_v59 }
 0x38c   : > { %5218 = vmatpush1.bf16.msra.mxu1 %v8265_v13 }
 0x38d   : > { %5211 = vmatprep.subr.bf16.mxu1 %v8270_v8 }
 0x390   : > { %5219 = vmatpush1.bf16.msra.mxu1 %v8271_v30 }
 0x391   : > { %5212 = vmatprep.subr.bf16.mxu1 %v8272_v6 }
 0x394   : > { %5220 = vmatpush1.bf16.msra.mxu1 %v8277_v58 }
 0x395   : > { %5213 = vmatprep.subr.bf16.mxu1 %v8331_v15 }
 0x398   : > { %5221 = vmatpush1.bf16.msra.mxu1 %v8332_v44 }
 0x399   : > { %5214 = vmatprep.subr.bf16.mxu1 %v8333_v4 }
 0x39c   : > { %5222 = vmatpush1.bf16.msra.mxu1 %v8334_v2 }
 0x39d   : > { %5215 = vmatprep.subr.bf16.mxu1 %v8335_v60 }
 0x3a0   : > { %5223 = vmatpush1.bf16.msra.mxu1 %v8338_v7 }
 0x3a3   : > { %4362 = vmatmul.mubr.f32.vlgmr.msra.gmra.mrb[6].mxu1 %v8248_v63 }
 0x3b6   : > { %v3416_v49 = vpop.f32.mrb[0].mxu1 }
 0x3b7   : > { %v5224_v19 = vadd.f32 %v3416_v49, %v7643_v27  ;;  %v3418_v61 = vpop.f32.mrb[1].mxu1 }
 0x3b8   : > { %v5225_v35 = vadd.f32 %v3418_v61, %v7645_v39 }
 0x3b9   : > { %3428 = vst [vmem:[%s289_s26] sm:$0xff] %v5224_v19 }
 0x3ba   : > { %3429 = vst [vmem:[%s289_s26 + $0x8] sm:$0xff] %v5225_v35  ;;  %v3423_v54 = vpop.f32.mrb[2].mxu1 }
 0x3bb   : > { %v5226_v29 = vadd.f32 %v3423_v54, %v8371_v3  ;;  %v3425_v10 = vpop.f32.mrb[3].mxu1 }
 0x3bc   : > { %v5227_v53 = vadd.f32 %v3425_v10, %v8372_v11 }
 0x3bd   : > { %3430 = vst [vmem:[%s289_s26 + $0x10] sm:$0x3] %v5226_v29 }
 0x3be   : > { %3431 = vst [vmem:[%s289_s26 + $0x18] sm:$0x3] %v5227_v53 }
 0x456   : > { %v4245_v63 = vpop.f32.mrb[4].mxu1 }
 0x457   : > { %v5228_v59 = vadd.f32 %v7677_v47, %v4245_v63  ;;  %v4247_v13 = vpop.f32.mrb[5].mxu1 }
 0x458   : > { %v5229_v8 = vadd.f32 %v7679_v42, %v4247_v13 }
 0x459   : > { %4368 = vst [vmem:[%s294_s24] sm:$0xff] %v5228_v59 }
 0x45a   : > { %4369 = vst [vmem:[%s294_s24 + $0x8] sm:$0xff] %v5229_v8 }
 0x476   : > { %v4363_v30 = vpop.f32.mrb[6].mxu1 }
 0x477   : > { %4370 = vst [vmem:[%s294_s24 + $0x10] sm:$0x3] %v4363_v30  ;;  %v4365_v6 = vpop.f32.mrb[7].mxu1 }
 0x478   : > { %4371 = vst [vmem:[%s294_s24 + $0x18] sm:$0x3] %v4365_v6 }
 0x479 PF: > { %s19_s21 = sadd.s32 1, %s5442_s21  }
 0x47a   : > { %p16_p5 = scmp.ge.s32.totalorder %s19_s21, 4  }
 0x47c   :  { %18 = sbr.rel (!%p16_p5) target bundleno = 2 (0x2), region = 93 }
 0x483   :  { %4409 = vsyncpa [#allocation3], 1 }
 0x484   :  { %4411 = vsyncpa [#allocation3 + $0x1], 1 }
 0x485   :  { %4412 = vsyncpa [#allocation5], 1 }

</bundles_post_ra>
